<compile_context>
chip_gen: v7x
topology: tpu7x:2x2x1
jax: 0.10.0
libtpu: 0.0.40
codegen_flags: <defaults>
</compile_context>

<pallas_src>
import functools
import math

import jax
import jax.numpy as jnp
from jax import lax
from jax.experimental import pallas as pl
from jax.experimental.pallas import tpu as pltpu


# ----------------------------- in-kernel helpers -----------------------------
def _gelu(x):
    # tanh-approximate GELU (EUP tanh); gelu(0) == 0 keeps width-padding zeros.
    c = 0.7978845608028654  # sqrt(2/pi)
    return 0.5 * x * (1.0 + jnp.tanh(c * (x + 0.044715 * x * x * x)))


# ------------------------------- fused kernel --------------------------------
def _fused_kernel(
    x_ref,
    emb_w_ref, emb_b_ref, fc_w_ref, fc_b_ref,
    c1w_ref, c1b_ref, c2w_ref, c2b_ref, pjw_ref, pjb_ref,
    tfd_w_ref, tfd_b_ref,
    cre_ref, cim_ref, ec_ref, wr_ref, wi_ref, rsel_ref,
    iar_ref, iai_ref, sbias_ref,
    pred_w_ref, pred_b_ref,
    trend_ref, sqerr_ref,
    *, T, d_model, width, Kmax, dils):
    f32 = jnp.float32
    bf16 = jnp.bfloat16
    W = width

    x = x_ref[...]                                   # (T, c_in) f32

    tvec = lax.broadcasted_iota(jnp.int32, (T, 1), 0)
    mask_cache = {}                                  # trace-time hoist/dedup

    def _mask(o):
        if o not in mask_cache:
            valid = jnp.logical_and(tvec + o >= 0, tvec + o < T)
            mask_cache[o] = jnp.where(valid, 1.0, 0.0).astype(f32)
        return mask_cache[o]

    def shift(v, o):
        """y[t] = v[t+o] if 0 <= t+o < T else 0 (zero 'same' padding)."""
        if o == 0:
            return v
        if o >= T or o <= -T:
            return jnp.zeros_like(v)
        return pltpu.roll(v, (-o) % T, axis=0) * _mask(o)

    def circ(v, o):
        """y[t] = v[(t+o) mod T] (circular padding)."""
        if o % T == 0:
            return v
        return pltpu.roll(v, (-o) % T, axis=0)

    def mm(a, b):                                    # bf16 operands, f32 accum
        return jnp.dot(a.astype(bf16), b.astype(bf16),
                       preferred_element_type=f32)

    # --- conv_embed: Conv1d(c_in, d_model, k=3, padding=1, circular), folded -
    cols0 = jnp.concatenate([circ(x, -1), x, circ(x, 1)], axis=1)
    h = mm(cols0, emb_w_ref[...]) + emb_b_ref[...]              # (T, d_model)

    # --- Distangle.input_fc ---------------------------------------------------
    h = mm(h, fc_w_ref[...]) + fc_b_ref[...]                    # (T, W)

    # --- DilatedConvEncoder: taps folded into single matmuls ------------------
    nblk = len(dils)
    for i, d in enumerate(dils):
        if i == nblk - 1:                 # only the final block has a projector
            residual = mm(h, pjw_ref[...]) + pjb_ref[...]
        else:
            residual = h
        g = _gelu(h)
        w1 = c1w_ref[i]                                         # (3W, W) bf16
        if d < T:
            c1 = jnp.concatenate([shift(g, -d), g, shift(g, d)], axis=1)
            h1 = mm(c1, w1) + c1b_ref[i]
        else:                             # +-d taps read only zero padding
            h1 = mm(g, w1[W:2 * W, :]) + c1b_ref[i]
        g1 = _gelu(h1)
        w2 = c2w_ref[i]
        if d < T:
            c2 = jnp.concatenate([shift(g1, -d), g1, shift(g1, d)], axis=1)
            h2 = mm(c2, w2) + c2b_ref[i]
        else:
            h2 = mm(g1, w2[W:2 * W, :]) + c2b_ref[i]
        h = h2 + residual

    feat = h[:, :d_model]                 # (T, d_model); padded tail is exactly 0

    # --- trend: all causal tfd convs as one im2col matmul ---------------------
    cols = jnp.concatenate([shift(feat, -m) for m in range(Kmax)], axis=1)
    trend = mm(cols, tfd_w_ref[...]) + tfd_b_ref[...]           # (T, comp)
    trend_ref[...] = trend

    # --- season: BandedFourierLayer (rfft -> band product -> irfft) ----------
    # feat_exp[s, c*comp+o] = feat[s, c]   (0/1 expansion matmul)
    feat_exp = mm(feat, ec_ref[...])                            # (T, C*comp)
    xr = mm(cre_ref[...], feat_exp)                             # (F, C*comp)
    xi = mm(cim_ref[...], feat_exp)
    wr = wr_ref[...]                                            # (F, C*comp) f32
    wi = wi_ref[...]
    zr = xr * wr - xi * wi                                      # complex band product
    zi = xr * wi + xi * wr
    yr = mm(zr, rsel_ref[...])                                  # (F, comp) sum over c
    yi = mm(zi, rsel_ref[...])
    season = mm(iar_ref[...], yr) + mm(iai_ref[...], yi) + sbias_ref[...]

    # --- pred head + per-row squared error (final mean in the wrapper) -------
    rep = jnp.concatenate([trend, season], axis=1)              # (T, d_model)
    pred = mm(rep, pred_w_ref[...]) + pred_b_ref[...]           # (T, c_in)
    diff = pred - x
    sqerr_ref[...] = jnp.sum(diff * diff, axis=1, keepdims=True)  # (T, 1)


# ------------------------------ parameters -----------------------------------
def _rnd(key, shape, scale=0.1):
    return scale * jax.random.normal(key, shape, dtype=jnp.float32)


def init_params(key, c_in, d_model, input_len, hidden=64, depth=10):
    """Conv weights stored as (K, Cin, Cout) == torch Conv1d weight transposed."""
    keys = iter(jax.random.split(key, 128))
    comp = d_model // 2
    p = {
        "conv_embed_w": _rnd(next(keys), (3, c_in, d_model)),
        "conv_embed_b": _rnd(next(keys), (1, d_model)),
        "input_fc_w": _rnd(next(keys), (d_model, hidden)),
        "input_fc_b": _rnd(next(keys), (1, hidden)),
    }
    channels = [hidden] * depth + [d_model]
    blocks = []
    in_ch = hidden
    for i, out_ch in enumerate(channels):
        final = i == len(channels) - 1
        blk = {
            "conv1_w": _rnd(next(keys), (3, in_ch, out_ch)),
            "conv1_b": _rnd(next(keys), (1, out_ch)),
            "conv2_w": _rnd(next(keys), (3, out_ch, out_ch)),
            "conv2_b": _rnd(next(keys), (1, out_ch)),
        }
        if in_ch != out_ch or final:
            blk["proj_w"] = _rnd(next(keys), (1, in_ch, out_ch))
            blk["proj_b"] = _rnd(next(keys), (1, out_ch))
        blocks.append(blk)
        in_ch = out_ch
    p["blocks"] = blocks

    kernels = [2 ** i for i in range(0, int(math.log2(input_len)) + 1)]
    p["tfd"] = [
        {"w": _rnd(next(keys), (k, d_model, comp)),
         "b": _rnd(next(keys), (1, comp))}
        for k in kernels
    ]
    F = input_len // 2 + 1
    p["sfd_wr"] = _rnd(next(keys), (F, d_model, comp))
    p["sfd_wi"] = _rnd(next(keys), (F, d_model, comp))
    p["sfd_br"] = _rnd(next(keys), (F, comp))
    p["sfd_bi"] = _rnd(next(keys), (F, comp))
    p["pred_w"] = _rnd(next(keys), (d_model, c_in))
    p["pred_b"] = _rnd(next(keys), (1, c_in))
    return p


def pack_params(params, *, c_in, d_model, input_len, hidden=64):
    """One-time prep: tap-stacked conv weights, combined tfd weight, lane-dense
    band weights, per-sequence DFT matrices (no batch block-diagonal)."""
    T = input_len
    F = T // 2 + 1
    comp = d_model // 2
    W = max(hidden, d_model)
    f32, bf16 = jnp.float32, jnp.bfloat16

    # conv_embed (taps stacked along K) / input_fc (padded to W)
    emb_w = params["conv_embed_w"].reshape(3 * c_in, d_model).astype(bf16)
    emb_b = params["conv_embed_b"].astype(f32)
    fc_w = jnp.zeros((d_model, W), f32).at[:, :hidden].set(
        params["input_fc_w"]).astype(bf16)
    fc_b = jnp.zeros((1, W), f32).at[:, :hidden].set(params["input_fc_b"])

    # ConvBlocks: taps stacked to (3W, W), zero padded up to W
    blocks = params["blocks"]
    nblk = len(blocks)
    c1w = jnp.zeros((nblk, 3 * W, W), f32)
    c1b = jnp.zeros((nblk, 1, W), f32)
    c2w = jnp.zeros((nblk, 3 * W, W), f32)
    c2b = jnp.zeros((nblk, 1, W), f32)
    pjw = jnp.zeros((W, W), f32)
    pjb = jnp.zeros((1, W), f32)
    for i, blk in enumerate(blocks):
        assert ("proj_w" in blk) == (i == nblk - 1), "only final block projects"
        w1, b1 = blk["conv1_w"], blk["conv1_b"]
        w2, b2 = blk["conv2_w"], blk["conv2_b"]
        for j in range(3):
            c1w = c1w.at[i, j * W:j * W + w1.shape[1], :w1.shape[2]].set(w1[j])
            c2w = c2w.at[i, j * W:j * W + w2.shape[1], :w2.shape[2]].set(w2[j])
        c1b = c1b.at[i, :, :b1.shape[1]].set(b1)
        c2b = c2b.at[i, :, :b2.shape[1]].set(b2)
        if "proj_w" in blk:
            pw, pb = blk["proj_w"][0], blk["proj_b"]
            pjw = pjw.at[:pw.shape[0], :pw.shape[1]].set(pw)
            pjb = pjb.at[:, :pb.shape[1]].set(pb)
    c1w, c2w, pjw = c1w.astype(bf16), c2w.astype(bf16), pjw.astype(bf16)
    # TODO(synk): at production widths, stream per-block weights from HBM
    # (pl.ANY + make_async_copy) instead of keeping the full stack resident.

    # tfd: fold all causal convs (+ the 1/n mean) into one im2col weight.
    kernels = [2 ** i for i in range(int(math.log2(T)) + 1)]
    Kmax = max(kernels)
    tfd_w = jnp.zeros((Kmax * d_model, comp), f32)
    tfd_b = jnp.zeros((1, comp), f32)
    for k, tp in zip(kernels, params["tfd"]):
        w_rev = tp["w"][::-1].reshape(k * d_model, comp)
        tfd_w = tfd_w.at[:k * d_model, :].add(w_rev)
        tfd_b = tfd_b + tp["b"]
    inv_nk = 1.0 / float(len(kernels))
    tfd_w = (tfd_w * inv_nk).astype(bf16)
    tfd_b = tfd_b * inv_nk

    # BandedFourierLayer (num_bands=1, band=0): per-sequence real-DFT matrices
    t = jnp.arange(T, dtype=f32)
    f = jnp.arange(F, dtype=f32)
    ang = 2.0 * math.pi * f[:, None] * t[None, :] / T
    cre = jnp.cos(ang)                                   # rfft real     (F, T)
    cim = -jnp.sin(ang)                                  # rfft imag
    if T % 2 == 0:
        special = (f == 0) | (f == T // 2)
    else:
        special = (f == 0)
    wgt = jnp.where(special, 1.0, 2.0) / T
    iar = (wgt[:, None] * jnp.cos(ang)).T                # irfft from Re (T, F)
    iai = (-wgt[:, None] * jnp.sin(ang)).T               # irfft from Im
    # 0/1 expansion (C, C*comp) and channel-sum selection (C*comp, comp)
    ec = jnp.kron(jnp.eye(d_model, dtype=f32), jnp.ones((1, comp), f32))
    rsel = jnp.tile(jnp.eye(comp, dtype=f32), (d_model, 1))
    # lane-dense band weights: (F, C*comp) with [f, c*comp+o] = w[f, c, o]
    wr_flat = params["sfd_wr"].reshape(F, d_model * comp)
    wi_flat = params["sfd_wi"].reshape(F, d_model * comp)
    # bias folded through the irfft at pack time (f32 for accuracy)
    sbias = iar @ params["sfd_br"] + iai @ params["sfd_bi"]      # (T, comp)

    pred_w = params["pred_w"].astype(bf16)
    pred_b = params["pred_b"].astype(f32)

    ops = (emb_w, emb_b, fc_w, fc_b, c1w, c1b, c2w, c2b, pjw, pjb,
           tfd_w, tfd_b,
           cre.astype(bf16), cim.astype(bf16), ec.astype(bf16),
           wr_flat, wi_flat, rsel.astype(bf16),
           iar.astype(bf16), iai.astype(bf16), sbias,
           pred_w, pred_b)
    meta = dict(T=T, c_in=c_in, d_model=d_model, comp=comp, width=W,
                Kmax=Kmax, dils=tuple(2 ** i for i in range(nblk)))
    return {"ops": ops, "meta": meta}


# -------------------------------- forward ------------------------------------
def distangle_mae_forward(packed, x, *, alpha=1.0):
    """x: (B, T, c_in) float32 -> (x_trend, loss). One fused pallas_call,
    gridded over batch (parallel across TensorCores)."""
    meta = packed["meta"]
    B, T, c_in = x.shape
    assert T == meta["T"] and c_in == meta["c_in"]
    comp = meta["comp"]
    x_flat = x.astype(jnp.float32).reshape(B * T, c_in)

    kern = functools.partial(
        _fused_kernel, T=T, d_model=meta["d_model"], width=meta["width"],
        Kmax=meta["Kmax"], dils=meta["dils"])

    def _const_spec(a):                  # whole-array block, constant across grid
        n = a.ndim
        return pl.BlockSpec(a.shape, lambda b, _n=n: (0,) * _n)

    in_specs = [pl.BlockSpec((T, c_in), lambda b: (b, 0))]
    in_specs += [_const_spec(a) for a in packed["ops"]]
    out_specs = [pl.BlockSpec((T, comp), lambda b: (b, 0)),
                 pl.BlockSpec((T, 1), lambda b: (b, 0))]

    trend_flat, sqerr = pl.pallas_call(
        kern,
        out_shape=(jax.ShapeDtypeStruct((B * T, comp), jnp.float32),
                   jax.ShapeDtypeStruct((B * T, 1), jnp.float32)),
        grid_spec=pltpu.PrefetchScalarGridSpec(
            num_scalar_prefetch=0, grid=(B,),
            in_specs=in_specs, out_specs=out_specs),
        compiler_params=pltpu.CompilerParams(
            dimension_semantics=("parallel",),
            vmem_limit_bytes=48 * 1024 * 1024),
    )(x_flat, *packed["ops"])

    x_trend = trend_flat.reshape(B, T, comp)
    loss_total = jnp.sum(sqerr) / float(B * T * c_in)     # MSE (mean over all elems)
    # TODO(synk): RetroMaskedAutoEncoder (season_mae / trend_mae) not provided;
    # both are treated as identity with zero reconstruction loss.
    loss_s = jnp.float32(0.0)
    loss_t = jnp.float32(0.0)
    loss = (loss_s + loss_t * alpha) / (1.0 + alpha) + loss_total
    return x_trend, loss


# ---------------------------------- main --------------------------------------
if __name__ == "__main__":
    B, c_in, d_model, input_len = 2, 4, 32, 16
    key = jax.random.PRNGKey(0)
    pkey, xkey = jax.random.split(key)
    params = init_params(pkey, c_in, d_model, input_len)
    packed = pack_params(params, c_in=c_in, d_model=d_model,
                         input_len=input_len, hidden=64)
    x = jax.random.normal(xkey, (B, input_len, c_in), dtype=jnp.float32)

    x_trend, loss = distangle_mae_forward(packed, x, alpha=1.0)
    jax.block_until_ready((x_trend, loss))

    assert x_trend.shape == (B, input_len, d_model // 2)
    assert loss.shape == ()
    assert bool(jnp.isfinite(loss))
    assert bool(jnp.all(jnp.isfinite(x_trend)))
    print("KERNEL_OK")
</pallas_src>

<mosaic_0001>
module attributes {stable_mosaic.version = 11 : i64} {
  func.func @_fused_kernel(%arg0: i32, %arg1: memref<16x4xf32, #tpu.memory_space<vmem>>, %arg2: memref<12x32xbf16, #tpu.memory_space<vmem>>, %arg3: memref<1x32xf32, #tpu.memory_space<vmem>>, %arg4: memref<32x64xbf16, #tpu.memory_space<vmem>>, %arg5: memref<1x64xf32, #tpu.memory_space<vmem>>, %arg6: memref<11x192x64xbf16, #tpu.memory_space<vmem>>, %arg7: memref<11x1x64xf32, #tpu.memory_space<vmem>>, %arg8: memref<11x192x64xbf16, #tpu.memory_space<vmem>>, %arg9: memref<11x1x64xf32, #tpu.memory_space<vmem>>, %arg10: memref<64x64xbf16, #tpu.memory_space<vmem>>, %arg11: memref<1x64xf32, #tpu.memory_space<vmem>>, %arg12: memref<512x16xbf16, #tpu.memory_space<vmem>>, %arg13: memref<1x16xf32, #tpu.memory_space<vmem>>, %arg14: memref<9x16xbf16, #tpu.memory_space<vmem>>, %arg15: memref<9x16xbf16, #tpu.memory_space<vmem>>, %arg16: memref<32x512xbf16, #tpu.memory_space<vmem>>, %arg17: memref<9x512xf32, #tpu.memory_space<vmem>>, %arg18: memref<9x512xf32, #tpu.memory_space<vmem>>, %arg19: memref<512x16xbf16, #tpu.memory_space<vmem>>, %arg20: memref<16x9xbf16, #tpu.memory_space<vmem>>, %arg21: memref<16x9xbf16, #tpu.memory_space<vmem>>, %arg22: memref<16x16xf32, #tpu.memory_space<vmem>>, %arg23: memref<32x4xbf16, #tpu.memory_space<vmem>>, %arg24: memref<1x4xf32, #tpu.memory_space<vmem>>, %arg25: memref<16x16xf32, #tpu.memory_space<vmem>>, %arg26: memref<16x1xf32, #tpu.memory_space<vmem>>) attributes {dimension_semantics = [#tpu.dimension_semantics<parallel>], iteration_bounds = array<i64: 2>, scalar_prefetch = 0 : i64, scratch_operands = 0 : i64, tpu.core_type = #tpu.core_type<tc>, window_params = [{transform_indices = @transform_0, window_bounds = array<i64: 16, 4>}, {pipeline_mode = #tpu.pipeline_mode<synchronous>, transform_indices = @transform_1, window_bounds = array<i64: 12, 32>}, {pipeline_mode = #tpu.pipeline_mode<synchronous>, transform_indices = @transform_2, window_bounds = array<i64: 1, 32>}, {pipeline_mode = #tpu.pipeline_mode<synchronous>, transform_indices = @transform_3, window_bounds = array<i64: 32, 64>}, {pipeline_mode = #tpu.pipeline_mode<synchronous>, transform_indices = @transform_4, window_bounds = array<i64: 1, 64>}, {pipeline_mode = #tpu.pipeline_mode<synchronous>, transform_indices = @transform_5, window_bounds = array<i64: 11, 192, 64>}, {pipeline_mode = #tpu.pipeline_mode<synchronous>, transform_indices = @transform_6, window_bounds = array<i64: 11, 1, 64>}, {pipeline_mode = #tpu.pipeline_mode<synchronous>, transform_indices = @transform_7, window_bounds = array<i64: 11, 192, 64>}, {pipeline_mode = #tpu.pipeline_mode<synchronous>, transform_indices = @transform_8, window_bounds = array<i64: 11, 1, 64>}, {pipeline_mode = #tpu.pipeline_mode<synchronous>, transform_indices = @transform_9, window_bounds = array<i64: 64, 64>}, {pipeline_mode = #tpu.pipeline_mode<synchronous>, transform_indices = @transform_10, window_bounds = array<i64: 1, 64>}, {pipeline_mode = #tpu.pipeline_mode<synchronous>, transform_indices = @transform_11, window_bounds = array<i64: 512, 16>}, {pipeline_mode = #tpu.pipeline_mode<synchronous>, transform_indices = @transform_12, window_bounds = array<i64: 1, 16>}, {pipeline_mode = #tpu.pipeline_mode<synchronous>, transform_indices = @transform_13, window_bounds = array<i64: 9, 16>}, {pipeline_mode = #tpu.pipeline_mode<synchronous>, transform_indices = @transform_14, window_bounds = array<i64: 9, 16>}, {pipeline_mode = #tpu.pipeline_mode<synchronous>, transform_indices = @transform_15, window_bounds = array<i64: 32, 512>}, {pipeline_mode = #tpu.pipeline_mode<synchronous>, transform_indices = @transform_16, window_bounds = array<i64: 9, 512>}, {pipeline_mode = #tpu.pipeline_mode<synchronous>, transform_indices = @transform_17, window_bounds = array<i64: 9, 512>}, {pipeline_mode = #tpu.pipeline_mode<synchronous>, transform_indices = @transform_18, window_bounds = array<i64: 512, 16>}, {pipeline_mode = #tpu.pipeline_mode<synchronous>, transform_indices = @transform_19, window_bounds = array<i64: 16, 9>}, {pipeline_mode = #tpu.pipeline_mode<synchronous>, transform_indices = @transform_20, window_bounds = array<i64: 16, 9>}, {pipeline_mode = #tpu.pipeline_mode<synchronous>, transform_indices = @transform_21, window_bounds = array<i64: 16, 16>}, {pipeline_mode = #tpu.pipeline_mode<synchronous>, transform_indices = @transform_22, window_bounds = array<i64: 32, 4>}, {pipeline_mode = #tpu.pipeline_mode<synchronous>, transform_indices = @transform_23, window_bounds = array<i64: 1, 4>}, {transform_indices = @transform_24, window_bounds = array<i64: 16, 16>}, {transform_indices = @transform_25, window_bounds = array<i64: 16, 1>}]} {
    %c0 = arith.constant 0 : index
    %c0_0 = arith.constant 0 : index
    %0 = vector.load %arg1[%c0, %c0_0] : memref<16x4xf32, #tpu.memory_space<vmem>>, vector<16x4xf32>
    %1 = tpu.iota {dimensions = array<i32: 0>} : vector<16x1xi32>
    %c1_i32 = arith.constant 1 : i32
    %2 = tpu.dynamic_rotate %0 by %c1_i32 dim 0 : vector<16x4xf32>, i32 -> vector<16x4xf32>
    %c15_i32 = arith.constant 15 : i32
    %3 = tpu.dynamic_rotate %0 by %c15_i32 dim 0 : vector<16x4xf32>, i32 -> vector<16x4xf32>
    %4 = tpu.concatenate %2, %0, %3 in 1 : vector<16x4xf32>, vector<16x4xf32>, vector<16x4xf32> -> vector<16x12xf32>
    %c0_1 = arith.constant 0 : index
    %c0_2 = arith.constant 0 : index
    %5 = vector.load %arg2[%c0_1, %c0_2] : memref<12x32xbf16, #tpu.memory_space<vmem>>, vector<12x32xbf16>
    %6 = arith.truncf %4 : vector<16x12xf32> to vector<16x12xbf16>
    %cst = arith.constant dense<0.000000e+00> : vector<16x32xf32>
    %7 = tpu.matmul %6, %5, %cst {dimension_numbers = #tpu.dot_dimension_numbers<[1], [0], [0], [1], [0, 0, 1, 1], [], []>} : vector<16x12xbf16>, vector<12x32xbf16>, vector<16x32xf32> -> vector<16x32xf32>
    %c0_3 = arith.constant 0 : index
    %c0_4 = arith.constant 0 : index
    %8 = vector.load %arg3[%c0_3, %c0_4] : memref<1x32xf32, #tpu.memory_space<vmem>>, vector<1x32xf32>
    %9 = vector.broadcast %8 : vector<1x32xf32> to vector<16x32xf32>
    %10 = arith.addf %7, %9 : vector<16x32xf32>
    %c0_5 = arith.constant 0 : index
    %c0_6 = arith.constant 0 : index
    %11 = vector.load %arg4[%c0_5, %c0_6] : memref<32x64xbf16, #tpu.memory_space<vmem>>, vector<32x64xbf16>
    %12 = arith.truncf %10 : vector<16x32xf32> to vector<16x32xbf16>
    %cst_7 = arith.constant dense<0.000000e+00> : vector<16x64xf32>
    %13 = tpu.matmul %12, %11, %cst_7 {dimension_numbers = #tpu.dot_dimension_numbers<[1], [0], [0], [1], [0, 0, 1, 1], [], []>} : vector<16x32xbf16>, vector<32x64xbf16>, vector<16x64xf32> -> vector<16x64xf32>
    %c0_8 = arith.constant 0 : index
    %c0_9 = arith.constant 0 : index
    %14 = vector.load %arg5[%c0_8, %c0_9] : memref<1x64xf32, #tpu.memory_space<vmem>>, vector<1x64xf32>
    %15 = vector.broadcast %14 : vector<1x64xf32> to vector<16x64xf32>
    %16 = arith.addf %13, %15 : vector<16x64xf32>
    %cst_10 = arith.constant 5.000000e-01 : f32
    %17 = vector.broadcast %cst_10 : f32 to vector<16x64xf32>
    %18 = arith.mulf %17, %16 : vector<16x64xf32>
    %cst_11 = arith.constant 4.471500e-02 : f32
    %19 = vector.broadcast %cst_11 : f32 to vector<16x64xf32>
    %20 = arith.mulf %19, %16 : vector<16x64xf32>
    %21 = arith.mulf %20, %16 : vector<16x64xf32>
    %22 = arith.mulf %21, %16 : vector<16x64xf32>
    %23 = arith.addf %16, %22 : vector<16x64xf32>
    %cst_12 = arith.constant 0.797884583 : f32
    %24 = vector.broadcast %cst_12 : f32 to vector<16x64xf32>
    %25 = arith.mulf %24, %23 : vector<16x64xf32>
    %26 = math.tanh %25 : vector<16x64xf32>
    %cst_13 = arith.constant 1.000000e+00 : f32
    %27 = vector.broadcast %cst_13 : f32 to vector<16x64xf32>
    %28 = arith.addf %27, %26 : vector<16x64xf32>
    %29 = arith.mulf %18, %28 : vector<16x64xf32>
    %c0_14 = arith.constant 0 : index
    %c0_15 = arith.constant 0 : index
    %c0_16 = arith.constant 0 : index
    %30 = vector.load %arg6[%c0_14, %c0_15, %c0_16] : memref<11x192x64xbf16, #tpu.memory_space<vmem>>, vector<1x192x64xbf16>
    %31 = vector.shape_cast %30 : vector<1x192x64xbf16> to vector<192x64xbf16>
    %c1_i32_17 = arith.constant 1 : i32
    %32 = tpu.dynamic_rotate %29 by %c1_i32_17 dim 0 : vector<16x64xf32>, i32 -> vector<16x64xf32>
    %c-1_i32 = arith.constant -1 : i32
    %33 = vector.broadcast %c-1_i32 : i32 to vector<16x1xi32>
    %34 = arith.addi %1, %33 : vector<16x1xi32>
    %c0_i32 = arith.constant 0 : i32
    %35 = vector.broadcast %c0_i32 : i32 to vector<16x1xi32>
    %36 = arith.cmpi sge, %34, %35 : vector<16x1xi32>
    %c-1_i32_18 = arith.constant -1 : i32
    %37 = vector.broadcast %c-1_i32_18 : i32 to vector<16x1xi32>
    %38 = arith.addi %1, %37 : vector<16x1xi32>
    %c16_i32 = arith.constant 16 : i32
    %39 = vector.broadcast %c16_i32 : i32 to vector<16x1xi32>
    %40 = arith.cmpi slt, %38, %39 : vector<16x1xi32>
    %41 = arith.andi %36, %40 : vector<16x1xi1>
    %cst_19 = arith.constant 1.000000e+00 : f32
    %cst_20 = arith.constant 0.000000e+00 : f32
    %42 = vector.broadcast %cst_19 : f32 to vector<16x1xf32>
    %43 = vector.broadcast %cst_20 : f32 to vector<16x1xf32>
    %44 = arith.select %41, %42, %43 : vector<16x1xi1>, vector<16x1xf32>
    %45 = vector.broadcast %44 : vector<16x1xf32> to vector<16x64xf32>
    %46 = arith.mulf %32, %45 : vector<16x64xf32>
    %c15_i32_21 = arith.constant 15 : i32
    %47 = tpu.dynamic_rotate %29 by %c15_i32_21 dim 0 : vector<16x64xf32>, i32 -> vector<16x64xf32>
    %c1_i32_22 = arith.constant 1 : i32
    %48 = vector.broadcast %c1_i32_22 : i32 to vector<16x1xi32>
    %49 = arith.addi %1, %48 : vector<16x1xi32>
    %c0_i32_23 = arith.constant 0 : i32
    %50 = vector.broadcast %c0_i32_23 : i32 to vector<16x1xi32>
    %51 = arith.cmpi sge, %49, %50 : vector<16x1xi32>
    %c1_i32_24 = arith.constant 1 : i32
    %52 = vector.broadcast %c1_i32_24 : i32 to vector<16x1xi32>
    %53 = arith.addi %1, %52 : vector<16x1xi32>
    %c16_i32_25 = arith.constant 16 : i32
    %54 = vector.broadcast %c16_i32_25 : i32 to vector<16x1xi32>
    %55 = arith.cmpi slt, %53, %54 : vector<16x1xi32>
    %56 = arith.andi %51, %55 : vector<16x1xi1>
    %cst_26 = arith.constant 1.000000e+00 : f32
    %cst_27 = arith.constant 0.000000e+00 : f32
    %57 = vector.broadcast %cst_26 : f32 to vector<16x1xf32>
    %58 = vector.broadcast %cst_27 : f32 to vector<16x1xf32>
    %59 = arith.select %56, %57, %58 : vector<16x1xi1>, vector<16x1xf32>
    %60 = vector.broadcast %59 : vector<16x1xf32> to vector<16x64xf32>
    %61 = arith.mulf %47, %60 : vector<16x64xf32>
    %62 = tpu.concatenate %46, %29, %61 in 1 : vector<16x64xf32>, vector<16x64xf32>, vector<16x64xf32> -> vector<16x192xf32>
    %63 = arith.truncf %62 : vector<16x192xf32> to vector<16x192xbf16>
    %cst_28 = arith.constant dense<0.000000e+00> : vector<16x64xf32>
    %64 = tpu.matmul %63, %31, %cst_28 {dimension_numbers = #tpu.dot_dimension_numbers<[1], [0], [0], [1], [0, 0, 1, 1], [], []>} : vector<16x192xbf16>, vector<192x64xbf16>, vector<16x64xf32> -> vector<16x64xf32>
    %c0_29 = arith.constant 0 : index
    %c0_30 = arith.constant 0 : index
    %c0_31 = arith.constant 0 : index
    %65 = vector.load %arg7[%c0_29, %c0_30, %c0_31] : memref<11x1x64xf32, #tpu.memory_space<vmem>>, vector<1x1x64xf32>
    %66 = vector.shape_cast %65 : vector<1x1x64xf32> to vector<1x64xf32>
    %67 = vector.broadcast %66 : vector<1x64xf32> to vector<16x64xf32>
    %68 = arith.addf %64, %67 : vector<16x64xf32>
    %cst_32 = arith.constant 5.000000e-01 : f32
    %69 = vector.broadcast %cst_32 : f32 to vector<16x64xf32>
    %70 = arith.mulf %69, %68 : vector<16x64xf32>
    %cst_33 = arith.constant 4.471500e-02 : f32
    %71 = vector.broadcast %cst_33 : f32 to vector<16x64xf32>
    %72 = arith.mulf %71, %68 : vector<16x64xf32>
    %73 = arith.mulf %72, %68 : vector<16x64xf32>
    %74 = arith.mulf %73, %68 : vector<16x64xf32>
    %75 = arith.addf %68, %74 : vector<16x64xf32>
    %cst_34 = arith.constant 0.797884583 : f32
    %76 = vector.broadcast %cst_34 : f32 to vector<16x64xf32>
    %77 = arith.mulf %76, %75 : vector<16x64xf32>
    %78 = math.tanh %77 : vector<16x64xf32>
    %cst_35 = arith.constant 1.000000e+00 : f32
    %79 = vector.broadcast %cst_35 : f32 to vector<16x64xf32>
    %80 = arith.addf %79, %78 : vector<16x64xf32>
    %81 = arith.mulf %70, %80 : vector<16x64xf32>
    %c0_36 = arith.constant 0 : index
    %c0_37 = arith.constant 0 : index
    %c0_38 = arith.constant 0 : index
    %82 = vector.load %arg8[%c0_36, %c0_37, %c0_38] : memref<11x192x64xbf16, #tpu.memory_space<vmem>>, vector<1x192x64xbf16>
    %83 = vector.shape_cast %82 : vector<1x192x64xbf16> to vector<192x64xbf16>
    %c1_i32_39 = arith.constant 1 : i32
    %84 = tpu.dynamic_rotate %81 by %c1_i32_39 dim 0 : vector<16x64xf32>, i32 -> vector<16x64xf32>
    %85 = vector.broadcast %44 : vector<16x1xf32> to vector<16x64xf32>
    %86 = arith.mulf %84, %85 : vector<16x64xf32>
    %c15_i32_40 = arith.constant 15 : i32
    %87 = tpu.dynamic_rotate %81 by %c15_i32_40 dim 0 : vector<16x64xf32>, i32 -> vector<16x64xf32>
    %88 = vector.broadcast %59 : vector<16x1xf32> to vector<16x64xf32>
    %89 = arith.mulf %87, %88 : vector<16x64xf32>
    %90 = tpu.concatenate %86, %81, %89 in 1 : vector<16x64xf32>, vector<16x64xf32>, vector<16x64xf32> -> vector<16x192xf32>
    %91 = arith.truncf %90 : vector<16x192xf32> to vector<16x192xbf16>
    %cst_41 = arith.constant dense<0.000000e+00> : vector<16x64xf32>
    %92 = tpu.matmul %91, %83, %cst_41 {dimension_numbers = #tpu.dot_dimension_numbers<[1], [0], [0], [1], [0, 0, 1, 1], [], []>} : vector<16x192xbf16>, vector<192x64xbf16>, vector<16x64xf32> -> vector<16x64xf32>
    %c0_42 = arith.constant 0 : index
    %c0_43 = arith.constant 0 : index
    %c0_44 = arith.constant 0 : index
    %93 = vector.load %arg9[%c0_42, %c0_43, %c0_44] : memref<11x1x64xf32, #tpu.memory_space<vmem>>, vector<1x1x64xf32>
    %94 = vector.shape_cast %93 : vector<1x1x64xf32> to vector<1x64xf32>
    %95 = vector.broadcast %94 : vector<1x64xf32> to vector<16x64xf32>
    %96 = arith.addf %92, %95 : vector<16x64xf32>
    %97 = arith.addf %96, %16 : vector<16x64xf32>
    %cst_45 = arith.constant 5.000000e-01 : f32
    %98 = vector.broadcast %cst_45 : f32 to vector<16x64xf32>
    %99 = arith.mulf %98, %97 : vector<16x64xf32>
    %cst_46 = arith.constant 4.471500e-02 : f32
    %100 = vector.broadcast %cst_46 : f32 to vector<16x64xf32>
    %101 = arith.mulf %100, %97 : vector<16x64xf32>
    %102 = arith.mulf %101, %97 : vector<16x64xf32>
    %103 = arith.mulf %102, %97 : vector<16x64xf32>
    %104 = arith.addf %97, %103 : vector<16x64xf32>
    %cst_47 = arith.constant 0.797884583 : f32
    %105 = vector.broadcast %cst_47 : f32 to vector<16x64xf32>
    %106 = arith.mulf %105, %104 : vector<16x64xf32>
    %107 = math.tanh %106 : vector<16x64xf32>
    %cst_48 = arith.constant 1.000000e+00 : f32
    %108 = vector.broadcast %cst_48 : f32 to vector<16x64xf32>
    %109 = arith.addf %108, %107 : vector<16x64xf32>
    %110 = arith.mulf %99, %109 : vector<16x64xf32>
    %c1 = arith.constant 1 : index
    %c0_49 = arith.constant 0 : index
    %c0_50 = arith.constant 0 : index
    %111 = vector.load %arg6[%c1, %c0_49, %c0_50] : memref<11x192x64xbf16, #tpu.memory_space<vmem>>, vector<1x192x64xbf16>
    %112 = vector.shape_cast %111 : vector<1x192x64xbf16> to vector<192x64xbf16>
    %c2_i32 = arith.constant 2 : i32
    %113 = tpu.dynamic_rotate %110 by %c2_i32 dim 0 : vector<16x64xf32>, i32 -> vector<16x64xf32>
    %c-2_i32 = arith.constant -2 : i32
    %114 = vector.broadcast %c-2_i32 : i32 to vector<16x1xi32>
    %115 = arith.addi %1, %114 : vector<16x1xi32>
    %c0_i32_51 = arith.constant 0 : i32
    %116 = vector.broadcast %c0_i32_51 : i32 to vector<16x1xi32>
    %117 = arith.cmpi sge, %115, %116 : vector<16x1xi32>
    %c-2_i32_52 = arith.constant -2 : i32
    %118 = vector.broadcast %c-2_i32_52 : i32 to vector<16x1xi32>
    %119 = arith.addi %1, %118 : vector<16x1xi32>
    %c16_i32_53 = arith.constant 16 : i32
    %120 = vector.broadcast %c16_i32_53 : i32 to vector<16x1xi32>
    %121 = arith.cmpi slt, %119, %120 : vector<16x1xi32>
    %122 = arith.andi %117, %121 : vector<16x1xi1>
    %cst_54 = arith.constant 1.000000e+00 : f32
    %cst_55 = arith.constant 0.000000e+00 : f32
    %123 = vector.broadcast %cst_54 : f32 to vector<16x1xf32>
    %124 = vector.broadcast %cst_55 : f32 to vector<16x1xf32>
    %125 = arith.select %122, %123, %124 : vector<16x1xi1>, vector<16x1xf32>
    %126 = vector.broadcast %125 : vector<16x1xf32> to vector<16x64xf32>
    %127 = arith.mulf %113, %126 : vector<16x64xf32>
    %c14_i32 = arith.constant 14 : i32
    %128 = tpu.dynamic_rotate %110 by %c14_i32 dim 0 : vector<16x64xf32>, i32 -> vector<16x64xf32>
    %c2_i32_56 = arith.constant 2 : i32
    %129 = vector.broadcast %c2_i32_56 : i32 to vector<16x1xi32>
    %130 = arith.addi %1, %129 : vector<16x1xi32>
    %c0_i32_57 = arith.constant 0 : i32
    %131 = vector.broadcast %c0_i32_57 : i32 to vector<16x1xi32>
    %132 = arith.cmpi sge, %130, %131 : vector<16x1xi32>
    %c2_i32_58 = arith.constant 2 : i32
    %133 = vector.broadcast %c2_i32_58 : i32 to vector<16x1xi32>
    %134 = arith.addi %1, %133 : vector<16x1xi32>
    %c16_i32_59 = arith.constant 16 : i32
    %135 = vector.broadcast %c16_i32_59 : i32 to vector<16x1xi32>
    %136 = arith.cmpi slt, %134, %135 : vector<16x1xi32>
    %137 = arith.andi %132, %136 : vector<16x1xi1>
    %cst_60 = arith.constant 1.000000e+00 : f32
    %cst_61 = arith.constant 0.000000e+00 : f32
    %138 = vector.broadcast %cst_60 : f32 to vector<16x1xf32>
    %139 = vector.broadcast %cst_61 : f32 to vector<16x1xf32>
    %140 = arith.select %137, %138, %139 : vector<16x1xi1>, vector<16x1xf32>
    %141 = vector.broadcast %140 : vector<16x1xf32> to vector<16x64xf32>
    %142 = arith.mulf %128, %141 : vector<16x64xf32>
    %143 = tpu.concatenate %127, %110, %142 in 1 : vector<16x64xf32>, vector<16x64xf32>, vector<16x64xf32> -> vector<16x192xf32>
    %144 = arith.truncf %143 : vector<16x192xf32> to vector<16x192xbf16>
    %cst_62 = arith.constant dense<0.000000e+00> : vector<16x64xf32>
    %145 = tpu.matmul %144, %112, %cst_62 {dimension_numbers = #tpu.dot_dimension_numbers<[1], [0], [0], [1], [0, 0, 1, 1], [], []>} : vector<16x192xbf16>, vector<192x64xbf16>, vector<16x64xf32> -> vector<16x64xf32>
    %c1_63 = arith.constant 1 : index
    %c0_64 = arith.constant 0 : index
    %c0_65 = arith.constant 0 : index
    %146 = vector.load %arg7[%c1_63, %c0_64, %c0_65] : memref<11x1x64xf32, #tpu.memory_space<vmem>>, vector<1x1x64xf32>
    %147 = vector.shape_cast %146 : vector<1x1x64xf32> to vector<1x64xf32>
    %148 = vector.broadcast %147 : vector<1x64xf32> to vector<16x64xf32>
    %149 = arith.addf %145, %148 : vector<16x64xf32>
    %cst_66 = arith.constant 5.000000e-01 : f32
    %150 = vector.broadcast %cst_66 : f32 to vector<16x64xf32>
    %151 = arith.mulf %150, %149 : vector<16x64xf32>
    %cst_67 = arith.constant 4.471500e-02 : f32
    %152 = vector.broadcast %cst_67 : f32 to vector<16x64xf32>
    %153 = arith.mulf %152, %149 : vector<16x64xf32>
    %154 = arith.mulf %153, %149 : vector<16x64xf32>
    %155 = arith.mulf %154, %149 : vector<16x64xf32>
    %156 = arith.addf %149, %155 : vector<16x64xf32>
    %cst_68 = arith.constant 0.797884583 : f32
    %157 = vector.broadcast %cst_68 : f32 to vector<16x64xf32>
    %158 = arith.mulf %157, %156 : vector<16x64xf32>
    %159 = math.tanh %158 : vector<16x64xf32>
    %cst_69 = arith.constant 1.000000e+00 : f32
    %160 = vector.broadcast %cst_69 : f32 to vector<16x64xf32>
    %161 = arith.addf %160, %159 : vector<16x64xf32>
    %162 = arith.mulf %151, %161 : vector<16x64xf32>
    %c1_70 = arith.constant 1 : index
    %c0_71 = arith.constant 0 : index
    %c0_72 = arith.constant 0 : index
    %163 = vector.load %arg8[%c1_70, %c0_71, %c0_72] : memref<11x192x64xbf16, #tpu.memory_space<vmem>>, vector<1x192x64xbf16>
    %164 = vector.shape_cast %163 : vector<1x192x64xbf16> to vector<192x64xbf16>
    %c2_i32_73 = arith.constant 2 : i32
    %165 = tpu.dynamic_rotate %162 by %c2_i32_73 dim 0 : vector<16x64xf32>, i32 -> vector<16x64xf32>
    %166 = vector.broadcast %125 : vector<16x1xf32> to vector<16x64xf32>
    %167 = arith.mulf %165, %166 : vector<16x64xf32>
    %c14_i32_74 = arith.constant 14 : i32
    %168 = tpu.dynamic_rotate %162 by %c14_i32_74 dim 0 : vector<16x64xf32>, i32 -> vector<16x64xf32>
    %169 = vector.broadcast %140 : vector<16x1xf32> to vector<16x64xf32>
    %170 = arith.mulf %168, %169 : vector<16x64xf32>
    %171 = tpu.concatenate %167, %162, %170 in 1 : vector<16x64xf32>, vector<16x64xf32>, vector<16x64xf32> -> vector<16x192xf32>
    %172 = arith.truncf %171 : vector<16x192xf32> to vector<16x192xbf16>
    %cst_75 = arith.constant dense<0.000000e+00> : vector<16x64xf32>
    %173 = tpu.matmul %172, %164, %cst_75 {dimension_numbers = #tpu.dot_dimension_numbers<[1], [0], [0], [1], [0, 0, 1, 1], [], []>} : vector<16x192xbf16>, vector<192x64xbf16>, vector<16x64xf32> -> vector<16x64xf32>
    %c1_76 = arith.constant 1 : index
    %c0_77 = arith.constant 0 : index
    %c0_78 = arith.constant 0 : index
    %174 = vector.load %arg9[%c1_76, %c0_77, %c0_78] : memref<11x1x64xf32, #tpu.memory_space<vmem>>, vector<1x1x64xf32>
    %175 = vector.shape_cast %174 : vector<1x1x64xf32> to vector<1x64xf32>
    %176 = vector.broadcast %175 : vector<1x64xf32> to vector<16x64xf32>
    %177 = arith.addf %173, %176 : vector<16x64xf32>
    %178 = arith.addf %177, %97 : vector<16x64xf32>
    %cst_79 = arith.constant 5.000000e-01 : f32
    %179 = vector.broadcast %cst_79 : f32 to vector<16x64xf32>
    %180 = arith.mulf %179, %178 : vector<16x64xf32>
    %cst_80 = arith.constant 4.471500e-02 : f32
    %181 = vector.broadcast %cst_80 : f32 to vector<16x64xf32>
    %182 = arith.mulf %181, %178 : vector<16x64xf32>
    %183 = arith.mulf %182, %178 : vector<16x64xf32>
    %184 = arith.mulf %183, %178 : vector<16x64xf32>
    %185 = arith.addf %178, %184 : vector<16x64xf32>
    %cst_81 = arith.constant 0.797884583 : f32
    %186 = vector.broadcast %cst_81 : f32 to vector<16x64xf32>
    %187 = arith.mulf %186, %185 : vector<16x64xf32>
    %188 = math.tanh %187 : vector<16x64xf32>
    %cst_82 = arith.constant 1.000000e+00 : f32
    %189 = vector.broadcast %cst_82 : f32 to vector<16x64xf32>
    %190 = arith.addf %189, %188 : vector<16x64xf32>
    %191 = arith.mulf %180, %190 : vector<16x64xf32>
    %c2 = arith.constant 2 : index
    %c0_83 = arith.constant 0 : index
    %c0_84 = arith.constant 0 : index
    %192 = vector.load %arg6[%c2, %c0_83, %c0_84] : memref<11x192x64xbf16, #tpu.memory_space<vmem>>, vector<1x192x64xbf16>
    %193 = vector.shape_cast %192 : vector<1x192x64xbf16> to vector<192x64xbf16>
    %c4_i32 = arith.constant 4 : i32
    %194 = tpu.dynamic_rotate %191 by %c4_i32 dim 0 : vector<16x64xf32>, i32 -> vector<16x64xf32>
    %c-4_i32 = arith.constant -4 : i32
    %195 = vector.broadcast %c-4_i32 : i32 to vector<16x1xi32>
    %196 = arith.addi %1, %195 : vector<16x1xi32>
    %c0_i32_85 = arith.constant 0 : i32
    %197 = vector.broadcast %c0_i32_85 : i32 to vector<16x1xi32>
    %198 = arith.cmpi sge, %196, %197 : vector<16x1xi32>
    %c-4_i32_86 = arith.constant -4 : i32
    %199 = vector.broadcast %c-4_i32_86 : i32 to vector<16x1xi32>
    %200 = arith.addi %1, %199 : vector<16x1xi32>
    %c16_i32_87 = arith.constant 16 : i32
    %201 = vector.broadcast %c16_i32_87 : i32 to vector<16x1xi32>
    %202 = arith.cmpi slt, %200, %201 : vector<16x1xi32>
    %203 = arith.andi %198, %202 : vector<16x1xi1>
    %cst_88 = arith.constant 1.000000e+00 : f32
    %cst_89 = arith.constant 0.000000e+00 : f32
    %204 = vector.broadcast %cst_88 : f32 to vector<16x1xf32>
    %205 = vector.broadcast %cst_89 : f32 to vector<16x1xf32>
    %206 = arith.select %203, %204, %205 : vector<16x1xi1>, vector<16x1xf32>
    %207 = vector.broadcast %206 : vector<16x1xf32> to vector<16x64xf32>
    %208 = arith.mulf %194, %207 : vector<16x64xf32>
    %c12_i32 = arith.constant 12 : i32
    %209 = tpu.dynamic_rotate %191 by %c12_i32 dim 0 : vector<16x64xf32>, i32 -> vector<16x64xf32>
    %c4_i32_90 = arith.constant 4 : i32
    %210 = vector.broadcast %c4_i32_90 : i32 to vector<16x1xi32>
    %211 = arith.addi %1, %210 : vector<16x1xi32>
    %c0_i32_91 = arith.constant 0 : i32
    %212 = vector.broadcast %c0_i32_91 : i32 to vector<16x1xi32>
    %213 = arith.cmpi sge, %211, %212 : vector<16x1xi32>
    %c4_i32_92 = arith.constant 4 : i32
    %214 = vector.broadcast %c4_i32_92 : i32 to vector<16x1xi32>
    %215 = arith.addi %1, %214 : vector<16x1xi32>
    %c16_i32_93 = arith.constant 16 : i32
    %216 = vector.broadcast %c16_i32_93 : i32 to vector<16x1xi32>
    %217 = arith.cmpi slt, %215, %216 : vector<16x1xi32>
    %218 = arith.andi %213, %217 : vector<16x1xi1>
    %cst_94 = arith.constant 1.000000e+00 : f32
    %cst_95 = arith.constant 0.000000e+00 : f32
    %219 = vector.broadcast %cst_94 : f32 to vector<16x1xf32>
    %220 = vector.broadcast %cst_95 : f32 to vector<16x1xf32>
    %221 = arith.select %218, %219, %220 : vector<16x1xi1>, vector<16x1xf32>
    %222 = vector.broadcast %221 : vector<16x1xf32> to vector<16x64xf32>
    %223 = arith.mulf %209, %222 : vector<16x64xf32>
    %224 = tpu.concatenate %208, %191, %223 in 1 : vector<16x64xf32>, vector<16x64xf32>, vector<16x64xf32> -> vector<16x192xf32>
    %225 = arith.truncf %224 : vector<16x192xf32> to vector<16x192xbf16>
    %cst_96 = arith.constant dense<0.000000e+00> : vector<16x64xf32>
    %226 = tpu.matmul %225, %193, %cst_96 {dimension_numbers = #tpu.dot_dimension_numbers<[1], [0], [0], [1], [0, 0, 1, 1], [], []>} : vector<16x192xbf16>, vector<192x64xbf16>, vector<16x64xf32> -> vector<16x64xf32>
    %c2_97 = arith.constant 2 : index
    %c0_98 = arith.constant 0 : index
    %c0_99 = arith.constant 0 : index
    %227 = vector.load %arg7[%c2_97, %c0_98, %c0_99] : memref<11x1x64xf32, #tpu.memory_space<vmem>>, vector<1x1x64xf32>
    %228 = vector.shape_cast %227 : vector<1x1x64xf32> to vector<1x64xf32>
    %229 = vector.broadcast %228 : vector<1x64xf32> to vector<16x64xf32>
    %230 = arith.addf %226, %229 : vector<16x64xf32>
    %cst_100 = arith.constant 5.000000e-01 : f32
    %231 = vector.broadcast %cst_100 : f32 to vector<16x64xf32>
    %232 = arith.mulf %231, %230 : vector<16x64xf32>
    %cst_101 = arith.constant 4.471500e-02 : f32
    %233 = vector.broadcast %cst_101 : f32 to vector<16x64xf32>
    %234 = arith.mulf %233, %230 : vector<16x64xf32>
    %235 = arith.mulf %234, %230 : vector<16x64xf32>
    %236 = arith.mulf %235, %230 : vector<16x64xf32>
    %237 = arith.addf %230, %236 : vector<16x64xf32>
    %cst_102 = arith.constant 0.797884583 : f32
    %238 = vector.broadcast %cst_102 : f32 to vector<16x64xf32>
    %239 = arith.mulf %238, %237 : vector<16x64xf32>
    %240 = math.tanh %239 : vector<16x64xf32>
    %cst_103 = arith.constant 1.000000e+00 : f32
    %241 = vector.broadcast %cst_103 : f32 to vector<16x64xf32>
    %242 = arith.addf %241, %240 : vector<16x64xf32>
    %243 = arith.mulf %232, %242 : vector<16x64xf32>
    %c2_104 = arith.constant 2 : index
    %c0_105 = arith.constant 0 : index
    %c0_106 = arith.constant 0 : index
    %244 = vector.load %arg8[%c2_104, %c0_105, %c0_106] : memref<11x192x64xbf16, #tpu.memory_space<vmem>>, vector<1x192x64xbf16>
    %245 = vector.shape_cast %244 : vector<1x192x64xbf16> to vector<192x64xbf16>
    %c4_i32_107 = arith.constant 4 : i32
    %246 = tpu.dynamic_rotate %243 by %c4_i32_107 dim 0 : vector<16x64xf32>, i32 -> vector<16x64xf32>
    %247 = vector.broadcast %206 : vector<16x1xf32> to vector<16x64xf32>
    %248 = arith.mulf %246, %247 : vector<16x64xf32>
    %c12_i32_108 = arith.constant 12 : i32
    %249 = tpu.dynamic_rotate %243 by %c12_i32_108 dim 0 : vector<16x64xf32>, i32 -> vector<16x64xf32>
    %250 = vector.broadcast %221 : vector<16x1xf32> to vector<16x64xf32>
    %251 = arith.mulf %249, %250 : vector<16x64xf32>
    %252 = tpu.concatenate %248, %243, %251 in 1 : vector<16x64xf32>, vector<16x64xf32>, vector<16x64xf32> -> vector<16x192xf32>
    %253 = arith.truncf %252 : vector<16x192xf32> to vector<16x192xbf16>
    %cst_109 = arith.constant dense<0.000000e+00> : vector<16x64xf32>
    %254 = tpu.matmul %253, %245, %cst_109 {dimension_numbers = #tpu.dot_dimension_numbers<[1], [0], [0], [1], [0, 0, 1, 1], [], []>} : vector<16x192xbf16>, vector<192x64xbf16>, vector<16x64xf32> -> vector<16x64xf32>
    %c2_110 = arith.constant 2 : index
    %c0_111 = arith.constant 0 : index
    %c0_112 = arith.constant 0 : index
    %255 = vector.load %arg9[%c2_110, %c0_111, %c0_112] : memref<11x1x64xf32, #tpu.memory_space<vmem>>, vector<1x1x64xf32>
    %256 = vector.shape_cast %255 : vector<1x1x64xf32> to vector<1x64xf32>
    %257 = vector.broadcast %256 : vector<1x64xf32> to vector<16x64xf32>
    %258 = arith.addf %254, %257 : vector<16x64xf32>
    %259 = arith.addf %258, %178 : vector<16x64xf32>
    %cst_113 = arith.constant 5.000000e-01 : f32
    %260 = vector.broadcast %cst_113 : f32 to vector<16x64xf32>
    %261 = arith.mulf %260, %259 : vector<16x64xf32>
    %cst_114 = arith.constant 4.471500e-02 : f32
    %262 = vector.broadcast %cst_114 : f32 to vector<16x64xf32>
    %263 = arith.mulf %262, %259 : vector<16x64xf32>
    %264 = arith.mulf %263, %259 : vector<16x64xf32>
    %265 = arith.mulf %264, %259 : vector<16x64xf32>
    %266 = arith.addf %259, %265 : vector<16x64xf32>
    %cst_115 = arith.constant 0.797884583 : f32
    %267 = vector.broadcast %cst_115 : f32 to vector<16x64xf32>
    %268 = arith.mulf %267, %266 : vector<16x64xf32>
    %269 = math.tanh %268 : vector<16x64xf32>
    %cst_116 = arith.constant 1.000000e+00 : f32
    %270 = vector.broadcast %cst_116 : f32 to vector<16x64xf32>
    %271 = arith.addf %270, %269 : vector<16x64xf32>
    %272 = arith.mulf %261, %271 : vector<16x64xf32>
    %c3 = arith.constant 3 : index
    %c0_117 = arith.constant 0 : index
    %c0_118 = arith.constant 0 : index
    %273 = vector.load %arg6[%c3, %c0_117, %c0_118] : memref<11x192x64xbf16, #tpu.memory_space<vmem>>, vector<1x192x64xbf16>
    %274 = vector.shape_cast %273 : vector<1x192x64xbf16> to vector<192x64xbf16>
    %c8_i32 = arith.constant 8 : i32
    %275 = tpu.dynamic_rotate %272 by %c8_i32 dim 0 : vector<16x64xf32>, i32 -> vector<16x64xf32>
    %c-8_i32 = arith.constant -8 : i32
    %276 = vector.broadcast %c-8_i32 : i32 to vector<16x1xi32>
    %277 = arith.addi %1, %276 : vector<16x1xi32>
    %c0_i32_119 = arith.constant 0 : i32
    %278 = vector.broadcast %c0_i32_119 : i32 to vector<16x1xi32>
    %279 = arith.cmpi sge, %277, %278 : vector<16x1xi32>
    %c-8_i32_120 = arith.constant -8 : i32
    %280 = vector.broadcast %c-8_i32_120 : i32 to vector<16x1xi32>
    %281 = arith.addi %1, %280 : vector<16x1xi32>
    %c16_i32_121 = arith.constant 16 : i32
    %282 = vector.broadcast %c16_i32_121 : i32 to vector<16x1xi32>
    %283 = arith.cmpi slt, %281, %282 : vector<16x1xi32>
    %284 = arith.andi %279, %283 : vector<16x1xi1>
    %cst_122 = arith.constant 1.000000e+00 : f32
    %cst_123 = arith.constant 0.000000e+00 : f32
    %285 = vector.broadcast %cst_122 : f32 to vector<16x1xf32>
    %286 = vector.broadcast %cst_123 : f32 to vector<16x1xf32>
    %287 = arith.select %284, %285, %286 : vector<16x1xi1>, vector<16x1xf32>
    %288 = vector.broadcast %287 : vector<16x1xf32> to vector<16x64xf32>
    %289 = arith.mulf %275, %288 : vector<16x64xf32>
    %c8_i32_124 = arith.constant 8 : i32
    %290 = tpu.dynamic_rotate %272 by %c8_i32_124 dim 0 : vector<16x64xf32>, i32 -> vector<16x64xf32>
    %c8_i32_125 = arith.constant 8 : i32
    %291 = vector.broadcast %c8_i32_125 : i32 to vector<16x1xi32>
    %292 = arith.addi %1, %291 : vector<16x1xi32>
    %c0_i32_126 = arith.constant 0 : i32
    %293 = vector.broadcast %c0_i32_126 : i32 to vector<16x1xi32>
    %294 = arith.cmpi sge, %292, %293 : vector<16x1xi32>
    %c8_i32_127 = arith.constant 8 : i32
    %295 = vector.broadcast %c8_i32_127 : i32 to vector<16x1xi32>
    %296 = arith.addi %1, %295 : vector<16x1xi32>
    %c16_i32_128 = arith.constant 16 : i32
    %297 = vector.broadcast %c16_i32_128 : i32 to vector<16x1xi32>
    %298 = arith.cmpi slt, %296, %297 : vector<16x1xi32>
    %299 = arith.andi %294, %298 : vector<16x1xi1>
    %cst_129 = arith.constant 1.000000e+00 : f32
    %cst_130 = arith.constant 0.000000e+00 : f32
    %300 = vector.broadcast %cst_129 : f32 to vector<16x1xf32>
    %301 = vector.broadcast %cst_130 : f32 to vector<16x1xf32>
    %302 = arith.select %299, %300, %301 : vector<16x1xi1>, vector<16x1xf32>
    %303 = vector.broadcast %302 : vector<16x1xf32> to vector<16x64xf32>
    %304 = arith.mulf %290, %303 : vector<16x64xf32>
    %305 = tpu.concatenate %289, %272, %304 in 1 : vector<16x64xf32>, vector<16x64xf32>, vector<16x64xf32> -> vector<16x192xf32>
    %306 = arith.truncf %305 : vector<16x192xf32> to vector<16x192xbf16>
    %cst_131 = arith.constant dense<0.000000e+00> : vector<16x64xf32>
    %307 = tpu.matmul %306, %274, %cst_131 {dimension_numbers = #tpu.dot_dimension_numbers<[1], [0], [0], [1], [0, 0, 1, 1], [], []>} : vector<16x192xbf16>, vector<192x64xbf16>, vector<16x64xf32> -> vector<16x64xf32>
    %c3_132 = arith.constant 3 : index
    %c0_133 = arith.constant 0 : index
    %c0_134 = arith.constant 0 : index
    %308 = vector.load %arg7[%c3_132, %c0_133, %c0_134] : memref<11x1x64xf32, #tpu.memory_space<vmem>>, vector<1x1x64xf32>
    %309 = vector.shape_cast %308 : vector<1x1x64xf32> to vector<1x64xf32>
    %310 = vector.broadcast %309 : vector<1x64xf32> to vector<16x64xf32>
    %311 = arith.addf %307, %310 : vector<16x64xf32>
    %cst_135 = arith.constant 5.000000e-01 : f32
    %312 = vector.broadcast %cst_135 : f32 to vector<16x64xf32>
    %313 = arith.mulf %312, %311 : vector<16x64xf32>
    %cst_136 = arith.constant 4.471500e-02 : f32
    %314 = vector.broadcast %cst_136 : f32 to vector<16x64xf32>
    %315 = arith.mulf %314, %311 : vector<16x64xf32>
    %316 = arith.mulf %315, %311 : vector<16x64xf32>
    %317 = arith.mulf %316, %311 : vector<16x64xf32>
    %318 = arith.addf %311, %317 : vector<16x64xf32>
    %cst_137 = arith.constant 0.797884583 : f32
    %319 = vector.broadcast %cst_137 : f32 to vector<16x64xf32>
    %320 = arith.mulf %319, %318 : vector<16x64xf32>
    %321 = math.tanh %320 : vector<16x64xf32>
    %cst_138 = arith.constant 1.000000e+00 : f32
    %322 = vector.broadcast %cst_138 : f32 to vector<16x64xf32>
    %323 = arith.addf %322, %321 : vector<16x64xf32>
    %324 = arith.mulf %313, %323 : vector<16x64xf32>
    %c3_139 = arith.constant 3 : index
    %c0_140 = arith.constant 0 : index
    %c0_141 = arith.constant 0 : index
    %325 = vector.load %arg8[%c3_139, %c0_140, %c0_141] : memref<11x192x64xbf16, #tpu.memory_space<vmem>>, vector<1x192x64xbf16>
    %326 = vector.shape_cast %325 : vector<1x192x64xbf16> to vector<192x64xbf16>
    %c8_i32_142 = arith.constant 8 : i32
    %327 = tpu.dynamic_rotate %324 by %c8_i32_142 dim 0 : vector<16x64xf32>, i32 -> vector<16x64xf32>
    %328 = vector.broadcast %287 : vector<16x1xf32> to vector<16x64xf32>
    %329 = arith.mulf %327, %328 : vector<16x64xf32>
    %c8_i32_143 = arith.constant 8 : i32
    %330 = tpu.dynamic_rotate %324 by %c8_i32_143 dim 0 : vector<16x64xf32>, i32 -> vector<16x64xf32>
    %331 = vector.broadcast %302 : vector<16x1xf32> to vector<16x64xf32>
    %332 = arith.mulf %330, %331 : vector<16x64xf32>
    %333 = tpu.concatenate %329, %324, %332 in 1 : vector<16x64xf32>, vector<16x64xf32>, vector<16x64xf32> -> vector<16x192xf32>
    %334 = arith.truncf %333 : vector<16x192xf32> to vector<16x192xbf16>
    %cst_144 = arith.constant dense<0.000000e+00> : vector<16x64xf32>
    %335 = tpu.matmul %334, %326, %cst_144 {dimension_numbers = #tpu.dot_dimension_numbers<[1], [0], [0], [1], [0, 0, 1, 1], [], []>} : vector<16x192xbf16>, vector<192x64xbf16>, vector<16x64xf32> -> vector<16x64xf32>
    %c3_145 = arith.constant 3 : index
    %c0_146 = arith.constant 0 : index
    %c0_147 = arith.constant 0 : index
    %336 = vector.load %arg9[%c3_145, %c0_146, %c0_147] : memref<11x1x64xf32, #tpu.memory_space<vmem>>, vector<1x1x64xf32>
    %337 = vector.shape_cast %336 : vector<1x1x64xf32> to vector<1x64xf32>
    %338 = vector.broadcast %337 : vector<1x64xf32> to vector<16x64xf32>
    %339 = arith.addf %335, %338 : vector<16x64xf32>
    %340 = arith.addf %339, %259 : vector<16x64xf32>
    %cst_148 = arith.constant 5.000000e-01 : f32
    %341 = vector.broadcast %cst_148 : f32 to vector<16x64xf32>
    %342 = arith.mulf %341, %340 : vector<16x64xf32>
    %cst_149 = arith.constant 4.471500e-02 : f32
    %343 = vector.broadcast %cst_149 : f32 to vector<16x64xf32>
    %344 = arith.mulf %343, %340 : vector<16x64xf32>
    %345 = arith.mulf %344, %340 : vector<16x64xf32>
    %346 = arith.mulf %345, %340 : vector<16x64xf32>
    %347 = arith.addf %340, %346 : vector<16x64xf32>
    %cst_150 = arith.constant 0.797884583 : f32
    %348 = vector.broadcast %cst_150 : f32 to vector<16x64xf32>
    %349 = arith.mulf %348, %347 : vector<16x64xf32>
    %350 = math.tanh %349 : vector<16x64xf32>
    %cst_151 = arith.constant 1.000000e+00 : f32
    %351 = vector.broadcast %cst_151 : f32 to vector<16x64xf32>
    %352 = arith.addf %351, %350 : vector<16x64xf32>
    %353 = arith.mulf %342, %352 : vector<16x64xf32>
    %c4 = arith.constant 4 : index
    %c0_152 = arith.constant 0 : index
    %c0_153 = arith.constant 0 : index
    %354 = vector.load %arg6[%c4, %c0_152, %c0_153] : memref<11x192x64xbf16, #tpu.memory_space<vmem>>, vector<1x192x64xbf16>
    %355 = vector.shape_cast %354 : vector<1x192x64xbf16> to vector<192x64xbf16>
    %356 = vector.extract_strided_slice %355 {offsets = [64, 0], sizes = [64, 64], strides = [1, 1]} : vector<192x64xbf16> to vector<64x64xbf16>
    %357 = arith.truncf %353 : vector<16x64xf32> to vector<16x64xbf16>
    %cst_154 = arith.constant dense<0.000000e+00> : vector<16x64xf32>
    %358 = tpu.matmul %357, %356, %cst_154 {dimension_numbers = #tpu.dot_dimension_numbers<[1], [0], [0], [1], [0, 0, 1, 1], [], []>} : vector<16x64xbf16>, vector<64x64xbf16>, vector<16x64xf32> -> vector<16x64xf32>
    %c4_155 = arith.constant 4 : index
    %c0_156 = arith.constant 0 : index
    %c0_157 = arith.constant 0 : index
    %359 = vector.load %arg7[%c4_155, %c0_156, %c0_157] : memref<11x1x64xf32, #tpu.memory_space<vmem>>, vector<1x1x64xf32>
    %360 = vector.shape_cast %359 : vector<1x1x64xf32> to vector<1x64xf32>
    %361 = vector.broadcast %360 : vector<1x64xf32> to vector<16x64xf32>
    %362 = arith.addf %358, %361 : vector<16x64xf32>
    %cst_158 = arith.constant 5.000000e-01 : f32
    %363 = vector.broadcast %cst_158 : f32 to vector<16x64xf32>
    %364 = arith.mulf %363, %362 : vector<16x64xf32>
    %cst_159 = arith.constant 4.471500e-02 : f32
    %365 = vector.broadcast %cst_159 : f32 to vector<16x64xf32>
    %366 = arith.mulf %365, %362 : vector<16x64xf32>
    %367 = arith.mulf %366, %362 : vector<16x64xf32>
    %368 = arith.mulf %367, %362 : vector<16x64xf32>
    %369 = arith.addf %362, %368 : vector<16x64xf32>
    %cst_160 = arith.constant 0.797884583 : f32
    %370 = vector.broadcast %cst_160 : f32 to vector<16x64xf32>
    %371 = arith.mulf %370, %369 : vector<16x64xf32>
    %372 = math.tanh %371 : vector<16x64xf32>
    %cst_161 = arith.constant 1.000000e+00 : f32
    %373 = vector.broadcast %cst_161 : f32 to vector<16x64xf32>
    %374 = arith.addf %373, %372 : vector<16x64xf32>
    %375 = arith.mulf %364, %374 : vector<16x64xf32>
    %c4_162 = arith.constant 4 : index
    %c0_163 = arith.constant 0 : index
    %c0_164 = arith.constant 0 : index
    %376 = vector.load %arg8[%c4_162, %c0_163, %c0_164] : memref<11x192x64xbf16, #tpu.memory_space<vmem>>, vector<1x192x64xbf16>
    %377 = vector.shape_cast %376 : vector<1x192x64xbf16> to vector<192x64xbf16>
    %378 = vector.extract_strided_slice %377 {offsets = [64, 0], sizes = [64, 64], strides = [1, 1]} : vector<192x64xbf16> to vector<64x64xbf16>
    %379 = arith.truncf %375 : vector<16x64xf32> to vector<16x64xbf16>
    %cst_165 = arith.constant dense<0.000000e+00> : vector<16x64xf32>
    %380 = tpu.matmul %379, %378, %cst_165 {dimension_numbers = #tpu.dot_dimension_numbers<[1], [0], [0], [1], [0, 0, 1, 1], [], []>} : vector<16x64xbf16>, vector<64x64xbf16>, vector<16x64xf32> -> vector<16x64xf32>
    %c4_166 = arith.constant 4 : index
    %c0_167 = arith.constant 0 : index
    %c0_168 = arith.constant 0 : index
    %381 = vector.load %arg9[%c4_166, %c0_167, %c0_168] : memref<11x1x64xf32, #tpu.memory_space<vmem>>, vector<1x1x64xf32>
    %382 = vector.shape_cast %381 : vector<1x1x64xf32> to vector<1x64xf32>
    %383 = vector.broadcast %382 : vector<1x64xf32> to vector<16x64xf32>
    %384 = arith.addf %380, %383 : vector<16x64xf32>
    %385 = arith.addf %384, %340 : vector<16x64xf32>
    %cst_169 = arith.constant 5.000000e-01 : f32
    %386 = vector.broadcast %cst_169 : f32 to vector<16x64xf32>
    %387 = arith.mulf %386, %385 : vector<16x64xf32>
    %cst_170 = arith.constant 4.471500e-02 : f32
    %388 = vector.broadcast %cst_170 : f32 to vector<16x64xf32>
    %389 = arith.mulf %388, %385 : vector<16x64xf32>
    %390 = arith.mulf %389, %385 : vector<16x64xf32>
    %391 = arith.mulf %390, %385 : vector<16x64xf32>
    %392 = arith.addf %385, %391 : vector<16x64xf32>
    %cst_171 = arith.constant 0.797884583 : f32
    %393 = vector.broadcast %cst_171 : f32 to vector<16x64xf32>
    %394 = arith.mulf %393, %392 : vector<16x64xf32>
    %395 = math.tanh %394 : vector<16x64xf32>
    %cst_172 = arith.constant 1.000000e+00 : f32
    %396 = vector.broadcast %cst_172 : f32 to vector<16x64xf32>
    %397 = arith.addf %396, %395 : vector<16x64xf32>
    %398 = arith.mulf %387, %397 : vector<16x64xf32>
    %c5 = arith.constant 5 : index
    %c0_173 = arith.constant 0 : index
    %c0_174 = arith.constant 0 : index
    %399 = vector.load %arg6[%c5, %c0_173, %c0_174] : memref<11x192x64xbf16, #tpu.memory_space<vmem>>, vector<1x192x64xbf16>
    %400 = vector.shape_cast %399 : vector<1x192x64xbf16> to vector<192x64xbf16>
    %401 = vector.extract_strided_slice %400 {offsets = [64, 0], sizes = [64, 64], strides = [1, 1]} : vector<192x64xbf16> to vector<64x64xbf16>
    %402 = arith.truncf %398 : vector<16x64xf32> to vector<16x64xbf16>
    %cst_175 = arith.constant dense<0.000000e+00> : vector<16x64xf32>
    %403 = tpu.matmul %402, %401, %cst_175 {dimension_numbers = #tpu.dot_dimension_numbers<[1], [0], [0], [1], [0, 0, 1, 1], [], []>} : vector<16x64xbf16>, vector<64x64xbf16>, vector<16x64xf32> -> vector<16x64xf32>
    %c5_176 = arith.constant 5 : index
    %c0_177 = arith.constant 0 : index
    %c0_178 = arith.constant 0 : index
    %404 = vector.load %arg7[%c5_176, %c0_177, %c0_178] : memref<11x1x64xf32, #tpu.memory_space<vmem>>, vector<1x1x64xf32>
    %405 = vector.shape_cast %404 : vector<1x1x64xf32> to vector<1x64xf32>
    %406 = vector.broadcast %405 : vector<1x64xf32> to vector<16x64xf32>
    %407 = arith.addf %403, %406 : vector<16x64xf32>
    %cst_179 = arith.constant 5.000000e-01 : f32
    %408 = vector.broadcast %cst_179 : f32 to vector<16x64xf32>
    %409 = arith.mulf %408, %407 : vector<16x64xf32>
    %cst_180 = arith.constant 4.471500e-02 : f32
    %410 = vector.broadcast %cst_180 : f32 to vector<16x64xf32>
    %411 = arith.mulf %410, %407 : vector<16x64xf32>
    %412 = arith.mulf %411, %407 : vector<16x64xf32>
    %413 = arith.mulf %412, %407 : vector<16x64xf32>
    %414 = arith.addf %407, %413 : vector<16x64xf32>
    %cst_181 = arith.constant 0.797884583 : f32
    %415 = vector.broadcast %cst_181 : f32 to vector<16x64xf32>
    %416 = arith.mulf %415, %414 : vector<16x64xf32>
    %417 = math.tanh %416 : vector<16x64xf32>
    %cst_182 = arith.constant 1.000000e+00 : f32
    %418 = vector.broadcast %cst_182 : f32 to vector<16x64xf32>
    %419 = arith.addf %418, %417 : vector<16x64xf32>
    %420 = arith.mulf %409, %419 : vector<16x64xf32>
    %c5_183 = arith.constant 5 : index
    %c0_184 = arith.constant 0 : index
    %c0_185 = arith.constant 0 : index
    %421 = vector.load %arg8[%c5_183, %c0_184, %c0_185] : memref<11x192x64xbf16, #tpu.memory_space<vmem>>, vector<1x192x64xbf16>
    %422 = vector.shape_cast %421 : vector<1x192x64xbf16> to vector<192x64xbf16>
    %423 = vector.extract_strided_slice %422 {offsets = [64, 0], sizes = [64, 64], strides = [1, 1]} : vector<192x64xbf16> to vector<64x64xbf16>
    %424 = arith.truncf %420 : vector<16x64xf32> to vector<16x64xbf16>
    %cst_186 = arith.constant dense<0.000000e+00> : vector<16x64xf32>
    %425 = tpu.matmul %424, %423, %cst_186 {dimension_numbers = #tpu.dot_dimension_numbers<[1], [0], [0], [1], [0, 0, 1, 1], [], []>} : vector<16x64xbf16>, vector<64x64xbf16>, vector<16x64xf32> -> vector<16x64xf32>
    %c5_187 = arith.constant 5 : index
    %c0_188 = arith.constant 0 : index
    %c0_189 = arith.constant 0 : index
    %426 = vector.load %arg9[%c5_187, %c0_188, %c0_189] : memref<11x1x64xf32, #tpu.memory_space<vmem>>, vector<1x1x64xf32>
    %427 = vector.shape_cast %426 : vector<1x1x64xf32> to vector<1x64xf32>
    %428 = vector.broadcast %427 : vector<1x64xf32> to vector<16x64xf32>
    %429 = arith.addf %425, %428 : vector<16x64xf32>
    %430 = arith.addf %429, %385 : vector<16x64xf32>
    %cst_190 = arith.constant 5.000000e-01 : f32
    %431 = vector.broadcast %cst_190 : f32 to vector<16x64xf32>
    %432 = arith.mulf %431, %430 : vector<16x64xf32>
    %cst_191 = arith.constant 4.471500e-02 : f32
    %433 = vector.broadcast %cst_191 : f32 to vector<16x64xf32>
    %434 = arith.mulf %433, %430 : vector<16x64xf32>
    %435 = arith.mulf %434, %430 : vector<16x64xf32>
    %436 = arith.mulf %435, %430 : vector<16x64xf32>
    %437 = arith.addf %430, %436 : vector<16x64xf32>
    %cst_192 = arith.constant 0.797884583 : f32
    %438 = vector.broadcast %cst_192 : f32 to vector<16x64xf32>
    %439 = arith.mulf %438, %437 : vector<16x64xf32>
    %440 = math.tanh %439 : vector<16x64xf32>
    %cst_193 = arith.constant 1.000000e+00 : f32
    %441 = vector.broadcast %cst_193 : f32 to vector<16x64xf32>
    %442 = arith.addf %441, %440 : vector<16x64xf32>
    %443 = arith.mulf %432, %442 : vector<16x64xf32>
    %c6 = arith.constant 6 : index
    %c0_194 = arith.constant 0 : index
    %c0_195 = arith.constant 0 : index
    %444 = vector.load %arg6[%c6, %c0_194, %c0_195] : memref<11x192x64xbf16, #tpu.memory_space<vmem>>, vector<1x192x64xbf16>
    %445 = vector.shape_cast %444 : vector<1x192x64xbf16> to vector<192x64xbf16>
    %446 = vector.extract_strided_slice %445 {offsets = [64, 0], sizes = [64, 64], strides = [1, 1]} : vector<192x64xbf16> to vector<64x64xbf16>
    %447 = arith.truncf %443 : vector<16x64xf32> to vector<16x64xbf16>
    %cst_196 = arith.constant dense<0.000000e+00> : vector<16x64xf32>
    %448 = tpu.matmul %447, %446, %cst_196 {dimension_numbers = #tpu.dot_dimension_numbers<[1], [0], [0], [1], [0, 0, 1, 1], [], []>} : vector<16x64xbf16>, vector<64x64xbf16>, vector<16x64xf32> -> vector<16x64xf32>
    %c6_197 = arith.constant 6 : index
    %c0_198 = arith.constant 0 : index
    %c0_199 = arith.constant 0 : index
    %449 = vector.load %arg7[%c6_197, %c0_198, %c0_199] : memref<11x1x64xf32, #tpu.memory_space<vmem>>, vector<1x1x64xf32>
    %450 = vector.shape_cast %449 : vector<1x1x64xf32> to vector<1x64xf32>
    %451 = vector.broadcast %450 : vector<1x64xf32> to vector<16x64xf32>
    %452 = arith.addf %448, %451 : vector<16x64xf32>
    %cst_200 = arith.constant 5.000000e-01 : f32
    %453 = vector.broadcast %cst_200 : f32 to vector<16x64xf32>
    %454 = arith.mulf %453, %452 : vector<16x64xf32>
    %cst_201 = arith.constant 4.471500e-02 : f32
    %455 = vector.broadcast %cst_201 : f32 to vector<16x64xf32>
    %456 = arith.mulf %455, %452 : vector<16x64xf32>
    %457 = arith.mulf %456, %452 : vector<16x64xf32>
    %458 = arith.mulf %457, %452 : vector<16x64xf32>
    %459 = arith.addf %452, %458 : vector<16x64xf32>
    %cst_202 = arith.constant 0.797884583 : f32
    %460 = vector.broadcast %cst_202 : f32 to vector<16x64xf32>
    %461 = arith.mulf %460, %459 : vector<16x64xf32>
    %462 = math.tanh %461 : vector<16x64xf32>
    %cst_203 = arith.constant 1.000000e+00 : f32
    %463 = vector.broadcast %cst_203 : f32 to vector<16x64xf32>
    %464 = arith.addf %463, %462 : vector<16x64xf32>
    %465 = arith.mulf %454, %464 : vector<16x64xf32>
    %c6_204 = arith.constant 6 : index
    %c0_205 = arith.constant 0 : index
    %c0_206 = arith.constant 0 : index
    %466 = vector.load %arg8[%c6_204, %c0_205, %c0_206] : memref<11x192x64xbf16, #tpu.memory_space<vmem>>, vector<1x192x64xbf16>
    %467 = vector.shape_cast %466 : vector<1x192x64xbf16> to vector<192x64xbf16>
    %468 = vector.extract_strided_slice %467 {offsets = [64, 0], sizes = [64, 64], strides = [1, 1]} : vector<192x64xbf16> to vector<64x64xbf16>
    %469 = arith.truncf %465 : vector<16x64xf32> to vector<16x64xbf16>
    %cst_207 = arith.constant dense<0.000000e+00> : vector<16x64xf32>
    %470 = tpu.matmul %469, %468, %cst_207 {dimension_numbers = #tpu.dot_dimension_numbers<[1], [0], [0], [1], [0, 0, 1, 1], [], []>} : vector<16x64xbf16>, vector<64x64xbf16>, vector<16x64xf32> -> vector<16x64xf32>
    %c6_208 = arith.constant 6 : index
    %c0_209 = arith.constant 0 : index
    %c0_210 = arith.constant 0 : index
    %471 = vector.load %arg9[%c6_208, %c0_209, %c0_210] : memref<11x1x64xf32, #tpu.memory_space<vmem>>, vector<1x1x64xf32>
    %472 = vector.shape_cast %471 : vector<1x1x64xf32> to vector<1x64xf32>
    %473 = vector.broadcast %472 : vector<1x64xf32> to vector<16x64xf32>
    %474 = arith.addf %470, %473 : vector<16x64xf32>
    %475 = arith.addf %474, %430 : vector<16x64xf32>
    %cst_211 = arith.constant 5.000000e-01 : f32
    %476 = vector.broadcast %cst_211 : f32 to vector<16x64xf32>
    %477 = arith.mulf %476, %475 : vector<16x64xf32>
    %cst_212 = arith.constant 4.471500e-02 : f32
    %478 = vector.broadcast %cst_212 : f32 to vector<16x64xf32>
    %479 = arith.mulf %478, %475 : vector<16x64xf32>
    %480 = arith.mulf %479, %475 : vector<16x64xf32>
    %481 = arith.mulf %480, %475 : vector<16x64xf32>
    %482 = arith.addf %475, %481 : vector<16x64xf32>
    %cst_213 = arith.constant 0.797884583 : f32
    %483 = vector.broadcast %cst_213 : f32 to vector<16x64xf32>
    %484 = arith.mulf %483, %482 : vector<16x64xf32>
    %485 = math.tanh %484 : vector<16x64xf32>
    %cst_214 = arith.constant 1.000000e+00 : f32
    %486 = vector.broadcast %cst_214 : f32 to vector<16x64xf32>
    %487 = arith.addf %486, %485 : vector<16x64xf32>
    %488 = arith.mulf %477, %487 : vector<16x64xf32>
    %c7 = arith.constant 7 : index
    %c0_215 = arith.constant 0 : index
    %c0_216 = arith.constant 0 : index
    %489 = vector.load %arg6[%c7, %c0_215, %c0_216] : memref<11x192x64xbf16, #tpu.memory_space<vmem>>, vector<1x192x64xbf16>
    %490 = vector.shape_cast %489 : vector<1x192x64xbf16> to vector<192x64xbf16>
    %491 = vector.extract_strided_slice %490 {offsets = [64, 0], sizes = [64, 64], strides = [1, 1]} : vector<192x64xbf16> to vector<64x64xbf16>
    %492 = arith.truncf %488 : vector<16x64xf32> to vector<16x64xbf16>
    %cst_217 = arith.constant dense<0.000000e+00> : vector<16x64xf32>
    %493 = tpu.matmul %492, %491, %cst_217 {dimension_numbers = #tpu.dot_dimension_numbers<[1], [0], [0], [1], [0, 0, 1, 1], [], []>} : vector<16x64xbf16>, vector<64x64xbf16>, vector<16x64xf32> -> vector<16x64xf32>
    %c7_218 = arith.constant 7 : index
    %c0_219 = arith.constant 0 : index
    %c0_220 = arith.constant 0 : index
    %494 = vector.load %arg7[%c7_218, %c0_219, %c0_220] : memref<11x1x64xf32, #tpu.memory_space<vmem>>, vector<1x1x64xf32>
    %495 = vector.shape_cast %494 : vector<1x1x64xf32> to vector<1x64xf32>
    %496 = vector.broadcast %495 : vector<1x64xf32> to vector<16x64xf32>
    %497 = arith.addf %493, %496 : vector<16x64xf32>
    %cst_221 = arith.constant 5.000000e-01 : f32
    %498 = vector.broadcast %cst_221 : f32 to vector<16x64xf32>
    %499 = arith.mulf %498, %497 : vector<16x64xf32>
    %cst_222 = arith.constant 4.471500e-02 : f32
    %500 = vector.broadcast %cst_222 : f32 to vector<16x64xf32>
    %501 = arith.mulf %500, %497 : vector<16x64xf32>
    %502 = arith.mulf %501, %497 : vector<16x64xf32>
    %503 = arith.mulf %502, %497 : vector<16x64xf32>
    %504 = arith.addf %497, %503 : vector<16x64xf32>
    %cst_223 = arith.constant 0.797884583 : f32
    %505 = vector.broadcast %cst_223 : f32 to vector<16x64xf32>
    %506 = arith.mulf %505, %504 : vector<16x64xf32>
    %507 = math.tanh %506 : vector<16x64xf32>
    %cst_224 = arith.constant 1.000000e+00 : f32
    %508 = vector.broadcast %cst_224 : f32 to vector<16x64xf32>
    %509 = arith.addf %508, %507 : vector<16x64xf32>
    %510 = arith.mulf %499, %509 : vector<16x64xf32>
    %c7_225 = arith.constant 7 : index
    %c0_226 = arith.constant 0 : index
    %c0_227 = arith.constant 0 : index
    %511 = vector.load %arg8[%c7_225, %c0_226, %c0_227] : memref<11x192x64xbf16, #tpu.memory_space<vmem>>, vector<1x192x64xbf16>
    %512 = vector.shape_cast %511 : vector<1x192x64xbf16> to vector<192x64xbf16>
    %513 = vector.extract_strided_slice %512 {offsets = [64, 0], sizes = [64, 64], strides = [1, 1]} : vector<192x64xbf16> to vector<64x64xbf16>
    %514 = arith.truncf %510 : vector<16x64xf32> to vector<16x64xbf16>
    %cst_228 = arith.constant dense<0.000000e+00> : vector<16x64xf32>
    %515 = tpu.matmul %514, %513, %cst_228 {dimension_numbers = #tpu.dot_dimension_numbers<[1], [0], [0], [1], [0, 0, 1, 1], [], []>} : vector<16x64xbf16>, vector<64x64xbf16>, vector<16x64xf32> -> vector<16x64xf32>
    %c7_229 = arith.constant 7 : index
    %c0_230 = arith.constant 0 : index
    %c0_231 = arith.constant 0 : index
    %516 = vector.load %arg9[%c7_229, %c0_230, %c0_231] : memref<11x1x64xf32, #tpu.memory_space<vmem>>, vector<1x1x64xf32>
    %517 = vector.shape_cast %516 : vector<1x1x64xf32> to vector<1x64xf32>
    %518 = vector.broadcast %517 : vector<1x64xf32> to vector<16x64xf32>
    %519 = arith.addf %515, %518 : vector<16x64xf32>
    %520 = arith.addf %519, %475 : vector<16x64xf32>
    %cst_232 = arith.constant 5.000000e-01 : f32
    %521 = vector.broadcast %cst_232 : f32 to vector<16x64xf32>
    %522 = arith.mulf %521, %520 : vector<16x64xf32>
    %cst_233 = arith.constant 4.471500e-02 : f32
    %523 = vector.broadcast %cst_233 : f32 to vector<16x64xf32>
    %524 = arith.mulf %523, %520 : vector<16x64xf32>
    %525 = arith.mulf %524, %520 : vector<16x64xf32>
    %526 = arith.mulf %525, %520 : vector<16x64xf32>
    %527 = arith.addf %520, %526 : vector<16x64xf32>
    %cst_234 = arith.constant 0.797884583 : f32
    %528 = vector.broadcast %cst_234 : f32 to vector<16x64xf32>
    %529 = arith.mulf %528, %527 : vector<16x64xf32>
    %530 = math.tanh %529 : vector<16x64xf32>
    %cst_235 = arith.constant 1.000000e+00 : f32
    %531 = vector.broadcast %cst_235 : f32 to vector<16x64xf32>
    %532 = arith.addf %531, %530 : vector<16x64xf32>
    %533 = arith.mulf %522, %532 : vector<16x64xf32>
    %c8 = arith.constant 8 : index
    %c0_236 = arith.constant 0 : index
    %c0_237 = arith.constant 0 : index
    %534 = vector.load %arg6[%c8, %c0_236, %c0_237] : memref<11x192x64xbf16, #tpu.memory_space<vmem>>, vector<1x192x64xbf16>
    %535 = vector.shape_cast %534 : vector<1x192x64xbf16> to vector<192x64xbf16>
    %536 = vector.extract_strided_slice %535 {offsets = [64, 0], sizes = [64, 64], strides = [1, 1]} : vector<192x64xbf16> to vector<64x64xbf16>
    %537 = arith.truncf %533 : vector<16x64xf32> to vector<16x64xbf16>
    %cst_238 = arith.constant dense<0.000000e+00> : vector<16x64xf32>
    %538 = tpu.matmul %537, %536, %cst_238 {dimension_numbers = #tpu.dot_dimension_numbers<[1], [0], [0], [1], [0, 0, 1, 1], [], []>} : vector<16x64xbf16>, vector<64x64xbf16>, vector<16x64xf32> -> vector<16x64xf32>
    %c8_239 = arith.constant 8 : index
    %c0_240 = arith.constant 0 : index
    %c0_241 = arith.constant 0 : index
    %539 = vector.load %arg7[%c8_239, %c0_240, %c0_241] : memref<11x1x64xf32, #tpu.memory_space<vmem>>, vector<1x1x64xf32>
    %540 = vector.shape_cast %539 : vector<1x1x64xf32> to vector<1x64xf32>
    %541 = vector.broadcast %540 : vector<1x64xf32> to vector<16x64xf32>
    %542 = arith.addf %538, %541 : vector<16x64xf32>
    %cst_242 = arith.constant 5.000000e-01 : f32
    %543 = vector.broadcast %cst_242 : f32 to vector<16x64xf32>
    %544 = arith.mulf %543, %542 : vector<16x64xf32>
    %cst_243 = arith.constant 4.471500e-02 : f32
    %545 = vector.broadcast %cst_243 : f32 to vector<16x64xf32>
    %546 = arith.mulf %545, %542 : vector<16x64xf32>
    %547 = arith.mulf %546, %542 : vector<16x64xf32>
    %548 = arith.mulf %547, %542 : vector<16x64xf32>
    %549 = arith.addf %542, %548 : vector<16x64xf32>
    %cst_244 = arith.constant 0.797884583 : f32
    %550 = vector.broadcast %cst_244 : f32 to vector<16x64xf32>
    %551 = arith.mulf %550, %549 : vector<16x64xf32>
    %552 = math.tanh %551 : vector<16x64xf32>
    %cst_245 = arith.constant 1.000000e+00 : f32
    %553 = vector.broadcast %cst_245 : f32 to vector<16x64xf32>
    %554 = arith.addf %553, %552 : vector<16x64xf32>
    %555 = arith.mulf %544, %554 : vector<16x64xf32>
    %c8_246 = arith.constant 8 : index
    %c0_247 = arith.constant 0 : index
    %c0_248 = arith.constant 0 : index
    %556 = vector.load %arg8[%c8_246, %c0_247, %c0_248] : memref<11x192x64xbf16, #tpu.memory_space<vmem>>, vector<1x192x64xbf16>
    %557 = vector.shape_cast %556 : vector<1x192x64xbf16> to vector<192x64xbf16>
    %558 = vector.extract_strided_slice %557 {offsets = [64, 0], sizes = [64, 64], strides = [1, 1]} : vector<192x64xbf16> to vector<64x64xbf16>
    %559 = arith.truncf %555 : vector<16x64xf32> to vector<16x64xbf16>
    %cst_249 = arith.constant dense<0.000000e+00> : vector<16x64xf32>
    %560 = tpu.matmul %559, %558, %cst_249 {dimension_numbers = #tpu.dot_dimension_numbers<[1], [0], [0], [1], [0, 0, 1, 1], [], []>} : vector<16x64xbf16>, vector<64x64xbf16>, vector<16x64xf32> -> vector<16x64xf32>
    %c8_250 = arith.constant 8 : index
    %c0_251 = arith.constant 0 : index
    %c0_252 = arith.constant 0 : index
    %561 = vector.load %arg9[%c8_250, %c0_251, %c0_252] : memref<11x1x64xf32, #tpu.memory_space<vmem>>, vector<1x1x64xf32>
    %562 = vector.shape_cast %561 : vector<1x1x64xf32> to vector<1x64xf32>
    %563 = vector.broadcast %562 : vector<1x64xf32> to vector<16x64xf32>
    %564 = arith.addf %560, %563 : vector<16x64xf32>
    %565 = arith.addf %564, %520 : vector<16x64xf32>
    %cst_253 = arith.constant 5.000000e-01 : f32
    %566 = vector.broadcast %cst_253 : f32 to vector<16x64xf32>
    %567 = arith.mulf %566, %565 : vector<16x64xf32>
    %cst_254 = arith.constant 4.471500e-02 : f32
    %568 = vector.broadcast %cst_254 : f32 to vector<16x64xf32>
    %569 = arith.mulf %568, %565 : vector<16x64xf32>
    %570 = arith.mulf %569, %565 : vector<16x64xf32>
    %571 = arith.mulf %570, %565 : vector<16x64xf32>
    %572 = arith.addf %565, %571 : vector<16x64xf32>
    %cst_255 = arith.constant 0.797884583 : f32
    %573 = vector.broadcast %cst_255 : f32 to vector<16x64xf32>
    %574 = arith.mulf %573, %572 : vector<16x64xf32>
    %575 = math.tanh %574 : vector<16x64xf32>
    %cst_256 = arith.constant 1.000000e+00 : f32
    %576 = vector.broadcast %cst_256 : f32 to vector<16x64xf32>
    %577 = arith.addf %576, %575 : vector<16x64xf32>
    %578 = arith.mulf %567, %577 : vector<16x64xf32>
    %c9 = arith.constant 9 : index
    %c0_257 = arith.constant 0 : index
    %c0_258 = arith.constant 0 : index
    %579 = vector.load %arg6[%c9, %c0_257, %c0_258] : memref<11x192x64xbf16, #tpu.memory_space<vmem>>, vector<1x192x64xbf16>
    %580 = vector.shape_cast %579 : vector<1x192x64xbf16> to vector<192x64xbf16>
    %581 = vector.extract_strided_slice %580 {offsets = [64, 0], sizes = [64, 64], strides = [1, 1]} : vector<192x64xbf16> to vector<64x64xbf16>
    %582 = arith.truncf %578 : vector<16x64xf32> to vector<16x64xbf16>
    %cst_259 = arith.constant dense<0.000000e+00> : vector<16x64xf32>
    %583 = tpu.matmul %582, %581, %cst_259 {dimension_numbers = #tpu.dot_dimension_numbers<[1], [0], [0], [1], [0, 0, 1, 1], [], []>} : vector<16x64xbf16>, vector<64x64xbf16>, vector<16x64xf32> -> vector<16x64xf32>
    %c9_260 = arith.constant 9 : index
    %c0_261 = arith.constant 0 : index
    %c0_262 = arith.constant 0 : index
    %584 = vector.load %arg7[%c9_260, %c0_261, %c0_262] : memref<11x1x64xf32, #tpu.memory_space<vmem>>, vector<1x1x64xf32>
    %585 = vector.shape_cast %584 : vector<1x1x64xf32> to vector<1x64xf32>
    %586 = vector.broadcast %585 : vector<1x64xf32> to vector<16x64xf32>
    %587 = arith.addf %583, %586 : vector<16x64xf32>
    %cst_263 = arith.constant 5.000000e-01 : f32
    %588 = vector.broadcast %cst_263 : f32 to vector<16x64xf32>
    %589 = arith.mulf %588, %587 : vector<16x64xf32>
    %cst_264 = arith.constant 4.471500e-02 : f32
    %590 = vector.broadcast %cst_264 : f32 to vector<16x64xf32>
    %591 = arith.mulf %590, %587 : vector<16x64xf32>
    %592 = arith.mulf %591, %587 : vector<16x64xf32>
    %593 = arith.mulf %592, %587 : vector<16x64xf32>
    %594 = arith.addf %587, %593 : vector<16x64xf32>
    %cst_265 = arith.constant 0.797884583 : f32
    %595 = vector.broadcast %cst_265 : f32 to vector<16x64xf32>
    %596 = arith.mulf %595, %594 : vector<16x64xf32>
    %597 = math.tanh %596 : vector<16x64xf32>
    %cst_266 = arith.constant 1.000000e+00 : f32
    %598 = vector.broadcast %cst_266 : f32 to vector<16x64xf32>
    %599 = arith.addf %598, %597 : vector<16x64xf32>
    %600 = arith.mulf %589, %599 : vector<16x64xf32>
    %c9_267 = arith.constant 9 : index
    %c0_268 = arith.constant 0 : index
    %c0_269 = arith.constant 0 : index
    %601 = vector.load %arg8[%c9_267, %c0_268, %c0_269] : memref<11x192x64xbf16, #tpu.memory_space<vmem>>, vector<1x192x64xbf16>
    %602 = vector.shape_cast %601 : vector<1x192x64xbf16> to vector<192x64xbf16>
    %603 = vector.extract_strided_slice %602 {offsets = [64, 0], sizes = [64, 64], strides = [1, 1]} : vector<192x64xbf16> to vector<64x64xbf16>
    %604 = arith.truncf %600 : vector<16x64xf32> to vector<16x64xbf16>
    %cst_270 = arith.constant dense<0.000000e+00> : vector<16x64xf32>
    %605 = tpu.matmul %604, %603, %cst_270 {dimension_numbers = #tpu.dot_dimension_numbers<[1], [0], [0], [1], [0, 0, 1, 1], [], []>} : vector<16x64xbf16>, vector<64x64xbf16>, vector<16x64xf32> -> vector<16x64xf32>
    %c9_271 = arith.constant 9 : index
    %c0_272 = arith.constant 0 : index
    %c0_273 = arith.constant 0 : index
    %606 = vector.load %arg9[%c9_271, %c0_272, %c0_273] : memref<11x1x64xf32, #tpu.memory_space<vmem>>, vector<1x1x64xf32>
    %607 = vector.shape_cast %606 : vector<1x1x64xf32> to vector<1x64xf32>
    %608 = vector.broadcast %607 : vector<1x64xf32> to vector<16x64xf32>
    %609 = arith.addf %605, %608 : vector<16x64xf32>
    %610 = arith.addf %609, %565 : vector<16x64xf32>
    %c0_274 = arith.constant 0 : index
    %c0_275 = arith.constant 0 : index
    %611 = vector.load %arg10[%c0_274, %c0_275] : memref<64x64xbf16, #tpu.memory_space<vmem>>, vector<64x64xbf16>
    %612 = arith.truncf %610 : vector<16x64xf32> to vector<16x64xbf16>
    %cst_276 = arith.constant dense<0.000000e+00> : vector<16x64xf32>
    %613 = tpu.matmul %612, %611, %cst_276 {dimension_numbers = #tpu.dot_dimension_numbers<[1], [0], [0], [1], [0, 0, 1, 1], [], []>} : vector<16x64xbf16>, vector<64x64xbf16>, vector<16x64xf32> -> vector<16x64xf32>
    %c0_277 = arith.constant 0 : index
    %c0_278 = arith.constant 0 : index
    %614 = vector.load %arg11[%c0_277, %c0_278] : memref<1x64xf32, #tpu.memory_space<vmem>>, vector<1x64xf32>
    %615 = vector.broadcast %614 : vector<1x64xf32> to vector<16x64xf32>
    %616 = arith.addf %613, %615 : vector<16x64xf32>
    %cst_279 = arith.constant 5.000000e-01 : f32
    %617 = vector.broadcast %cst_279 : f32 to vector<16x64xf32>
    %618 = arith.mulf %617, %610 : vector<16x64xf32>
    %cst_280 = arith.constant 4.471500e-02 : f32
    %619 = vector.broadcast %cst_280 : f32 to vector<16x64xf32>
    %620 = arith.mulf %619, %610 : vector<16x64xf32>
    %621 = arith.mulf %620, %610 : vector<16x64xf32>
    %622 = arith.mulf %621, %610 : vector<16x64xf32>
    %623 = arith.addf %610, %622 : vector<16x64xf32>
    %cst_281 = arith.constant 0.797884583 : f32
    %624 = vector.broadcast %cst_281 : f32 to vector<16x64xf32>
    %625 = arith.mulf %624, %623 : vector<16x64xf32>
    %626 = math.tanh %625 : vector<16x64xf32>
    %cst_282 = arith.constant 1.000000e+00 : f32
    %627 = vector.broadcast %cst_282 : f32 to vector<16x64xf32>
    %628 = arith.addf %627, %626 : vector<16x64xf32>
    %629 = arith.mulf %618, %628 : vector<16x64xf32>
    %c10 = arith.constant 10 : index
    %c0_283 = arith.constant 0 : index
    %c0_284 = arith.constant 0 : index
    %630 = vector.load %arg6[%c10, %c0_283, %c0_284] : memref<11x192x64xbf16, #tpu.memory_space<vmem>>, vector<1x192x64xbf16>
    %631 = vector.shape_cast %630 : vector<1x192x64xbf16> to vector<192x64xbf16>
    %632 = vector.extract_strided_slice %631 {offsets = [64, 0], sizes = [64, 64], strides = [1, 1]} : vector<192x64xbf16> to vector<64x64xbf16>
    %633 = arith.truncf %629 : vector<16x64xf32> to vector<16x64xbf16>
    %cst_285 = arith.constant dense<0.000000e+00> : vector<16x64xf32>
    %634 = tpu.matmul %633, %632, %cst_285 {dimension_numbers = #tpu.dot_dimension_numbers<[1], [0], [0], [1], [0, 0, 1, 1], [], []>} : vector<16x64xbf16>, vector<64x64xbf16>, vector<16x64xf32> -> vector<16x64xf32>
    %c10_286 = arith.constant 10 : index
    %c0_287 = arith.constant 0 : index
    %c0_288 = arith.constant 0 : index
    %635 = vector.load %arg7[%c10_286, %c0_287, %c0_288] : memref<11x1x64xf32, #tpu.memory_space<vmem>>, vector<1x1x64xf32>
    %636 = vector.shape_cast %635 : vector<1x1x64xf32> to vector<1x64xf32>
    %637 = vector.broadcast %636 : vector<1x64xf32> to vector<16x64xf32>
    %638 = arith.addf %634, %637 : vector<16x64xf32>
    %cst_289 = arith.constant 5.000000e-01 : f32
    %639 = vector.broadcast %cst_289 : f32 to vector<16x64xf32>
    %640 = arith.mulf %639, %638 : vector<16x64xf32>
    %cst_290 = arith.constant 4.471500e-02 : f32
    %641 = vector.broadcast %cst_290 : f32 to vector<16x64xf32>
    %642 = arith.mulf %641, %638 : vector<16x64xf32>
    %643 = arith.mulf %642, %638 : vector<16x64xf32>
    %644 = arith.mulf %643, %638 : vector<16x64xf32>
    %645 = arith.addf %638, %644 : vector<16x64xf32>
    %cst_291 = arith.constant 0.797884583 : f32
    %646 = vector.broadcast %cst_291 : f32 to vector<16x64xf32>
    %647 = arith.mulf %646, %645 : vector<16x64xf32>
    %648 = math.tanh %647 : vector<16x64xf32>
    %cst_292 = arith.constant 1.000000e+00 : f32
    %649 = vector.broadcast %cst_292 : f32 to vector<16x64xf32>
    %650 = arith.addf %649, %648 : vector<16x64xf32>
    %651 = arith.mulf %640, %650 : vector<16x64xf32>
    %c10_293 = arith.constant 10 : index
    %c0_294 = arith.constant 0 : index
    %c0_295 = arith.constant 0 : index
    %652 = vector.load %arg8[%c10_293, %c0_294, %c0_295] : memref<11x192x64xbf16, #tpu.memory_space<vmem>>, vector<1x192x64xbf16>
    %653 = vector.shape_cast %652 : vector<1x192x64xbf16> to vector<192x64xbf16>
    %654 = vector.extract_strided_slice %653 {offsets = [64, 0], sizes = [64, 64], strides = [1, 1]} : vector<192x64xbf16> to vector<64x64xbf16>
    %655 = arith.truncf %651 : vector<16x64xf32> to vector<16x64xbf16>
    %cst_296 = arith.constant dense<0.000000e+00> : vector<16x64xf32>
    %656 = tpu.matmul %655, %654, %cst_296 {dimension_numbers = #tpu.dot_dimension_numbers<[1], [0], [0], [1], [0, 0, 1, 1], [], []>} : vector<16x64xbf16>, vector<64x64xbf16>, vector<16x64xf32> -> vector<16x64xf32>
    %c10_297 = arith.constant 10 : index
    %c0_298 = arith.constant 0 : index
    %c0_299 = arith.constant 0 : index
    %657 = vector.load %arg9[%c10_297, %c0_298, %c0_299] : memref<11x1x64xf32, #tpu.memory_space<vmem>>, vector<1x1x64xf32>
    %658 = vector.shape_cast %657 : vector<1x1x64xf32> to vector<1x64xf32>
    %659 = vector.broadcast %658 : vector<1x64xf32> to vector<16x64xf32>
    %660 = arith.addf %656, %659 : vector<16x64xf32>
    %661 = arith.addf %660, %616 : vector<16x64xf32>
    %662 = vector.extract_strided_slice %661 {offsets = [0, 0], sizes = [16, 32], strides = [1, 1]} : vector<16x64xf32> to vector<16x32xf32>
    %c1_i32_300 = arith.constant 1 : i32
    %663 = tpu.dynamic_rotate %662 by %c1_i32_300 dim 0 : vector<16x32xf32>, i32 -> vector<16x32xf32>
    %664 = vector.broadcast %44 : vector<16x1xf32> to vector<16x32xf32>
    %665 = arith.mulf %663, %664 : vector<16x32xf32>
    %c2_i32_301 = arith.constant 2 : i32
    %666 = tpu.dynamic_rotate %662 by %c2_i32_301 dim 0 : vector<16x32xf32>, i32 -> vector<16x32xf32>
    %667 = vector.broadcast %125 : vector<16x1xf32> to vector<16x32xf32>
    %668 = arith.mulf %666, %667 : vector<16x32xf32>
    %c3_i32 = arith.constant 3 : i32
    %669 = tpu.dynamic_rotate %662 by %c3_i32 dim 0 : vector<16x32xf32>, i32 -> vector<16x32xf32>
    %c-3_i32 = arith.constant -3 : i32
    %670 = vector.broadcast %c-3_i32 : i32 to vector<16x1xi32>
    %671 = arith.addi %1, %670 : vector<16x1xi32>
    %c0_i32_302 = arith.constant 0 : i32
    %672 = vector.broadcast %c0_i32_302 : i32 to vector<16x1xi32>
    %673 = arith.cmpi sge, %671, %672 : vector<16x1xi32>
    %c-3_i32_303 = arith.constant -3 : i32
    %674 = vector.broadcast %c-3_i32_303 : i32 to vector<16x1xi32>
    %675 = arith.addi %1, %674 : vector<16x1xi32>
    %c16_i32_304 = arith.constant 16 : i32
    %676 = vector.broadcast %c16_i32_304 : i32 to vector<16x1xi32>
    %677 = arith.cmpi slt, %675, %676 : vector<16x1xi32>
    %678 = arith.andi %673, %677 : vector<16x1xi1>
    %cst_305 = arith.constant 1.000000e+00 : f32
    %cst_306 = arith.constant 0.000000e+00 : f32
    %679 = vector.broadcast %cst_305 : f32 to vector<16x1xf32>
    %680 = vector.broadcast %cst_306 : f32 to vector<16x1xf32>
    %681 = arith.select %678, %679, %680 : vector<16x1xi1>, vector<16x1xf32>
    %682 = vector.broadcast %681 : vector<16x1xf32> to vector<16x32xf32>
    %683 = arith.mulf %669, %682 : vector<16x32xf32>
    %c4_i32_307 = arith.constant 4 : i32
    %684 = tpu.dynamic_rotate %662 by %c4_i32_307 dim 0 : vector<16x32xf32>, i32 -> vector<16x32xf32>
    %685 = vector.broadcast %206 : vector<16x1xf32> to vector<16x32xf32>
    %686 = arith.mulf %684, %685 : vector<16x32xf32>
    %c5_i32 = arith.constant 5 : i32
    %687 = tpu.dynamic_rotate %662 by %c5_i32 dim 0 : vector<16x32xf32>, i32 -> vector<16x32xf32>
    %c-5_i32 = arith.constant -5 : i32
    %688 = vector.broadcast %c-5_i32 : i32 to vector<16x1xi32>
    %689 = arith.addi %1, %688 : vector<16x1xi32>
    %c0_i32_308 = arith.constant 0 : i32
    %690 = vector.broadcast %c0_i32_308 : i32 to vector<16x1xi32>
    %691 = arith.cmpi sge, %689, %690 : vector<16x1xi32>
    %c-5_i32_309 = arith.constant -5 : i32
    %692 = vector.broadcast %c-5_i32_309 : i32 to vector<16x1xi32>
    %693 = arith.addi %1, %692 : vector<16x1xi32>
    %c16_i32_310 = arith.constant 16 : i32
    %694 = vector.broadcast %c16_i32_310 : i32 to vector<16x1xi32>
    %695 = arith.cmpi slt, %693, %694 : vector<16x1xi32>
    %696 = arith.andi %691, %695 : vector<16x1xi1>
    %cst_311 = arith.constant 1.000000e+00 : f32
    %cst_312 = arith.constant 0.000000e+00 : f32
    %697 = vector.broadcast %cst_311 : f32 to vector<16x1xf32>
    %698 = vector.broadcast %cst_312 : f32 to vector<16x1xf32>
    %699 = arith.select %696, %697, %698 : vector<16x1xi1>, vector<16x1xf32>
    %700 = vector.broadcast %699 : vector<16x1xf32> to vector<16x32xf32>
    %701 = arith.mulf %687, %700 : vector<16x32xf32>
    %c6_i32 = arith.constant 6 : i32
    %702 = tpu.dynamic_rotate %662 by %c6_i32 dim 0 : vector<16x32xf32>, i32 -> vector<16x32xf32>
    %c-6_i32 = arith.constant -6 : i32
    %703 = vector.broadcast %c-6_i32 : i32 to vector<16x1xi32>
    %704 = arith.addi %1, %703 : vector<16x1xi32>
    %c0_i32_313 = arith.constant 0 : i32
    %705 = vector.broadcast %c0_i32_313 : i32 to vector<16x1xi32>
    %706 = arith.cmpi sge, %704, %705 : vector<16x1xi32>
    %c-6_i32_314 = arith.constant -6 : i32
    %707 = vector.broadcast %c-6_i32_314 : i32 to vector<16x1xi32>
    %708 = arith.addi %1, %707 : vector<16x1xi32>
    %c16_i32_315 = arith.constant 16 : i32
    %709 = vector.broadcast %c16_i32_315 : i32 to vector<16x1xi32>
    %710 = arith.cmpi slt, %708, %709 : vector<16x1xi32>
    %711 = arith.andi %706, %710 : vector<16x1xi1>
    %cst_316 = arith.constant 1.000000e+00 : f32
    %cst_317 = arith.constant 0.000000e+00 : f32
    %712 = vector.broadcast %cst_316 : f32 to vector<16x1xf32>
    %713 = vector.broadcast %cst_317 : f32 to vector<16x1xf32>
    %714 = arith.select %711, %712, %713 : vector<16x1xi1>, vector<16x1xf32>
    %715 = vector.broadcast %714 : vector<16x1xf32> to vector<16x32xf32>
    %716 = arith.mulf %702, %715 : vector<16x32xf32>
    %c7_i32 = arith.constant 7 : i32
    %717 = tpu.dynamic_rotate %662 by %c7_i32 dim 0 : vector<16x32xf32>, i32 -> vector<16x32xf32>
    %c-7_i32 = arith.constant -7 : i32
    %718 = vector.broadcast %c-7_i32 : i32 to vector<16x1xi32>
    %719 = arith.addi %1, %718 : vector<16x1xi32>
    %c0_i32_318 = arith.constant 0 : i32
    %720 = vector.broadcast %c0_i32_318 : i32 to vector<16x1xi32>
    %721 = arith.cmpi sge, %719, %720 : vector<16x1xi32>
    %c-7_i32_319 = arith.constant -7 : i32
    %722 = vector.broadcast %c-7_i32_319 : i32 to vector<16x1xi32>
    %723 = arith.addi %1, %722 : vector<16x1xi32>
    %c16_i32_320 = arith.constant 16 : i32
    %724 = vector.broadcast %c16_i32_320 : i32 to vector<16x1xi32>
    %725 = arith.cmpi slt, %723, %724 : vector<16x1xi32>
    %726 = arith.andi %721, %725 : vector<16x1xi1>
    %cst_321 = arith.constant 1.000000e+00 : f32
    %cst_322 = arith.constant 0.000000e+00 : f32
    %727 = vector.broadcast %cst_321 : f32 to vector<16x1xf32>
    %728 = vector.broadcast %cst_322 : f32 to vector<16x1xf32>
    %729 = arith.select %726, %727, %728 : vector<16x1xi1>, vector<16x1xf32>
    %730 = vector.broadcast %729 : vector<16x1xf32> to vector<16x32xf32>
    %731 = arith.mulf %717, %730 : vector<16x32xf32>
    %c8_i32_323 = arith.constant 8 : i32
    %732 = tpu.dynamic_rotate %662 by %c8_i32_323 dim 0 : vector<16x32xf32>, i32 -> vector<16x32xf32>
    %733 = vector.broadcast %287 : vector<16x1xf32> to vector<16x32xf32>
    %734 = arith.mulf %732, %733 : vector<16x32xf32>
    %c9_i32 = arith.constant 9 : i32
    %735 = tpu.dynamic_rotate %662 by %c9_i32 dim 0 : vector<16x32xf32>, i32 -> vector<16x32xf32>
    %c-9_i32 = arith.constant -9 : i32
    %736 = vector.broadcast %c-9_i32 : i32 to vector<16x1xi32>
    %737 = arith.addi %1, %736 : vector<16x1xi32>
    %c0_i32_324 = arith.constant 0 : i32
    %738 = vector.broadcast %c0_i32_324 : i32 to vector<16x1xi32>
    %739 = arith.cmpi sge, %737, %738 : vector<16x1xi32>
    %c-9_i32_325 = arith.constant -9 : i32
    %740 = vector.broadcast %c-9_i32_325 : i32 to vector<16x1xi32>
    %741 = arith.addi %1, %740 : vector<16x1xi32>
    %c16_i32_326 = arith.constant 16 : i32
    %742 = vector.broadcast %c16_i32_326 : i32 to vector<16x1xi32>
    %743 = arith.cmpi slt, %741, %742 : vector<16x1xi32>
    %744 = arith.andi %739, %743 : vector<16x1xi1>
    %cst_327 = arith.constant 1.000000e+00 : f32
    %cst_328 = arith.constant 0.000000e+00 : f32
    %745 = vector.broadcast %cst_327 : f32 to vector<16x1xf32>
    %746 = vector.broadcast %cst_328 : f32 to vector<16x1xf32>
    %747 = arith.select %744, %745, %746 : vector<16x1xi1>, vector<16x1xf32>
    %748 = vector.broadcast %747 : vector<16x1xf32> to vector<16x32xf32>
    %749 = arith.mulf %735, %748 : vector<16x32xf32>
    %c10_i32 = arith.constant 10 : i32
    %750 = tpu.dynamic_rotate %662 by %c10_i32 dim 0 : vector<16x32xf32>, i32 -> vector<16x32xf32>
    %c-10_i32 = arith.constant -10 : i32
    %751 = vector.broadcast %c-10_i32 : i32 to vector<16x1xi32>
    %752 = arith.addi %1, %751 : vector<16x1xi32>
    %c0_i32_329 = arith.constant 0 : i32
    %753 = vector.broadcast %c0_i32_329 : i32 to vector<16x1xi32>
    %754 = arith.cmpi sge, %752, %753 : vector<16x1xi32>
    %c-10_i32_330 = arith.constant -10 : i32
    %755 = vector.broadcast %c-10_i32_330 : i32 to vector<16x1xi32>
    %756 = arith.addi %1, %755 : vector<16x1xi32>
    %c16_i32_331 = arith.constant 16 : i32
    %757 = vector.broadcast %c16_i32_331 : i32 to vector<16x1xi32>
    %758 = arith.cmpi slt, %756, %757 : vector<16x1xi32>
    %759 = arith.andi %754, %758 : vector<16x1xi1>
    %cst_332 = arith.constant 1.000000e+00 : f32
    %cst_333 = arith.constant 0.000000e+00 : f32
    %760 = vector.broadcast %cst_332 : f32 to vector<16x1xf32>
    %761 = vector.broadcast %cst_333 : f32 to vector<16x1xf32>
    %762 = arith.select %759, %760, %761 : vector<16x1xi1>, vector<16x1xf32>
    %763 = vector.broadcast %762 : vector<16x1xf32> to vector<16x32xf32>
    %764 = arith.mulf %750, %763 : vector<16x32xf32>
    %c11_i32 = arith.constant 11 : i32
    %765 = tpu.dynamic_rotate %662 by %c11_i32 dim 0 : vector<16x32xf32>, i32 -> vector<16x32xf32>
    %c-11_i32 = arith.constant -11 : i32
    %766 = vector.broadcast %c-11_i32 : i32 to vector<16x1xi32>
    %767 = arith.addi %1, %766 : vector<16x1xi32>
    %c0_i32_334 = arith.constant 0 : i32
    %768 = vector.broadcast %c0_i32_334 : i32 to vector<16x1xi32>
    %769 = arith.cmpi sge, %767, %768 : vector<16x1xi32>
    %c-11_i32_335 = arith.constant -11 : i32
    %770 = vector.broadcast %c-11_i32_335 : i32 to vector<16x1xi32>
    %771 = arith.addi %1, %770 : vector<16x1xi32>
    %c16_i32_336 = arith.constant 16 : i32
    %772 = vector.broadcast %c16_i32_336 : i32 to vector<16x1xi32>
    %773 = arith.cmpi slt, %771, %772 : vector<16x1xi32>
    %774 = arith.andi %769, %773 : vector<16x1xi1>
    %cst_337 = arith.constant 1.000000e+00 : f32
    %cst_338 = arith.constant 0.000000e+00 : f32
    %775 = vector.broadcast %cst_337 : f32 to vector<16x1xf32>
    %776 = vector.broadcast %cst_338 : f32 to vector<16x1xf32>
    %777 = arith.select %774, %775, %776 : vector<16x1xi1>, vector<16x1xf32>
    %778 = vector.broadcast %777 : vector<16x1xf32> to vector<16x32xf32>
    %779 = arith.mulf %765, %778 : vector<16x32xf32>
    %c12_i32_339 = arith.constant 12 : i32
    %780 = tpu.dynamic_rotate %662 by %c12_i32_339 dim 0 : vector<16x32xf32>, i32 -> vector<16x32xf32>
    %c-12_i32 = arith.constant -12 : i32
    %781 = vector.broadcast %c-12_i32 : i32 to vector<16x1xi32>
    %782 = arith.addi %1, %781 : vector<16x1xi32>
    %c0_i32_340 = arith.constant 0 : i32
    %783 = vector.broadcast %c0_i32_340 : i32 to vector<16x1xi32>
    %784 = arith.cmpi sge, %782, %783 : vector<16x1xi32>
    %c-12_i32_341 = arith.constant -12 : i32
    %785 = vector.broadcast %c-12_i32_341 : i32 to vector<16x1xi32>
    %786 = arith.addi %1, %785 : vector<16x1xi32>
    %c16_i32_342 = arith.constant 16 : i32
    %787 = vector.broadcast %c16_i32_342 : i32 to vector<16x1xi32>
    %788 = arith.cmpi slt, %786, %787 : vector<16x1xi32>
    %789 = arith.andi %784, %788 : vector<16x1xi1>
    %cst_343 = arith.constant 1.000000e+00 : f32
    %cst_344 = arith.constant 0.000000e+00 : f32
    %790 = vector.broadcast %cst_343 : f32 to vector<16x1xf32>
    %791 = vector.broadcast %cst_344 : f32 to vector<16x1xf32>
    %792 = arith.select %789, %790, %791 : vector<16x1xi1>, vector<16x1xf32>
    %793 = vector.broadcast %792 : vector<16x1xf32> to vector<16x32xf32>
    %794 = arith.mulf %780, %793 : vector<16x32xf32>
    %c13_i32 = arith.constant 13 : i32
    %795 = tpu.dynamic_rotate %662 by %c13_i32 dim 0 : vector<16x32xf32>, i32 -> vector<16x32xf32>
    %c-13_i32 = arith.constant -13 : i32
    %796 = vector.broadcast %c-13_i32 : i32 to vector<16x1xi32>
    %797 = arith.addi %1, %796 : vector<16x1xi32>
    %c0_i32_345 = arith.constant 0 : i32
    %798 = vector.broadcast %c0_i32_345 : i32 to vector<16x1xi32>
    %799 = arith.cmpi sge, %797, %798 : vector<16x1xi32>
    %c-13_i32_346 = arith.constant -13 : i32
    %800 = vector.broadcast %c-13_i32_346 : i32 to vector<16x1xi32>
    %801 = arith.addi %1, %800 : vector<16x1xi32>
    %c16_i32_347 = arith.constant 16 : i32
    %802 = vector.broadcast %c16_i32_347 : i32 to vector<16x1xi32>
    %803 = arith.cmpi slt, %801, %802 : vector<16x1xi32>
    %804 = arith.andi %799, %803 : vector<16x1xi1>
    %cst_348 = arith.constant 1.000000e+00 : f32
    %cst_349 = arith.constant 0.000000e+00 : f32
    %805 = vector.broadcast %cst_348 : f32 to vector<16x1xf32>
    %806 = vector.broadcast %cst_349 : f32 to vector<16x1xf32>
    %807 = arith.select %804, %805, %806 : vector<16x1xi1>, vector<16x1xf32>
    %808 = vector.broadcast %807 : vector<16x1xf32> to vector<16x32xf32>
    %809 = arith.mulf %795, %808 : vector<16x32xf32>
    %c14_i32_350 = arith.constant 14 : i32
    %810 = tpu.dynamic_rotate %662 by %c14_i32_350 dim 0 : vector<16x32xf32>, i32 -> vector<16x32xf32>
    %c-14_i32 = arith.constant -14 : i32
    %811 = vector.broadcast %c-14_i32 : i32 to vector<16x1xi32>
    %812 = arith.addi %1, %811 : vector<16x1xi32>
    %c0_i32_351 = arith.constant 0 : i32
    %813 = vector.broadcast %c0_i32_351 : i32 to vector<16x1xi32>
    %814 = arith.cmpi sge, %812, %813 : vector<16x1xi32>
    %c-14_i32_352 = arith.constant -14 : i32
    %815 = vector.broadcast %c-14_i32_352 : i32 to vector<16x1xi32>
    %816 = arith.addi %1, %815 : vector<16x1xi32>
    %c16_i32_353 = arith.constant 16 : i32
    %817 = vector.broadcast %c16_i32_353 : i32 to vector<16x1xi32>
    %818 = arith.cmpi slt, %816, %817 : vector<16x1xi32>
    %819 = arith.andi %814, %818 : vector<16x1xi1>
    %cst_354 = arith.constant 1.000000e+00 : f32
    %cst_355 = arith.constant 0.000000e+00 : f32
    %820 = vector.broadcast %cst_354 : f32 to vector<16x1xf32>
    %821 = vector.broadcast %cst_355 : f32 to vector<16x1xf32>
    %822 = arith.select %819, %820, %821 : vector<16x1xi1>, vector<16x1xf32>
    %823 = vector.broadcast %822 : vector<16x1xf32> to vector<16x32xf32>
    %824 = arith.mulf %810, %823 : vector<16x32xf32>
    %c15_i32_356 = arith.constant 15 : i32
    %825 = tpu.dynamic_rotate %662 by %c15_i32_356 dim 0 : vector<16x32xf32>, i32 -> vector<16x32xf32>
    %c-15_i32 = arith.constant -15 : i32
    %826 = vector.broadcast %c-15_i32 : i32 to vector<16x1xi32>
    %827 = arith.addi %1, %826 : vector<16x1xi32>
    %c0_i32_357 = arith.constant 0 : i32
    %828 = vector.broadcast %c0_i32_357 : i32 to vector<16x1xi32>
    %829 = arith.cmpi sge, %827, %828 : vector<16x1xi32>
    %c-15_i32_358 = arith.constant -15 : i32
    %830 = vector.broadcast %c-15_i32_358 : i32 to vector<16x1xi32>
    %831 = arith.addi %1, %830 : vector<16x1xi32>
    %c16_i32_359 = arith.constant 16 : i32
    %832 = vector.broadcast %c16_i32_359 : i32 to vector<16x1xi32>
    %833 = arith.cmpi slt, %831, %832 : vector<16x1xi32>
    %834 = arith.andi %829, %833 : vector<16x1xi1>
    %cst_360 = arith.constant 1.000000e+00 : f32
    %cst_361 = arith.constant 0.000000e+00 : f32
    %835 = vector.broadcast %cst_360 : f32 to vector<16x1xf32>
    %836 = vector.broadcast %cst_361 : f32 to vector<16x1xf32>
    %837 = arith.select %834, %835, %836 : vector<16x1xi1>, vector<16x1xf32>
    %838 = vector.broadcast %837 : vector<16x1xf32> to vector<16x32xf32>
    %839 = arith.mulf %825, %838 : vector<16x32xf32>
    %840 = tpu.concatenate %662, %665, %668, %683, %686, %701, %716, %731, %734, %749, %764, %779, %794, %809, %824, %839 in 1 : vector<16x32xf32>, vector<16x32xf32>, vector<16x32xf32>, vector<16x32xf32>, vector<16x32xf32>, vector<16x32xf32>, vector<16x32xf32>, vector<16x32xf32>, vector<16x32xf32>, vector<16x32xf32>, vector<16x32xf32>, vector<16x32xf32>, vector<16x32xf32>, vector<16x32xf32>, vector<16x32xf32>, vector<16x32xf32> -> vector<16x512xf32>
    %c0_362 = arith.constant 0 : index
    %c0_363 = arith.constant 0 : index
    %841 = vector.load %arg12[%c0_362, %c0_363] : memref<512x16xbf16, #tpu.memory_space<vmem>>, vector<512x16xbf16>
    %842 = arith.truncf %840 : vector<16x512xf32> to vector<16x512xbf16>
    %cst_364 = arith.constant dense<0.000000e+00> : vector<16x16xf32>
    %843 = tpu.matmul %842, %841, %cst_364 {dimension_numbers = #tpu.dot_dimension_numbers<[1], [0], [0], [1], [0, 0, 1, 1], [], []>} : vector<16x512xbf16>, vector<512x16xbf16>, vector<16x16xf32> -> vector<16x16xf32>
    %c0_365 = arith.constant 0 : index
    %c0_366 = arith.constant 0 : index
    %844 = vector.load %arg13[%c0_365, %c0_366] : memref<1x16xf32, #tpu.memory_space<vmem>>, vector<1x16xf32>
    %845 = vector.broadcast %844 : vector<1x16xf32> to vector<16x16xf32>
    %846 = arith.addf %843, %845 : vector<16x16xf32>
    %c0_367 = arith.constant 0 : index
    %c0_368 = arith.constant 0 : index
    %847 = vector.load %arg25[%c0_367, %c0_368] : memref<16x16xf32, #tpu.memory_space<vmem>>, vector<16x16xf32>
    tpu.vector_store %arg25[%c0_367, %c0_368], %846 {strides = array<i32>} : memref<16x16xf32, #tpu.memory_space<vmem>>, vector<16x16xf32>,
    %c0_369 = arith.constant 0 : index
    %c0_370 = arith.constant 0 : index
    %848 = vector.load %arg16[%c0_369, %c0_370] : memref<32x512xbf16, #tpu.memory_space<vmem>>, vector<32x512xbf16>
    %849 = arith.truncf %662 : vector<16x32xf32> to vector<16x32xbf16>
    %cst_371 = arith.constant dense<0.000000e+00> : vector<16x512xf32>
    %850 = tpu.matmul %849, %848, %cst_371 {dimension_numbers = #tpu.dot_dimension_numbers<[1], [0], [0], [1], [0, 0, 1, 1], [], []>} : vector<16x32xbf16>, vector<32x512xbf16>, vector<16x512xf32> -> vector<16x512xf32>
    %c0_372 = arith.constant 0 : index
    %c0_373 = arith.constant 0 : index
    %851 = vector.load %arg14[%c0_372, %c0_373] : memref<9x16xbf16, #tpu.memory_space<vmem>>, vector<9x16xbf16>
    %852 = arith.truncf %850 : vector<16x512xf32> to vector<16x512xbf16>
    %cst_374 = arith.constant dense<0.000000e+00> : vector<9x512xf32>
    %853 = tpu.matmul %851, %852, %cst_374 {dimension_numbers = #tpu.dot_dimension_numbers<[1], [0], [0], [1], [0, 0, 1, 1], [], []>} : vector<9x16xbf16>, vector<16x512xbf16>, vector<9x512xf32> -> vector<9x512xf32>
    %c0_375 = arith.constant 0 : index
    %c0_376 = arith.constant 0 : index
    %854 = vector.load %arg15[%c0_375, %c0_376] : memref<9x16xbf16, #tpu.memory_space<vmem>>, vector<9x16xbf16>
    %855 = arith.truncf %850 : vector<16x512xf32> to vector<16x512xbf16>
    %cst_377 = arith.constant dense<0.000000e+00> : vector<9x512xf32>
    %856 = tpu.matmul %854, %855, %cst_377 {dimension_numbers = #tpu.dot_dimension_numbers<[1], [0], [0], [1], [0, 0, 1, 1], [], []>} : vector<9x16xbf16>, vector<16x512xbf16>, vector<9x512xf32> -> vector<9x512xf32>
    %c0_378 = arith.constant 0 : index
    %c0_379 = arith.constant 0 : index
    %857 = vector.load %arg17[%c0_378, %c0_379] : memref<9x512xf32, #tpu.memory_space<vmem>>, vector<9x512xf32>
    %c0_380 = arith.constant 0 : index
    %c0_381 = arith.constant 0 : index
    %858 = vector.load %arg18[%c0_380, %c0_381] : memref<9x512xf32, #tpu.memory_space<vmem>>, vector<9x512xf32>
    %859 = arith.mulf %853, %857 : vector<9x512xf32>
    %860 = arith.mulf %856, %858 : vector<9x512xf32>
    %861 = arith.subf %859, %860 : vector<9x512xf32>
    %862 = arith.mulf %853, %858 : vector<9x512xf32>
    %863 = arith.mulf %856, %857 : vector<9x512xf32>
    %864 = arith.addf %862, %863 : vector<9x512xf32>
    %c0_382 = arith.constant 0 : index
    %c0_383 = arith.constant 0 : index
    %865 = vector.load %arg19[%c0_382, %c0_383] : memref<512x16xbf16, #tpu.memory_space<vmem>>, vector<512x16xbf16>
    %866 = arith.truncf %861 : vector<9x512xf32> to vector<9x512xbf16>
    %cst_384 = arith.constant dense<0.000000e+00> : vector<9x16xf32>
    %867 = tpu.matmul %866, %865, %cst_384 {dimension_numbers = #tpu.dot_dimension_numbers<[1], [0], [0], [1], [0, 0, 1, 1], [], []>} : vector<9x512xbf16>, vector<512x16xbf16>, vector<9x16xf32> -> vector<9x16xf32>
    %c0_385 = arith.constant 0 : index
    %c0_386 = arith.constant 0 : index
    %868 = vector.load %arg19[%c0_385, %c0_386] : memref<512x16xbf16, #tpu.memory_space<vmem>>, vector<512x16xbf16>
    %869 = arith.truncf %864 : vector<9x512xf32> to vector<9x512xbf16>
    %cst_387 = arith.constant dense<0.000000e+00> : vector<9x16xf32>
    %870 = tpu.matmul %869, %868, %cst_387 {dimension_numbers = #tpu.dot_dimension_numbers<[1], [0], [0], [1], [0, 0, 1, 1], [], []>} : vector<9x512xbf16>, vector<512x16xbf16>, vector<9x16xf32> -> vector<9x16xf32>
    %c0_388 = arith.constant 0 : index
    %c0_389 = arith.constant 0 : index
    %871 = vector.load %arg20[%c0_388, %c0_389] : memref<16x9xbf16, #tpu.memory_space<vmem>>, vector<16x9xbf16>
    %872 = arith.truncf %867 : vector<9x16xf32> to vector<9x16xbf16>
    %cst_390 = arith.constant dense<0.000000e+00> : vector<16x16xf32>
    %873 = tpu.matmul %871, %872, %cst_390 {dimension_numbers = #tpu.dot_dimension_numbers<[1], [0], [0], [1], [0, 0, 1, 1], [], []>} : vector<16x9xbf16>, vector<9x16xbf16>, vector<16x16xf32> -> vector<16x16xf32>
    %c0_391 = arith.constant 0 : index
    %c0_392 = arith.constant 0 : index
    %874 = vector.load %arg21[%c0_391, %c0_392] : memref<16x9xbf16, #tpu.memory_space<vmem>>, vector<16x9xbf16>
    %875 = arith.truncf %870 : vector<9x16xf32> to vector<9x16xbf16>
    %cst_393 = arith.constant dense<0.000000e+00> : vector<16x16xf32>
    %876 = tpu.matmul %874, %875, %cst_393 {dimension_numbers = #tpu.dot_dimension_numbers<[1], [0], [0], [1], [0, 0, 1, 1], [], []>} : vector<16x9xbf16>, vector<9x16xbf16>, vector<16x16xf32> -> vector<16x16xf32>
    %877 = arith.addf %873, %876 : vector<16x16xf32>
    %c0_394 = arith.constant 0 : index
    %c0_395 = arith.constant 0 : index
    %878 = vector.load %arg22[%c0_394, %c0_395] : memref<16x16xf32, #tpu.memory_space<vmem>>, vector<16x16xf32>
    %879 = arith.addf %877, %878 : vector<16x16xf32>
    %880 = tpu.concatenate %846, %879 in 1 : vector<16x16xf32>, vector<16x16xf32> -> vector<16x32xf32>
    %c0_396 = arith.constant 0 : index
    %c0_397 = arith.constant 0 : index
    %881 = vector.load %arg23[%c0_396, %c0_397] : memref<32x4xbf16, #tpu.memory_space<vmem>>, vector<32x4xbf16>
    %882 = arith.truncf %880 : vector<16x32xf32> to vector<16x32xbf16>
    %cst_398 = arith.constant dense<0.000000e+00> : vector<16x4xf32>
    %883 = tpu.matmul %882, %881, %cst_398 {dimension_numbers = #tpu.dot_dimension_numbers<[1], [0], [0], [1], [0, 0, 1, 1], [], []>} : vector<16x32xbf16>, vector<32x4xbf16>, vector<16x4xf32> -> vector<16x4xf32>
    %c0_399 = arith.constant 0 : index
    %c0_400 = arith.constant 0 : index
    %884 = vector.load %arg24[%c0_399, %c0_400] : memref<1x4xf32, #tpu.memory_space<vmem>>, vector<1x4xf32>
    %885 = vector.broadcast %884 : vector<1x4xf32> to vector<16x4xf32>
    %886 = arith.addf %883, %885 : vector<16x4xf32>
    %887 = arith.subf %886, %0 : vector<16x4xf32>
    %888 = arith.mulf %887, %887 : vector<16x4xf32>
    %cst_401 = arith.constant dense<0.000000e+00> : vector<16xf32>
    %889 = vector.multi_reduction <add>, %888, %cst_401 [1] : vector<16x4xf32> to vector<16xf32>
    %890 = vector.shape_cast %889 : vector<16xf32> to vector<16x1xf32>
    %c0_402 = arith.constant 0 : index
    %c0_403 = arith.constant 0 : index
    %891 = vector.load %arg26[%c0_402, %c0_403] : memref<16x1xf32, #tpu.memory_space<vmem>>, vector<16x1xf32>
    tpu.vector_store %arg26[%c0_402, %c0_403], %890 {strides = array<i32>} : memref<16x1xf32, #tpu.memory_space<vmem>>, vector<16x1xf32>,
    return
  }
  func.func @transform_0(%arg0: i32) -> (i32, i32) {
    %c0_i32 = arith.constant 0 : i32
    %c0_i32_0 = arith.constant 0 : i32
    return %arg0, %c0_i32 : i32, i32
  }
  func.func @transform_1(%arg0: i32) -> (i32, i32) {
    %c0_i32 = arith.constant 0 : i32
    %c0_i32_0 = arith.constant 0 : i32
    %c0_i32_1 = arith.constant 0 : i32
    return %c0_i32, %c0_i32_0 : i32, i32
  }
  func.func @transform_2(%arg0: i32) -> (i32, i32) {
    %c0_i32 = arith.constant 0 : i32
    %c0_i32_0 = arith.constant 0 : i32
    %c0_i32_1 = arith.constant 0 : i32
    return %c0_i32, %c0_i32_0 : i32, i32
  }
  func.func @transform_3(%arg0: i32) -> (i32, i32) {
    %c0_i32 = arith.constant 0 : i32
    %c0_i32_0 = arith.constant 0 : i32
    %c0_i32_1 = arith.constant 0 : i32
    return %c0_i32, %c0_i32_0 : i32, i32
  }
  func.func @transform_4(%arg0: i32) -> (i32, i32) {
    %c0_i32 = arith.constant 0 : i32
    %c0_i32_0 = arith.constant 0 : i32
    %c0_i32_1 = arith.constant 0 : i32
    return %c0_i32, %c0_i32_0 : i32, i32
  }
  func.func @transform_5(%arg0: i32) -> (i32, i32, i32) {
    %c0_i32 = arith.constant 0 : i32
    %c0_i32_0 = arith.constant 0 : i32
    %c0_i32_1 = arith.constant 0 : i32
    %c0_i32_2 = arith.constant 0 : i32
    return %c0_i32, %c0_i32_0, %c0_i32_1 : i32, i32, i32
  }
  func.func @transform_6(%arg0: i32) -> (i32, i32, i32) {
    %c0_i32 = arith.constant 0 : i32
    %c0_i32_0 = arith.constant 0 : i32
    %c0_i32_1 = arith.constant 0 : i32
    %c0_i32_2 = arith.constant 0 : i32
    return %c0_i32, %c0_i32_0, %c0_i32_1 : i32, i32, i32
  }
  func.func @transform_7(%arg0: i32) -> (i32, i32, i32) {
    %c0_i32 = arith.constant 0 : i32
    %c0_i32_0 = arith.constant 0 : i32
    %c0_i32_1 = arith.constant 0 : i32
    %c0_i32_2 = arith.constant 0 : i32
    return %c0_i32, %c0_i32_0, %c0_i32_1 : i32, i32, i32
  }
  func.func @transform_8(%arg0: i32) -> (i32, i32, i32) {
    %c0_i32 = arith.constant 0 : i32
    %c0_i32_0 = arith.constant 0 : i32
    %c0_i32_1 = arith.constant 0 : i32
    %c0_i32_2 = arith.constant 0 : i32
    return %c0_i32, %c0_i32_0, %c0_i32_1 : i32, i32, i32
  }
  func.func @transform_9(%arg0: i32) -> (i32, i32) {
    %c0_i32 = arith.constant 0 : i32
    %c0_i32_0 = arith.constant 0 : i32
    %c0_i32_1 = arith.constant 0 : i32
    return %c0_i32, %c0_i32_0 : i32, i32
  }
  func.func @transform_10(%arg0: i32) -> (i32, i32) {
    %c0_i32 = arith.constant 0 : i32
    %c0_i32_0 = arith.constant 0 : i32
    %c0_i32_1 = arith.constant 0 : i32
    return %c0_i32, %c0_i32_0 : i32, i32
  }
  func.func @transform_11(%arg0: i32) -> (i32, i32) {
    %c0_i32 = arith.constant 0 : i32
    %c0_i32_0 = arith.constant 0 : i32
    %c0_i32_1 = arith.constant 0 : i32
    return %c0_i32, %c0_i32_0 : i32, i32
  }
  func.func @transform_12(%arg0: i32) -> (i32, i32) {
    %c0_i32 = arith.constant 0 : i32
    %c0_i32_0 = arith.constant 0 : i32
    %c0_i32_1 = arith.constant 0 : i32
    return %c0_i32, %c0_i32_0 : i32, i32
  }
  func.func @transform_13(%arg0: i32) -> (i32, i32) {
    %c0_i32 = arith.constant 0 : i32
    %c0_i32_0 = arith.constant 0 : i32
    %c0_i32_1 = arith.constant 0 : i32
    return %c0_i32, %c0_i32_0 : i32, i32
  }
  func.func @transform_14(%arg0: i32) -> (i32, i32) {
    %c0_i32 = arith.constant 0 : i32
    %c0_i32_0 = arith.constant 0 : i32
    %c0_i32_1 = arith.constant 0 : i32
    return %c0_i32, %c0_i32_0 : i32, i32
  }
  func.func @transform_15(%arg0: i32) -> (i32, i32) {
    %c0_i32 = arith.constant 0 : i32
    %c0_i32_0 = arith.constant 0 : i32
    %c0_i32_1 = arith.constant 0 : i32
    return %c0_i32, %c0_i32_0 : i32, i32
  }
  func.func @transform_16(%arg0: i32) -> (i32, i32) {
    %c0_i32 = arith.constant 0 : i32
    %c0_i32_0 = arith.constant 0 : i32
    %c0_i32_1 = arith.constant 0 : i32
    return %c0_i32, %c0_i32_0 : i32, i32
  }
  func.func @transform_17(%arg0: i32) -> (i32, i32) {
    %c0_i32 = arith.constant 0 : i32
    %c0_i32_0 = arith.constant 0 : i32
    %c0_i32_1 = arith.constant 0 : i32
    return %c0_i32, %c0_i32_0 : i32, i32
  }
  func.func @transform_18(%arg0: i32) -> (i32, i32) {
    %c0_i32 = arith.constant 0 : i32
    %c0_i32_0 = arith.constant 0 : i32
    %c0_i32_1 = arith.constant 0 : i32
    return %c0_i32, %c0_i32_0 : i32, i32
  }
  func.func @transform_19(%arg0: i32) -> (i32, i32) {
    %c0_i32 = arith.constant 0 : i32
    %c0_i32_0 = arith.constant 0 : i32
    %c0_i32_1 = arith.constant 0 : i32
    return %c0_i32, %c0_i32_0 : i32, i32
  }
  func.func @transform_20(%arg0: i32) -> (i32, i32) {
    %c0_i32 = arith.constant 0 : i32
    %c0_i32_0 = arith.constant 0 : i32
    %c0_i32_1 = arith.constant 0 : i32
    return %c0_i32, %c0_i32_0 : i32, i32
  }
  func.func @transform_21(%arg0: i32) -> (i32, i32) {
    %c0_i32 = arith.constant 0 : i32
    %c0_i32_0 = arith.constant 0 : i32
    %c0_i32_1 = arith.constant 0 : i32
    return %c0_i32, %c0_i32_0 : i32, i32
  }
  func.func @transform_22(%arg0: i32) -> (i32, i32) {
    %c0_i32 = arith.constant 0 : i32
    %c0_i32_0 = arith.constant 0 : i32
    %c0_i32_1 = arith.constant 0 : i32
    return %c0_i32, %c0_i32_0 : i32, i32
  }
  func.func @transform_23(%arg0: i32) -> (i32, i32) {
    %c0_i32 = arith.constant 0 : i32
    %c0_i32_0 = arith.constant 0 : i32
    %c0_i32_1 = arith.constant 0 : i32
    return %c0_i32, %c0_i32_0 : i32, i32
  }
  func.func @transform_24(%arg0: i32) -> (i32, i32) {
    %c0_i32 = arith.constant 0 : i32
    %c0_i32_0 = arith.constant 0 : i32
    return %arg0, %c0_i32 : i32, i32
  }
  func.func @transform_25(%arg0: i32) -> (i32, i32) {
    %c0_i32 = arith.constant 0 : i32
    %c0_i32_0 = arith.constant 0 : i32
    return %arg0, %c0_i32 : i32, i32
  }
}

</mosaic_0001>

<bundles_post_ra>
// kernel: tpu_custom_call.1
= control target key start
LH: loop header
LB: loop body
LE: loop exit
PB: predicated region body
PF: predicated region fallthrough
CT: control target
= control target key end

     0   :  { %s7507_s29 = smov 0   ;;  %s9205_s0 = inlined_call_operand.vmem [shape: f32[32,4], index: 0, kind: input, shape index: {}]   ;;  %s9206_s1 = inlined_call_operand.vmem [shape: bf16[12,32], index: 1, kind: input, shape index: {}]   ;;  %s9207_s2 = inlined_call_operand.vmem [shape: f32[1,32], index: 2, kind: input, shape index: {}]   ;;  %s9208_s3 = inlined_call_operand.vmem [shape: bf16[32,64], index: 3, kind: input, shape index: {}]   ;;  %s9209_s4 = inlined_call_operand.vmem [shape: f32[1,64], index: 4, kind: input, shape index: {}]   ;;  %s9210_s5 = inlined_call_operand.vmem [shape: bf16[11,192,64], index: 5, kind: input, shape index: {}]   ;;  %s9211_s6 = inlined_call_operand.vmem [shape: f32[11,1,64], index: 6, kind: input, shape index: {}]   ;;  %s9212_s7 = inlined_call_operand.vmem [shape: bf16[11,192,64], index: 7, kind: input, shape index: {}]   ;;  %s9213_s8 = inlined_call_operand.vmem [shape: f32[11,1,64], index: 8, kind: input, shape index: {}]   ;;  %s9214_s9 = inlined_call_operand.vmem [shape: bf16[64,64], index: 9, kind: input, shape index: {}]   ;;  %s9215_s10 = inlined_call_operand.vmem [shape: f32[1,64], index: 10, kind: input, shape index: {}]   ;;  %s9216_s11 = inlined_call_operand.vmem [shape: bf16[512,16], index: 11, kind: input, shape index: {}]   ;;  %s9217_s12 = inlined_call_operand.vmem [shape: f32[1,16], index: 12, kind: input, shape index: {}]   ;;  %s9218_s13 = inlined_call_operand.vmem [shape: bf16[9,16], index: 13, kind: input, shape index: {}]   ;;  %s9219_s14 = inlined_call_operand.vmem [shape: bf16[9,16], index: 14, kind: input, shape index: {}]   ;;  %s9220_s15 = inlined_call_operand.vmem [shape: bf16[32,512], index: 15, kind: input, shape index: {}]   ;;  %s9221_s16 = inlined_call_operand.vmem [shape: f32[9,512], index: 16, kind: input, shape index: {}]   ;;  %s9222_s17 = inlined_call_operand.vmem [shape: f32[9,512], index: 17, kind: input, shape index: {}]   ;;  %s9223_s18 = inlined_call_operand.vmem [shape: bf16[512,16], index: 18, kind: input, shape index: {}]   ;;  %s9224_s19 = inlined_call_operand.vmem [shape: bf16[16,9], index: 19, kind: input, shape index: {}]   ;;  %s9225_s20 = inlined_call_operand.vmem [shape: bf16[16,9], index: 20, kind: input, shape index: {}]   ;;  %s9226_s21 = inlined_call_operand.vmem [shape: f32[16,16], index: 21, kind: input, shape index: {}]   ;;  %s9227_s22 = inlined_call_operand.vmem [shape: bf16[32,4], index: 22, kind: input, shape index: {}]   ;;  %s9228_s23 = inlined_call_operand.vmem [shape: f32[1,4], index: 23, kind: input, shape index: {}]   ;;  %s9229_s24 = inlined_call_operand.vmem [shape: f32[32,16], index: 24, kind: output, shape index: {0}]   ;;  %s9230_s25 = inlined_call_operand.vmem [shape: f32[32,1], index: 25, kind: output, shape index: {1}]  }
   0x1   :  { %9255 = sst [smem:[#allocation13_spill]] %s9205_s0 }
   0x2   :  { %9256 = sst [smem:[#allocation14_spill]] %s9206_s1 }
   0x3   :  { %9257 = sst [smem:[#allocation15_spill]] %s9207_s2 }
   0x4   :  { %9258 = sst [smem:[#allocation16_spill]] %s9208_s3 }
   0x5   :  { %9259 = sst [smem:[#allocation17_spill]] %s9209_s4 }
   0x6   :  { %9260 = sst [smem:[#allocation18_spill]] %s9210_s5 }
   0x7   :  { %9261 = sst [smem:[#allocation19_spill]] %s9211_s6 }
   0x8   :  { %9262 = sst [smem:[#allocation20_spill]] %s9212_s7 }
   0x9   :  { %9263 = sst [smem:[#allocation21_spill]] %s9213_s8 }
   0xa   :  { %9264 = sst [smem:[#allocation22_spill]] %s9214_s9 }
   0xb   :  { %9265 = sst [smem:[#allocation23_spill]] %s9230_s25 }
   0xc LB: > { %9266 = sst [smem:[#allocation2_spill]] %s7365_s29  ;;  %s5867_s2 = sadd.s32 4294967295, %s7365_s29   ;;  %s7365_s29 = sphi %s7507_s29, %s36_s29  }
   0xd   : > { %p5871_p0 = scmp.ge.s32.totalorder %s7365_s29, 1  ;;  %p691_p1 = scmp.lt.s32.totalorder %s7365_s29, 3 }
   0xf   : > { %p692_p2 = pnand %p5871_p0, %p691_p1 }
  0x11   : > { %695 = sbr.rel (%p692_p2) target bundleno = 8484 (0x2124), region = 116 }
  0x18   : > { %s5872_s6 = sshll.u32 %s5867_s2, 1  ;;  %v785_v0 = vlaneseq  ;;  %vm839_vm0 = vcmask 1045504   ;;  %v9243_v2 = vmov 0.0   ;;  %s9267_s3 = sld [smem:[#allocation14_spill]]  ;;  %vm7368_vm1 = vmmov 0  }
  0x19   : > { %p765_p3 = scmp.lt.s32.totalorder %s5872_s6, 3  ;;  %6673 = vmatprep.subr.bf16.mxu0 %v9243_v2  ;;  %6679 = vmatprep.subr.bf16.mxu1 %v9243_v2  ;;  %s9268_s27 = sld [smem:[#allocation13_spill]]  ;;  %vm814_vm4 = vcmask 31744   ;;  %vm817_vm5 = vcmask 64512   ;;  %vm835_vm6 = vcmask 97280   ;;  %vm908_vm7 = vcmask 261120  }
  0x1a   : > { %v7515_v1 = vshrl.u32 %v785_v0, 7  ;;  %6675 = vmatprep.mubr.msk.bf16.mxu0 %vm7368_vm1, %v9243_v2  ;;  %6683 = vmatprep.mubr.msk.bf16.mxu1 %vm7368_vm1, %v9243_v2  ;;  %s7369_s28 = smov 4   ;;  %s7370_s9 = smov 8   ;;  %v7371_v39 = vmov 0   ;;  %vm1035_vm9 = vcmask 523264  }
  0x1b   : > { %s9302_s6 = smov (!%p765_p3, %s5872_s6), 3  ;;  %s9269_s2 = sld [smem:[#allocation16_spill]] }
  0x1c   : > { %s7522_s26 = sshll.u32 %s9302_s6, 3  ;;  %vm795_vm2 = vcmp.lt.s32.totalorder %v7515_v1, 7  ;;  %vm790_vm3 = vcmp.lt.s32.totalorder %v7515_v1, 1  ;;  %s9270_s1 = sld [smem:[#allocation15_spill]]  ;;  %vm1416_vm12 = vcmp.lt.s32.totalorder %v7515_v1, 6  ;;  %vm1399_vm13 = vcmp.lt.s32.totalorder %v7515_v1, 2 }
  0x1d   : > { %s9272_s0 = sld [smem:[#allocation17_spill]]  ;;  %s9237_s7 = smov 64  }
  0x1e   : > { %v7028_v3 = vld [vmem:[%s9267_s3] sm:$0x3f]   ;;  %s9273_s8 = sld [smem:[#allocation20_spill]]  ;;  %s9274_s3 = sld [smem:[#allocation19_spill]] }
  0x1f   : > { %v841_v4 = vsel %vm839_vm0, %v7028_v3, 0  ;;  %s7530_s4 = scalar_lea.vmem %s9268_s27, %s7522_s26  ;;  %s9276_s6 = smov 64   ;;  %vm1805_vm0 = vcmp.lt.s32.totalorder %v7515_v1, 4 }
  0x20   : > { %6674 = vmatpush3.bf16.msra.mxu0 %v841_v4  ;;  %v783_v5 = vld [vmem:[%s7530_s4] sm:$0xff]  ;;  %v784_v6 = vld [vmem:[%s7530_s4 + $0x8] sm:$0xff]  ;;  %s7373_s29 = smov 32   ;;  %s774_s30 = scalar_lea.vmem %s9229_s24, %s7522_s26 }
  0x21   : > { %v789_v7 = vrot.slane %v784_v6, 7  ;;  %v6913_v8 = vpack.i.bf16 %v784_v6, %v783_v5  ;;  %v788_v9 = vrot.slane %v783_v5, 7  ;;  %v793_v10 = vrot.slane %v783_v5, 1  ;;  %v7029_v28 = vld [vmem:[%s9269_s2] sm:$0xff]   ;;  %v7030_v29 = vld [vmem:[%s9269_s2 + $0x8] sm:$0xff]   ;;  %1122 = vmatprep.subr.bf16.mxu0 %v7371_v39  ;;  %s9299_s25 = sld [smem:[#allocation23_spill]] }
  0x22   : > { %v794_v11 = vrot.slane %v784_v6, 1  ;;  %6680 = vmatpush3.bf16.msra.mxu1 %v7029_v28  ;;  %v5878_v30 = vld [vmem:[%s9270_s1] ss:$0 sm:$0xff]  ;;  %v7621_v5 = vadd.s32 8, %v7515_v1  ;;  %v999_v28 = vadd.s32 4294967295, %v7515_v1  ;;  %s9277_s1 = sld [smem:[#allocation22_spill]] }
  0x23   : > { %6914 = vrot.lane.b32.xlu0 %v6913_v8, %s7369_s28  ;;  %v791_v18 = vsel %vm790_vm3, %v788_v9, %v789_v7  ;;  %v792_v19 = vsel %vm790_vm3, %v789_v7, %v788_v9  ;;  %6681 = vmatprep.subr.bf16.mxu1 %v9243_v2  ;;  %s9271_s28 = sld [smem:[#allocation18_spill]]  ;;  %v5881_v50 = vld [vmem:[%s9272_s0] ss:$0 sm:$0xff] }
  0x24   : > { %v796_v12 = vsel %vm795_vm2, %v793_v10, %v794_v11  ;;  %v797_v13 = vsel %vm795_vm2, %v794_v11, %v793_v10  ;;  %v1016_v7 = vadd.s32 1, %v7621_v5  ;;  %vm1001_vm10 = vcmp.ge.s32.totalorder %v999_v28, 0 }
  0x25   : > { %v6918_v14 = vpack.i.bf16 %v797_v13, %v796_v12 }
  0x26   : > { %6682 = vmatpush3.bf16.msra.mxu1 %v7030_v29  ;;  %vm1020_vm8 = vcmp.lt.s32.totalorder %v1016_v7, 16  ;;  %v7646_v29 = vsel %vm1001_vm10, 1.0, %v9243_v2  ;;  %v7054_v7 = vld [vmem:[%s9273_s8 + $0x58] sm:$0xff]   ;;  %vm4135_vm10 = vcmp.lt.s32.totalorder %v7515_v1, 5 }
  0x27   : > { %6919 = vrot.lane.b32.xlu0 %v6918_v14, %s7370_s9  ;;  %1311 = vmatprep.subr.bf16.mxu1 %v7371_v39  ;;  %s9275_s9 = sld [smem:[#allocation21_spill]]  ;;  %s780_s2 = scalar_lea.vmem %s9299_s25, %s7522_s26 }
  0x29   : > { %v7031_v38 = vld [vmem:[%s9271_s28] sm:$0xff]   ;;  %v7032_v40 = vld [vmem:[%s9271_s28 + $0x8] sm:$0xff]   ;;  %v7033_v41 = vld [vmem:[%s9271_s28 + $0x10] sm:$0xff]  }
  0x2a   : > { %v7034_v42 = vld [vmem:[%s9271_s28 + $0x18] sm:$0xff]   ;;  %v7035_v43 = vld [vmem:[%s9271_s28 + $0x20] sm:$0xff]   ;;  %v7036_v44 = vld [vmem:[%s9271_s28 + $0x28] sm:$0xff]  }
  0x2b   : > { %v7037_v45 = vld [vmem:[%s9271_s28 + $0x30] sm:$0xff]   ;;  %v7038_v46 = vld [vmem:[%s9271_s28 + $0x38] sm:$0xff]   ;;  %v7039_v47 = vld [vmem:[%s9271_s28 + $0x40] sm:$0xff]  }
  0x2c   : > { %v7040_v48 = vld [vmem:[%s9271_s28 + $0x48] sm:$0xff]   ;;  %v7041_v49 = vld [vmem:[%s9271_s28 + $0x50] sm:$0xff]   ;;  %v7042_v6 = vld [vmem:[%s9271_s28 + $0x58] sm:$0xff]  }
  0x95   : > { %v6915_v15 = vpop.permute.xlu0 %6914 }
  0x96   : > { %v6917_v16 = vunpack.i.h.bf16 %v6915_v15  ;;  %v6916_v17 = vunpack.i.l.bf16 %v6915_v15 }
  0x98   : > { %v815_v23 = vsel %vm814_vm4, %v792_v19, %v6916_v17  ;;  %v816_v24 = vsel %vm814_vm4, %v791_v18, %v6917_v16  ;;  %v7631_v17 = vsel %vm1020_vm8, 1.0, %v9243_v2 }
  0x99   : > { %v6920_v20 = vpop.permute.xlu0 %6919 }
  0x9a   : > { %v6922_v21 = vunpack.i.h.bf16 %v6920_v20  ;;  %v6921_v22 = vunpack.i.l.bf16 %v6920_v20 }
  0x9c   : > { %v818_v25 = vsel %vm817_vm5, %v815_v23, %v6921_v22  ;;  %v819_v26 = vsel %vm817_vm5, %v816_v24, %v6922_v21 }
  0x9d   : > { %v822_v27 = vpack.c.bf16 %v819_v26, %v818_v25 }
  0x9f   : > { %6676 = vmatmul.mubr.msk.bf16.vlgmr.msra.gmra.mrb[0].mxu0 %vm835_vm6, %v822_v27 }
  0xa0   : > { %1123 = vmatpush1.bf16.msra.mxu0 %v7031_v38  ;;  %v7044_v38 = vld [vmem:[%s9273_s8 + $0x8] sm:$0xff]  }
  0xa1   : > { %1124 = vmatprep.subr.bf16.mxu0 %v7371_v39 }
  0xa4   : > { %1125 = vmatpush1.bf16.msra.mxu0 %v7032_v40  ;;  %v7045_v40 = vld [vmem:[%s9273_s8 + $0x10] sm:$0xff]  }
  0xa5   : > { %1126 = vmatprep.subr.bf16.mxu0 %v7371_v39 }
  0xa8   : > { %1127 = vmatpush1.bf16.msra.mxu0 %v7033_v41  ;;  %v7046_v41 = vld [vmem:[%s9273_s8 + $0x18] sm:$0xff]  }
  0xa9   : > { %1128 = vmatprep.subr.bf16.mxu0 %v7371_v39 }
  0xac   : > { %1129 = vmatpush1.bf16.msra.mxu0 %v7034_v42  ;;  %v7047_v42 = vld [vmem:[%s9273_s8 + $0x20] sm:$0xff]  }
  0xad   : > { %1130 = vmatprep.subr.bf16.mxu0 %v7371_v39 }
  0xb0   : > { %1131 = vmatpush1.bf16.msra.mxu0 %v7035_v43  ;;  %v7048_v43 = vld [vmem:[%s9273_s8 + $0x28] sm:$0xff]  }
  0xb1   : > { %1132 = vmatprep.subr.bf16.mxu0 %v7371_v39 }
  0xb4   : > { %1133 = vmatpush1.bf16.msra.mxu0 %v7036_v44  ;;  %v7049_v44 = vld [vmem:[%s9273_s8 + $0x30] sm:$0xff]  }
  0xb5   : > { %1134 = vmatprep.subr.bf16.mxu0 %v7371_v39 }
  0xb8   : > { %1135 = vmatpush1.bf16.msra.mxu0 %v7037_v45  ;;  %v7050_v45 = vld [vmem:[%s9273_s8 + $0x38] sm:$0xff]  }
  0xb9   : > { %1136 = vmatprep.subr.bf16.mxu0 %v7371_v39 }
  0xbc   : > { %1137 = vmatpush1.bf16.msra.mxu0 %v7038_v46  ;;  %v7051_v46 = vld [vmem:[%s9273_s8 + $0x40] sm:$0xff]  }
  0xbd   : > { %1138 = vmatprep.subr.bf16.mxu0 %v7371_v39 }
  0xc0   : > { %1139 = vmatpush1.bf16.msra.mxu0 %v7039_v47  ;;  %v7052_v47 = vld [vmem:[%s9273_s8 + $0x48] sm:$0xff]  }
  0xc1   : > { %1140 = vmatprep.subr.bf16.mxu0 %v7371_v39 }
  0xc4   : > { %1141 = vmatpush1.bf16.msra.mxu0 %v7040_v48  ;;  %v7053_v48 = vld [vmem:[%s9273_s8 + $0x50] sm:$0xff]  }
  0xc5   : > { %1142 = vmatprep.subr.bf16.mxu0 %v7371_v39 }
  0xc8   : > { %1143 = vmatpush1.bf16.msra.mxu0 %v7041_v49  ;;  %v5885_v49 = vld [vmem:[%s9274_s3] ss:$0 sm:$0xff] }
  0xc9   : > { %1144 = vmatprep.subr.bf16.mxu0 %v7371_v39 }
  0xcc   : > { %1145 = vmatpush1.bf16.msra.mxu0 %v7042_v6 }
  0xcd   : > { %1526 = vmatprep.subr.bf16.mxu0 %v7371_v39 }
 0x172   : > { %v877_v31 = vpop.f32.mrb[0].mxu0 }
 0x173   : > { %v6677_v32 = vpop.f32.mrb[1].mxu0  ;;  %v878_v34 = vadd.f32 %v5878_v30, %v877_v31 }
 0x174   : > { %v880_v33 = vpop.f32.mrb[2].mxu0 }
 0x175   : > { %v881_v35 = vadd.f32 %v5878_v30, %v880_v33  ;;  %v6678_v36 = vpop.f32.mrb[3].mxu0 }
 0x177   : > { %v888_v37 = vpack.c.bf16 %v881_v35, %v878_v34 }
 0x179   : > { %6684 = vmatmul.mubr.msk.bf16.vlgmr.msra.gmra.mrb[0].mxu1 %vm908_vm7, %v888_v37  ;;  %v7043_v37 = vld [vmem:[%s9273_s8] sm:$0xff]  }
 0x17a   : > { %1312 = vmatpush1.bf16.msra.mxu1 %v7043_v37  ;;  %v7057_v37 = vld [vmem:[%s9271_s28 + $0x70] sm:$0xff]  }
 0x17b   : > { %1313 = vmatprep.subr.bf16.mxu1 %v7371_v39 }
 0x17e   : > { %1314 = vmatpush1.bf16.msra.mxu1 %v7044_v38  ;;  %v7058_v38 = vld [vmem:[%s9271_s28 + $0x78] sm:$0xff]  }
 0x17f   : > { %1315 = vmatprep.subr.bf16.mxu1 %v7371_v39 }
 0x182   : > { %1316 = vmatpush1.bf16.msra.mxu1 %v7045_v40  ;;  %v7059_v40 = vld [vmem:[%s9271_s28 + $0x80] sm:$0xff]  }
 0x183   : > { %1317 = vmatprep.subr.bf16.mxu1 %v7371_v39 }
 0x186   : > { %1318 = vmatpush1.bf16.msra.mxu1 %v7046_v41  ;;  %v7060_v41 = vld [vmem:[%s9271_s28 + $0x88] sm:$0xff]  }
 0x187   : > { %1319 = vmatprep.subr.bf16.mxu1 %v7371_v39 }
 0x18a   : > { %1320 = vmatpush1.bf16.msra.mxu1 %v7047_v42  ;;  %v7061_v42 = vld [vmem:[%s9271_s28 + $0x90] sm:$0xff]  }
 0x18b   : > { %1321 = vmatprep.subr.bf16.mxu1 %v7371_v39 }
 0x18e   : > { %1322 = vmatpush1.bf16.msra.mxu1 %v7048_v43  ;;  %v7062_v43 = vld [vmem:[%s9271_s28 + $0x98] sm:$0xff]  }
 0x18f   : > { %1323 = vmatprep.subr.bf16.mxu1 %v7371_v39 }
 0x192   : > { %1324 = vmatpush1.bf16.msra.mxu1 %v7049_v44  ;;  %v7063_v44 = vld [vmem:[%s9271_s28 + $0xa0] sm:$0xff]  }
 0x193   : > { %1325 = vmatprep.subr.bf16.mxu1 %v7371_v39 }
 0x196   : > { %1326 = vmatpush1.bf16.msra.mxu1 %v7050_v45  ;;  %v7064_v45 = vld [vmem:[%s9271_s28 + $0xa8] sm:$0xff]  }
 0x197   : > { %1327 = vmatprep.subr.bf16.mxu1 %v7371_v39 }
 0x19a   : > { %1328 = vmatpush1.bf16.msra.mxu1 %v7051_v46  ;;  %v7065_v46 = vld [vmem:[%s9271_s28 + $0xb0] sm:$0xff]  }
 0x19b   : > { %1329 = vmatprep.subr.bf16.mxu1 %v7371_v39 }
 0x19e   : > { %1330 = vmatpush1.bf16.msra.mxu1 %v7052_v47  ;;  %v5899_v47 = vld [vmem:[%s9275_s9] ss:$0 sm:$0xff] }
 0x19f   : > { %1331 = vmatprep.subr.bf16.mxu1 %v7371_v39 }
 0x1a2   : > { %1332 = vmatpush1.bf16.msra.mxu1 %v7053_v48 }
 0x1a3   : > { %1333 = vmatprep.subr.bf16.mxu1 %v7371_v39 }
 0x1a6   : > { %1334 = vmatpush1.bf16.msra.mxu1 %v7054_v7 }
 0x1a7   : > { %1717 = vmatprep.subr.bf16.mxu1 %v7371_v39 }
 0x24c   : > { %v946_v51 = vpop.f32.mrb[0].mxu1 }
 0x24d   : > { %v7608_v52 = vadd.f32 %v5881_v50, %v946_v51  ;;  %v6685_v53 = vpop.f32.mrb[1].mxu1 }
 0x24e   : > { %v949_v54 = vpop.f32.mrb[2].mxu1 }
 0x24f   : > { %v7610_v55 = vadd.f32 %v5881_v50, %v949_v54  ;;  %v6686_v56 = vpop.f32.mrb[3].mxu1  ;;  %v955_v57 = vmul.f32 0.044715, %v7608_v52  ;;  %v953_v9 = vmul.f32 0.5, %v7608_v52 }
 0x251   : > { %v956_v58 = vmul.f32 0.044715, %v7610_v55  ;;  %v957_v59 = vmul.f32 %v955_v57, %v7608_v52  ;;  %v954_v12 = vmul.f32 0.5, %v7610_v55 }
 0x253   : > { %v958_v60 = vmul.f32 %v956_v58, %v7610_v55  ;;  %v959_v61 = vmul.f32 %v957_v59, %v7608_v52 }
 0x255   : > { %v960_v62 = vmul.f32 %v958_v60, %v7610_v55  ;;  %v961_v63 = vadd.f32 %v959_v61, %v7608_v52 }
 0x257   : > { %v962_v0 = vadd.f32 %v960_v62, %v7610_v55  ;;  %v963_v3 = vmul.f32 0.7978846, %v961_v63 }
 0x259   : > { %v964_v4 = vmul.f32 0.7978846, %v962_v0  ;;  %7269 = vtanh.f32 %v963_v3 }
 0x25b   : > { %7271 = vtanh.f32 %v964_v4 }
 0x263   : > { %v7270_v8 = vpop.eup %7269 }
 0x264   : > { %v967_v10 = vadd.f32 1.0, %v7270_v8 }
 0x265   : > { %v7272_v11 = vpop.eup %7271 }
 0x266   : > { %v968_v13 = vadd.f32 1.0, %v7272_v11  ;;  %v969_v14 = vmul.f32 %v967_v10, %v953_v9 }
 0x268   : > { %v970_v15 = vmul.f32 %v968_v13, %v954_v12  ;;  %v995_v16 = vrot.slane %v969_v14, 7  ;;  %v1011_v18 = vrot.slane %v969_v14, 1 }
 0x26a   : > { %v6923_v19 = vpack.i.bf16 %v970_v15, %v969_v14  ;;  %v996_v20 = vrot.slane %v970_v15, 7  ;;  %v1012_v21 = vrot.slane %v970_v15, 1 }
 0x26c   : > { %6924 = vrot.lane.b32.xlu1 %v6923_v19, %s9237_s7  ;;  %v1014_v22 = vsel %vm795_vm2, %v1012_v21, %v1011_v18  ;;  %v997_v23 = vsel %vm790_vm3, %v995_v16, %v996_v20  ;;  %v998_v24 = vsel %vm790_vm3, %v996_v20, %v995_v16  ;;  %v1013_v26 = vsel %vm795_vm2, %v1011_v18, %v1012_v21 }
 0x26d   : > { %v1026_v25 = vmul.f32 %v7631_v17, %v1014_v22  ;;  %v1009_v33 = vmul.f32 %v7646_v29, %v998_v24 }
 0x26f   : > { %v1039_v27 = vpack.c.bf16 %v1026_v25, %v1013_v26 }
 0x271   : > { %5898 = vmatprep.mubr.msk.bf16.mxu0 %vm1035_vm9, %v1039_v27 }
 0x2de   : > { %v6925_v30 = vpop.permute.xlu1 %6924 }
 0x2df   : > { %v6927_v31 = vunpack.i.h.bf16 %v6925_v30  ;;  %v6926_v32 = vunpack.i.l.bf16 %v6925_v30 }
 0x2e1   : > { %v1036_v34 = vsel %vm1035_vm9, %v1009_v33, %v6926_v32  ;;  %v1037_v35 = vsel %vm1035_vm9, %v997_v23, %v6927_v31 }
 0x2e2   : > { %v1038_v36 = vpack.c.bf16 %v1037_v35, %v1036_v34 }
 0x2e4   : > { %1155 = vmatmul.mubr.bf16.vlgmr.msra.gmra.mrb[4].mxu0 %v1038_v36  ;;  %v7055_v36 = vld [vmem:[%s9271_s28 + $0x60] sm:$0xff]  }
 0x2e5   : > { %1527 = vmatpush1.bf16.msra.mxu0 %v7055_v36 }
 0x2e6   : > { %1528 = vmatprep.subr.bf16.mxu0 %v7371_v39 }
 0x3b7   : > { %v1156_v50 = vpop.f32.mrb[4].mxu0 }
 0x3b8   : > { %v1157_v51 = vadd.f32 %v5885_v49, %v1156_v50  ;;  %v1158_v53 = vpop.f32.mrb[5].mxu0 }
 0x3b9   : > { %v1159_v54 = vpop.f32.mrb[6].mxu0 }
 0x3ba   : > { %v1165_v56 = vmul.f32 0.044715, %v1157_v51  ;;  %v1160_v57 = vadd.f32 %v5885_v49, %v1159_v54  ;;  %v1161_v58 = vpop.f32.mrb[7].mxu0  ;;  %v1163_v9 = vmul.f32 0.5, %v1157_v51 }
 0x3bc   : > { %v1167_v59 = vmul.f32 %v1165_v56, %v1157_v51  ;;  %v1166_v60 = vmul.f32 0.044715, %v1160_v57  ;;  %v1164_v12 = vmul.f32 0.5, %v1160_v57 }
 0x3be   : > { %v1169_v61 = vmul.f32 %v1167_v59, %v1157_v51  ;;  %v1168_v62 = vmul.f32 %v1166_v60, %v1160_v57 }
 0x3c0   : > { %v1171_v63 = vadd.f32 %v1169_v61, %v1157_v51  ;;  %v1170_v0 = vmul.f32 %v1168_v62, %v1160_v57 }
 0x3c2   : > { %v1173_v3 = vmul.f32 0.7978846, %v1171_v63  ;;  %v1172_v4 = vadd.f32 %v1170_v0, %v1160_v57 }
 0x3c4   : > { %v1174_v6 = vmul.f32 0.7978846, %v1172_v4  ;;  %7273 = vtanh.f32 %v1173_v3 }
 0x3c6   : > { %7275 = vtanh.f32 %v1174_v6  ;;  %v1420_v6 = vadd.s32 2, %v7621_v5 }
 0x3c8   : > { %vm1424_vm11 = vcmp.lt.s32.totalorder %v1420_v6, 16 }
 0x3ce   : > { %v7274_v8 = vpop.eup %7273 }
 0x3cf   : > { %v1177_v10 = vadd.f32 1.0, %v7274_v8 }
 0x3d0   : > { %v7276_v11 = vpop.eup %7275 }
 0x3d1   : > { %v1178_v13 = vadd.f32 1.0, %v7276_v11  ;;  %v1179_v14 = vmul.f32 %v1177_v10, %v1163_v9 }
 0x3d3   : > { %v1180_v15 = vmul.f32 %v1178_v13, %v1164_v12  ;;  %v1211_v16 = vrot.slane %v1179_v14, 1  ;;  %v1205_v21 = vrot.slane %v1179_v14, 7 }
 0x3d5   : > { %v6928_v18 = vpack.i.bf16 %v1180_v15, %v1179_v14  ;;  %v1212_v19 = vrot.slane %v1180_v15, 1  ;;  %v1206_v20 = vrot.slane %v1180_v15, 7 }
 0x3d7   : > { %6929 = vrot.lane.b32.xlu1 %v6928_v18, %s9237_s7  ;;  %v1213_v22 = vsel %vm795_vm2, %v1211_v16, %v1212_v19  ;;  %v1214_v23 = vsel %vm795_vm2, %v1212_v19, %v1211_v16  ;;  %v1207_v24 = vsel %vm790_vm3, %v1205_v21, %v1206_v20  ;;  %v1208_v25 = vsel %vm790_vm3, %v1206_v20, %v1205_v21  ;;  %s7376_s7 = smov 16  }
 0x3d8   : > { %v1216_v26 = vmul.f32 %v1214_v23, %v7631_v17  ;;  %v1209_v32 = vmul.f32 %v1208_v25, %v7646_v29  ;;  %v7056_v17 = vld [vmem:[%s9271_s28 + $0x68] sm:$0xff]   ;;  %v7786_v16 = vsel %vm1424_vm11, 1.0, %v9243_v2 }
 0x3d9   : > { %1529 = vmatpush1.bf16.msra.mxu0 %v7056_v17 }
 0x3da   : > { %v1228_v27 = vpack.c.bf16 %v1216_v26, %v1213_v22  ;;  %1530 = vmatprep.subr.bf16.mxu0 %v7371_v39 }
 0x3dc   : > { %5912 = vmatprep.mubr.msk.bf16.mxu1 %vm1035_vm9, %v1228_v27 }
 0x3dd   : > { %1531 = vmatpush1.bf16.msra.mxu0 %v7057_v37  ;;  %v7067_v37 = vld [vmem:[%s9273_s8 + $0x60] sm:$0xff]  }
 0x3de   : > { %1532 = vmatprep.subr.bf16.mxu0 %v7371_v39 }
 0x3e1   : > { %1533 = vmatpush1.bf16.msra.mxu0 %v7058_v38  ;;  %v7068_v38 = vld [vmem:[%s9273_s8 + $0x68] sm:$0xff]  }
 0x3e2   : > { %1534 = vmatprep.subr.bf16.mxu0 %v7371_v39 }
 0x3e5   : > { %1535 = vmatpush1.bf16.msra.mxu0 %v7059_v40  ;;  %v7069_v40 = vld [vmem:[%s9273_s8 + $0x70] sm:$0xff]  }
 0x3e6   : > { %1536 = vmatprep.subr.bf16.mxu0 %v7371_v39 }
 0x3e9   : > { %1537 = vmatpush1.bf16.msra.mxu0 %v7060_v41  ;;  %v7070_v41 = vld [vmem:[%s9273_s8 + $0x78] sm:$0xff]  }
 0x3ea   : > { %1538 = vmatprep.subr.bf16.mxu0 %v7371_v39 }
 0x3ed   : > { %1539 = vmatpush1.bf16.msra.mxu0 %v7061_v42  ;;  %v7071_v42 = vld [vmem:[%s9273_s8 + $0x80] sm:$0xff]  }
 0x3ee   : > { %1540 = vmatprep.subr.bf16.mxu0 %v7371_v39 }
 0x3f1   : > { %1541 = vmatpush1.bf16.msra.mxu0 %v7062_v43  ;;  %v7072_v43 = vld [vmem:[%s9273_s8 + $0x88] sm:$0xff]  }
 0x3f2   : > { %1542 = vmatprep.subr.bf16.mxu0 %v7371_v39 }
 0x3f5   : > { %1543 = vmatpush1.bf16.msra.mxu0 %v7063_v44  ;;  %v7073_v44 = vld [vmem:[%s9273_s8 + $0x90] sm:$0xff]  }
 0x3f6   : > { %1544 = vmatprep.subr.bf16.mxu0 %v7371_v39 }
 0x3f9   : > { %1545 = vmatpush1.bf16.msra.mxu0 %v7064_v45  ;;  %v7074_v45 = vld [vmem:[%s9273_s8 + $0x98] sm:$0xff]  }
 0x3fa   : > { %1546 = vmatprep.subr.bf16.mxu0 %v7371_v39 }
 0x3fd   : > { %1547 = vmatpush1.bf16.msra.mxu0 %v7065_v46  ;;  %v7075_v46 = vld [vmem:[%s9273_s8 + $0xa0] sm:$0xff]  }
 0x3fe   : > { %1548 = vmatprep.subr.bf16.mxu0 %v7371_v39 }
 0x449   : > { %v6930_v28 = vpop.permute.xlu1 %6929 }
 0x44a   : > { %v6932_v30 = vunpack.i.h.bf16 %v6930_v28  ;;  %v6931_v31 = vunpack.i.l.bf16 %v6930_v28  ;;  %v1402_v28 = vadd.s32 4294967294, %v7515_v1 }
 0x44c   : > { %v1225_v33 = vsel %vm1035_vm9, %v1209_v32, %v6931_v31  ;;  %v1226_v34 = vsel %vm1035_vm9, %v1207_v24, %v6932_v30  ;;  %vm1404_vm14 = vcmp.ge.s32.totalorder %v1402_v28, 0 }
 0x44d   : > { %v1227_v35 = vpack.c.bf16 %v1226_v34, %v1225_v33  ;;  %v7802_v30 = vsel %vm1404_vm14, 1.0, %v9243_v2  ;;  %vm4112_vm14 = vcmp.lt.s32.totalorder %v7515_v1, 3 }
 0x44f   : > { %1344 = vmatmul.mubr.bf16.vlgmr.msra.gmra.mrb[4].mxu1 %v1227_v35 }
 0x450   : > { %1718 = vmatpush1.bf16.msra.mxu1 %v7067_v37  ;;  %v7079_v37 = vld [vmem:[%s9271_s28 + $0xc0] sm:$0xff]  }
 0x451   : > { %1719 = vmatprep.subr.bf16.mxu1 %v7371_v39 }
 0x454   : > { %1720 = vmatpush1.bf16.msra.mxu1 %v7068_v38  ;;  %v7081_v38 = vld [vmem:[%s9271_s28 + $0xd0] sm:$0xff]  }
 0x455   : > { %1721 = vmatprep.subr.bf16.mxu1 %v7371_v39 }
 0x458   : > { %1722 = vmatpush1.bf16.msra.mxu1 %v7069_v40  ;;  %v7082_v40 = vld [vmem:[%s9271_s28 + $0xd8] sm:$0xff]  }
 0x459   : > { %1723 = vmatprep.subr.bf16.mxu1 %v7371_v39 }
 0x45c   : > { %1724 = vmatpush1.bf16.msra.mxu1 %v7070_v41  ;;  %v7083_v41 = vld [vmem:[%s9271_s28 + $0xe0] sm:$0xff]  }
 0x45d   : > { %1725 = vmatprep.subr.bf16.mxu1 %v7371_v39 }
 0x460   : > { %1726 = vmatpush1.bf16.msra.mxu1 %v7071_v42  ;;  %v7084_v42 = vld [vmem:[%s9271_s28 + $0xe8] sm:$0xff]  }
 0x461   : > { %1727 = vmatprep.subr.bf16.mxu1 %v7371_v39 }
 0x464   : > { %1728 = vmatpush1.bf16.msra.mxu1 %v7072_v43  ;;  %v7085_v43 = vld [vmem:[%s9271_s28 + $0xf0] sm:$0xff]  }
 0x465   : > { %1729 = vmatprep.subr.bf16.mxu1 %v7371_v39 }
 0x468   : > { %1730 = vmatpush1.bf16.msra.mxu1 %v7073_v44  ;;  %v7086_v44 = vld [vmem:[%s9271_s28 + $0xf8] sm:$0xff]  }
 0x469   : > { %1731 = vmatprep.subr.bf16.mxu1 %v7371_v39 }
 0x46c   : > { %1732 = vmatpush1.bf16.msra.mxu1 %v7074_v45  ;;  %v7087_v45 = vld [vmem:[%s9271_s28 + $0x100] sm:$0xff]  }
 0x46d   : > { %1733 = vmatprep.subr.bf16.mxu1 %v7371_v39 }
 0x470   : > { %1734 = vmatpush1.bf16.msra.mxu1 %v7075_v46  ;;  %v7088_v46 = vld [vmem:[%s9271_s28 + $0x108] sm:$0xff]  }
 0x471   : > { %1735 = vmatprep.subr.bf16.mxu1 %v7371_v39 }
 0x522   : > { %v1345_v48 = vpop.f32.mrb[4].mxu1 }
 0x523   : > { %v1346_v49 = vadd.f32 %v5899_v47, %v1345_v48  ;;  %v1347_v50 = vpop.f32.mrb[5].mxu1  ;;  %v7077_v48 = vld [vmem:[%s9273_s8 + $0xb0] sm:$0xff]  }
 0x524   : > { %v1348_v51 = vpop.f32.mrb[6].mxu1 }
 0x525   : > { %v7764_v53 = vadd.f32 %v1346_v49, %v7608_v52  ;;  %v1349_v54 = vadd.f32 %v5899_v47, %v1348_v51  ;;  %v1350_v56 = vpop.f32.mrb[7].mxu1  ;;  %v7076_v47 = vld [vmem:[%s9273_s8 + $0xa8] sm:$0xff]   ;;  %v5938_v49 = vld [vmem:[%s9274_s3 + $0x1] ss:$0 sm:$0xff] }
 0x526   : > { %1736 = vmatpush1.bf16.msra.mxu1 %v7076_v47  ;;  %v7089_v47 = vld [vmem:[%s9271_s28 + $0x110] sm:$0xff]  }
 0x527   : > { %v7767_v57 = vadd.f32 %v1349_v54, %v7610_v55  ;;  %v1356_v58 = vmul.f32 0.044715, %v7764_v53  ;;  %v7066_v55 = vld [vmem:[%s9271_s28 + $0xb8] sm:$0xff]   ;;  %v1354_v8 = vmul.f32 0.5, %v7764_v53  ;;  %1737 = vmatprep.subr.bf16.mxu1 %v7371_v39 }
 0x528   : > { %1549 = vmatpush1.bf16.msra.mxu0 %v7066_v55 }
 0x529   : > { %v1357_v59 = vmul.f32 0.044715, %v7767_v57  ;;  %v1358_v60 = vmul.f32 %v1356_v58, %v7764_v53  ;;  %1927 = vmatprep.subr.bf16.mxu0 %v7371_v39  ;;  %v1355_v11 = vmul.f32 0.5, %v7767_v57 }
 0x52a   : > { %1738 = vmatpush1.bf16.msra.mxu1 %v7077_v48  ;;  %v5977_v48 = vld [vmem:[%s9275_s9 + $0x1] ss:$0 sm:$0xff] }
 0x52b   : > { %v1359_v61 = vmul.f32 %v1357_v59, %v7767_v57  ;;  %v1360_v62 = vmul.f32 %v1358_v60, %v7764_v53  ;;  %1739 = vmatprep.subr.bf16.mxu1 %v7371_v39 }
 0x52d   : > { %v1361_v63 = vmul.f32 %v1359_v61, %v7767_v57  ;;  %v1362_v52 = vadd.f32 %v1360_v62, %v7764_v53 }
 0x52f   : > { %v1363_v0 = vadd.f32 %v1361_v63, %v7767_v57  ;;  %v1364_v3 = vmul.f32 0.7978846, %v1362_v52 }
 0x531   : > { %v1365_v4 = vmul.f32 0.7978846, %v1363_v0  ;;  %7277 = vtanh.f32 %v1364_v3 }
 0x533   : > { %7279 = vtanh.f32 %v1365_v4 }
 0x53b   : > { %v7278_v7 = vpop.eup %7277 }
 0x53c   : > { %v1368_v9 = vadd.f32 1.0, %v7278_v7  ;;  %v7078_v7 = vld [vmem:[%s9273_s8 + $0xb8] sm:$0xff]  }
 0x53d   : > { %v7280_v10 = vpop.eup %7279  ;;  %1740 = vmatpush1.bf16.msra.mxu1 %v7078_v7 }
 0x53e   : > { %v1369_v12 = vadd.f32 1.0, %v7280_v10  ;;  %v1370_v13 = vmul.f32 %v1368_v9, %v1354_v8  ;;  %2114 = vmatprep.subr.bf16.mxu1 %v7371_v39 }
 0x540   : > { %v1371_v14 = vmul.f32 %v1369_v12, %v1355_v11  ;;  %v1414_v15 = vrot.slane %v1370_v13, 2  ;;  %v1397_v21 = vrot.slane %v1370_v13, 6 }
 0x542   : > { %v6933_v18 = vpack.i.bf16 %v1371_v14, %v1370_v13  ;;  %v1415_v19 = vrot.slane %v1371_v14, 2  ;;  %v1398_v20 = vrot.slane %v1371_v14, 6 }
 0x544   : > { %6934 = vrot.lane.b32.xlu0 %v6933_v18, %s9276_s6  ;;  %v1418_v22 = vsel %vm1416_vm12, %v1415_v19, %v1414_v15  ;;  %v1400_v23 = vsel %vm1399_vm13, %v1397_v21, %v1398_v20  ;;  %v1401_v24 = vsel %vm1399_vm13, %v1398_v20, %v1397_v21  ;;  %v1417_v26 = vsel %vm1416_vm12, %v1414_v15, %v1415_v19 }
 0x545   : > { %v1430_v25 = vmul.f32 %v7786_v16, %v1418_v22  ;;  %v1412_v34 = vmul.f32 %v7802_v30, %v1401_v24 }
 0x547   : > { %v1442_v27 = vpack.c.bf16 %v1430_v25, %v1417_v26 }
 0x549   : > { %5951 = vmatprep.mubr.msk.bf16.mxu0 %vm1035_vm9, %v1442_v27 }
 0x5b6   : > { %v6935_v31 = vpop.permute.xlu0 %6934 }
 0x5b7   : > { %v6937_v32 = vunpack.i.h.bf16 %v6935_v31  ;;  %v6936_v33 = vunpack.i.l.bf16 %v6935_v31 }
 0x5b9   : > { %v1439_v35 = vsel %vm1035_vm9, %v1412_v34, %v6936_v33  ;;  %v1440_v36 = vsel %vm1035_vm9, %v1400_v23, %v6937_v32 }
 0x5ba   : > { %v1441_v17 = vpack.c.bf16 %v1440_v36, %v1439_v35 }
 0x5bc   : > { %1559 = vmatmul.mubr.bf16.vlgmr.msra.gmra.mrb[8].mxu0 %v1441_v17 }
 0x5bd   : > { %1928 = vmatpush1.bf16.msra.mxu0 %v7079_v37  ;;  %v7092_v37 = vld [vmem:[%s9273_s8 + $0xc8] sm:$0xff]  }
 0x5be   : > { %1929 = vmatprep.subr.bf16.mxu0 %v7371_v39 }
 0x68f   : > { %v1560_v50 = vpop.f32.mrb[8].mxu0 }
 0x690   : > { %v1561_v51 = vadd.f32 %v5938_v49, %v1560_v50  ;;  %v1562_v54 = vpop.f32.mrb[9].mxu0 }
 0x691   : > { %v1563_v56 = vpop.f32.mrb[10].mxu0 }
 0x692   : > { %v1569_v58 = vmul.f32 0.044715, %v1561_v51  ;;  %v1564_v59 = vadd.f32 %v5938_v49, %v1563_v56  ;;  %v1565_v60 = vpop.f32.mrb[11].mxu0  ;;  %v1567_v9 = vmul.f32 0.5, %v1561_v51 }
 0x694   : > { %v1571_v61 = vmul.f32 %v1569_v58, %v1561_v51  ;;  %v1570_v62 = vmul.f32 0.044715, %v1564_v59  ;;  %v1568_v12 = vmul.f32 0.5, %v1564_v59 }
 0x696   : > { %v1573_v63 = vmul.f32 %v1571_v61, %v1561_v51  ;;  %v1572_v52 = vmul.f32 %v1570_v62, %v1564_v59 }
 0x698   : > { %v1575_v0 = vadd.f32 %v1573_v63, %v1561_v51  ;;  %v1574_v3 = vmul.f32 %v1572_v52, %v1564_v59 }
 0x69a   : > { %v1577_v4 = vmul.f32 0.7978846, %v1575_v0  ;;  %v1576_v55 = vadd.f32 %v1574_v3, %v1564_v59 }
 0x69c   : > { %v1578_v6 = vmul.f32 0.7978846, %v1576_v55  ;;  %7281 = vtanh.f32 %v1577_v4 }
 0x69e   : > { %7283 = vtanh.f32 %v1578_v6 }
 0x6a6   : > { %v7282_v8 = vpop.eup %7281 }
 0x6a7   : > { %v1581_v10 = vadd.f32 1.0, %v7282_v8  ;;  %v1821_v8 = vadd.s32 4, %v7621_v5 }
 0x6a8   : > { %v7284_v11 = vpop.eup %7283 }
 0x6a9   : > { %v1582_v13 = vadd.f32 1.0, %v7284_v11  ;;  %v1583_v14 = vmul.f32 %v1581_v10, %v1567_v9  ;;  %vm1825_vm15 = vcmp.lt.s32.totalorder %v1821_v8, 16 }
 0x6ab   : > { %v1584_v15 = vmul.f32 %v1582_v13, %v1568_v12  ;;  %v1616_v18 = vrot.slane %v1583_v14, 2  ;;  %v1610_v22 = vrot.slane %v1583_v14, 6 }
 0x6ad   : > { %v6938_v19 = vpack.i.bf16 %v1584_v15, %v1583_v14  ;;  %v1617_v20 = vrot.slane %v1584_v15, 2  ;;  %v1611_v21 = vrot.slane %v1584_v15, 6 }
 0x6af   : > { %6939 = vrot.lane.b32.xlu1 %v6938_v19, %s9276_s6  ;;  %v1618_v23 = vsel %vm1416_vm12, %v1616_v18, %v1617_v20  ;;  %v1619_v24 = vsel %vm1416_vm12, %v1617_v20, %v1616_v18  ;;  %v1612_v25 = vsel %vm1399_vm13, %v1610_v22, %v1611_v21  ;;  %v1613_v26 = vsel %vm1399_vm13, %v1611_v21, %v1610_v22 }
 0x6b0   : > { %v1621_v27 = vmul.f32 %v1619_v24, %v7786_v16  ;;  %v1614_v34 = vmul.f32 %v1613_v26, %v7802_v30  ;;  %v7080_v16 = vld [vmem:[%s9271_s28 + $0xc8] sm:$0xff]   ;;  %v7942_v21 = vsel %vm1825_vm15, 1.0, %v9243_v2  ;;  %v1808_v26 = vadd.s32 4294967292, %v7515_v1 }
 0x6b1   : > { %1930 = vmatpush1.bf16.msra.mxu0 %v7080_v16  ;;  %v7093_v16 = vld [vmem:[%s9273_s8 + $0xd0] sm:$0xff]  }
 0x6b2   : > { %v1633_v28 = vpack.c.bf16 %v1621_v27, %v1618_v23  ;;  %1931 = vmatprep.subr.bf16.mxu0 %v7371_v39  ;;  %vm1810_vm5 = vcmp.ge.s32.totalorder %v1808_v26, 0 }
 0x6b3   : > { %v7953_v27 = vsel %vm1810_vm5, 1.0, %v9243_v2 }
 0x6b4   : > { %5990 = vmatprep.mubr.msk.bf16.mxu1 %vm1035_vm9, %v1633_v28 }
 0x6b5   : > { %1932 = vmatpush1.bf16.msra.mxu0 %v7081_v38  ;;  %v7094_v38 = vld [vmem:[%s9273_s8 + $0xd8] sm:$0xff]  }
 0x6b6   : > { %1933 = vmatprep.subr.bf16.mxu0 %v7371_v39 }
 0x6b9   : > { %1934 = vmatpush1.bf16.msra.mxu0 %v7082_v40  ;;  %v7095_v40 = vld [vmem:[%s9273_s8 + $0xe0] sm:$0xff]  }
 0x6ba   : > { %1935 = vmatprep.subr.bf16.mxu0 %v7371_v39 }
 0x6bd   : > { %1936 = vmatpush1.bf16.msra.mxu0 %v7083_v41  ;;  %v7096_v41 = vld [vmem:[%s9273_s8 + $0xe8] sm:$0xff]  }
 0x6be   : > { %1937 = vmatprep.subr.bf16.mxu0 %v7371_v39 }
 0x6c1   : > { %1938 = vmatpush1.bf16.msra.mxu0 %v7084_v42  ;;  %v7097_v42 = vld [vmem:[%s9273_s8 + $0xf0] sm:$0xff]  }
 0x6c2   : > { %1939 = vmatprep.subr.bf16.mxu0 %v7371_v39 }
 0x6c5   : > { %1940 = vmatpush1.bf16.msra.mxu0 %v7085_v43  ;;  %v7098_v43 = vld [vmem:[%s9273_s8 + $0xf8] sm:$0xff]  }
 0x6c6   : > { %1941 = vmatprep.subr.bf16.mxu0 %v7371_v39 }
 0x6c9   : > { %1942 = vmatpush1.bf16.msra.mxu0 %v7086_v44  ;;  %v7099_v44 = vld [vmem:[%s9273_s8 + $0x100] sm:$0xff]  }
 0x6ca   : > { %1943 = vmatprep.subr.bf16.mxu0 %v7371_v39 }
 0x6cd   : > { %1944 = vmatpush1.bf16.msra.mxu0 %v7087_v45  ;;  %v7100_v45 = vld [vmem:[%s9273_s8 + $0x108] sm:$0xff]  }
 0x6ce   : > { %1945 = vmatprep.subr.bf16.mxu0 %v7371_v39 }
 0x6d1   : > { %1946 = vmatpush1.bf16.msra.mxu0 %v7088_v46  ;;  %v7101_v46 = vld [vmem:[%s9273_s8 + $0x110] sm:$0xff]  }
 0x6d2   : > { %1947 = vmatprep.subr.bf16.mxu0 %v7371_v39 }
 0x6d5   : > { %1948 = vmatpush1.bf16.msra.mxu0 %v7089_v47  ;;  %v6016_v47 = vld [vmem:[%s9274_s3 + $0x2] ss:$0 sm:$0xff] }
 0x6d6   : > { %1949 = vmatprep.subr.bf16.mxu0 %v7371_v39 }
 0x721   : > { %v6940_v31 = vpop.permute.xlu1 %6939 }
 0x722   : > { %v6942_v32 = vunpack.i.h.bf16 %v6940_v31  ;;  %v6941_v33 = vunpack.i.l.bf16 %v6940_v31 }
 0x724   : > { %v1630_v35 = vsel %vm1035_vm9, %v1614_v34, %v6941_v33  ;;  %v1631_v36 = vsel %vm1035_vm9, %v1612_v25, %v6942_v32 }
 0x725   : > { %v1632_v17 = vpack.c.bf16 %v1631_v36, %v1630_v35 }
 0x727   : > { %1750 = vmatmul.mubr.bf16.vlgmr.msra.gmra.mrb[8].mxu1 %v1632_v17  ;;  %v7091_v17 = vld [vmem:[%s9273_s8 + $0xc0] sm:$0xff]  }
 0x728   : > { %2115 = vmatpush1.bf16.msra.mxu1 %v7091_v17  ;;  %v7107_v17 = vld [vmem:[%s9271_s28 + $0x140] sm:$0xff]  }
 0x729   : > { %2116 = vmatprep.subr.bf16.mxu1 %v7371_v39 }
 0x72c   : > { %2117 = vmatpush1.bf16.msra.mxu1 %v7092_v37  ;;  %v7108_v37 = vld [vmem:[%s9271_s28 + $0x148] sm:$0xff]  }
 0x72d   : > { %2118 = vmatprep.subr.bf16.mxu1 %v7371_v39 }
 0x730   : > { %2119 = vmatpush1.bf16.msra.mxu1 %v7093_v16  ;;  %v7109_v16 = vld [vmem:[%s9271_s28 + $0x150] sm:$0xff]  }
 0x731   : > { %2120 = vmatprep.subr.bf16.mxu1 %v7371_v39 }
 0x734   : > { %2121 = vmatpush1.bf16.msra.mxu1 %v7094_v38  ;;  %v7110_v38 = vld [vmem:[%s9271_s28 + $0x158] sm:$0xff]  }
 0x735   : > { %2122 = vmatprep.subr.bf16.mxu1 %v7371_v39 }
 0x738   : > { %2123 = vmatpush1.bf16.msra.mxu1 %v7095_v40  ;;  %v7111_v40 = vld [vmem:[%s9271_s28 + $0x160] sm:$0xff]  }
 0x739   : > { %2124 = vmatprep.subr.bf16.mxu1 %v7371_v39 }
 0x73c   : > { %2125 = vmatpush1.bf16.msra.mxu1 %v7096_v41  ;;  %v7112_v41 = vld [vmem:[%s9271_s28 + $0x168] sm:$0xff]  }
 0x73d   : > { %2126 = vmatprep.subr.bf16.mxu1 %v7371_v39 }
 0x740   : > { %2127 = vmatpush1.bf16.msra.mxu1 %v7097_v42  ;;  %v7113_v42 = vld [vmem:[%s9271_s28 + $0x170] sm:$0xff]  }
 0x741   : > { %2128 = vmatprep.subr.bf16.mxu1 %v7371_v39 }
 0x744   : > { %2129 = vmatpush1.bf16.msra.mxu1 %v7098_v43  ;;  %v6055_v43 = vld [vmem:[%s9275_s9 + $0x2] ss:$0 sm:$0xff] }
 0x745   : > { %2130 = vmatprep.subr.bf16.mxu1 %v7371_v39 }
 0x748   : > { %2131 = vmatpush1.bf16.msra.mxu1 %v7099_v44 }
 0x749   : > { %2132 = vmatprep.subr.bf16.mxu1 %v7371_v39 }
 0x74c   : > { %2133 = vmatpush1.bf16.msra.mxu1 %v7100_v45 }
 0x74d   : > { %2134 = vmatprep.subr.bf16.mxu1 %v7371_v39 }
 0x750   : > { %2135 = vmatpush1.bf16.msra.mxu1 %v7101_v46 }
 0x751   : > { %2136 = vmatprep.subr.bf16.mxu1 %v7371_v39 }
 0x7fa   : > { %v1751_v49 = vpop.f32.mrb[8].mxu1 }
 0x7fb   : > { %v1752_v50 = vadd.f32 %v5977_v48, %v1751_v49  ;;  %v1753_v51 = vpop.f32.mrb[9].mxu1 }
 0x7fc   : > { %v1754_v54 = vpop.f32.mrb[10].mxu1 }
 0x7fd   : > { %v7920_v56 = vadd.f32 %v1752_v50, %v7764_v53  ;;  %v1755_v58 = vadd.f32 %v5977_v48, %v1754_v54  ;;  %v1756_v59 = vpop.f32.mrb[11].mxu1 }
 0x7ff   : > { %v7923_v60 = vadd.f32 %v1755_v58, %v7767_v57  ;;  %v1762_v61 = vmul.f32 0.044715, %v7920_v56  ;;  %v7090_v57 = vld [vmem:[%s9271_s28 + $0x118] sm:$0xff]   ;;  %v1760_v9 = vmul.f32 0.5, %v7920_v56 }
 0x800   : > { %1950 = vmatpush1.bf16.msra.mxu0 %v7090_v57 }
 0x801   : > { %v1763_v62 = vmul.f32 0.044715, %v7923_v60  ;;  %v1764_v63 = vmul.f32 %v1762_v61, %v7920_v56  ;;  %2318 = vmatprep.subr.bf16.mxu0 %v7371_v39  ;;  %v1761_v12 = vmul.f32 0.5, %v7923_v60 }
 0x803   : > { %v1765_v52 = vmul.f32 %v1763_v62, %v7923_v60  ;;  %v1766_v0 = vmul.f32 %v1764_v63, %v7920_v56 }
 0x805   : > { %v1767_v3 = vmul.f32 %v1765_v52, %v7923_v60  ;;  %v1768_v53 = vadd.f32 %v1766_v0, %v7920_v56 }
 0x807   : > { %v1769_v4 = vadd.f32 %v1767_v3, %v7923_v60  ;;  %v1770_v55 = vmul.f32 0.7978846, %v1768_v53 }
 0x809   : > { %v1771_v6 = vmul.f32 0.7978846, %v1769_v4  ;;  %7285 = vtanh.f32 %v1770_v55 }
 0x80b   : > { %7287 = vtanh.f32 %v1771_v6  ;;  %v7102_v6 = vld [vmem:[%s9273_s8 + $0x118] sm:$0xff]  }
 0x80c   : > { %2137 = vmatpush1.bf16.msra.mxu1 %v7102_v6 }
 0x80d   : > { %2501 = vmatprep.subr.bf16.mxu1 %v7371_v39 }
 0x813   : > { %v7286_v7 = vpop.eup %7285 }
 0x814   : > { %v1774_v10 = vadd.f32 1.0, %v7286_v7 }
 0x815   : > { %v7288_v11 = vpop.eup %7287 }
 0x816   : > { %v1775_v13 = vadd.f32 1.0, %v7288_v11  ;;  %v1776_v14 = vmul.f32 %v1774_v10, %v1760_v9 }
 0x818   : > { %v1777_v15 = vmul.f32 %v1775_v13, %v1761_v12  ;;  %v1803_v20 = vrot.slane %v1776_v14, 4 }
 0x81a   : > { %v1804_v18 = vrot.slane %v1777_v15, 4  ;;  %v6943_v19 = vpack.i.bf16 %v1777_v15, %v1776_v14 }
 0x81c   : > { %6944 = vrot.lane.b32.xlu0 %v6943_v19, %s9276_s6  ;;  %v1807_v22 = vsel %vm1805_vm0, %v1804_v18, %v1803_v20  ;;  %v1806_v24 = vsel %vm1805_vm0, %v1803_v20, %v1804_v18 }
 0x81d   : > { %v1831_v23 = vmul.f32 %v7942_v21, %v1807_v22  ;;  %v1818_v33 = vmul.f32 %v7953_v27, %v1807_v22 }
 0x81f   : > { %v1843_v25 = vpack.c.bf16 %v1831_v23, %v1806_v24 }
 0x821   : > { %6029 = vmatprep.mubr.msk.bf16.mxu0 %vm1035_vm9, %v1843_v25 }
 0x88e   : > { %v6945_v28 = vpop.permute.xlu0 %6944 }
 0x88f   : > { %v6947_v31 = vunpack.i.h.bf16 %v6945_v28  ;;  %v6946_v32 = vunpack.i.l.bf16 %v6945_v28 }
 0x891   : > { %v1840_v34 = vsel %vm1035_vm9, %v1818_v33, %v6946_v32  ;;  %v1841_v35 = vsel %vm1035_vm9, %v1806_v24, %v6947_v31 }
 0x892   : > { %v1842_v36 = vpack.c.bf16 %v1841_v35, %v1840_v34  ;;  %v7103_v34 = vld [vmem:[%s9271_s28 + $0x120] sm:$0xff]   ;;  %v7105_v35 = vld [vmem:[%s9271_s28 + $0x130] sm:$0xff]  }
 0x894   : > { %1960 = vmatmul.mubr.bf16.vlgmr.msra.gmra.mrb[12].mxu0 %v1842_v36  ;;  %v7106_v36 = vld [vmem:[%s9271_s28 + $0x138] sm:$0xff]  }
 0x895   : > { %2319 = vmatpush1.bf16.msra.mxu0 %v7103_v34  ;;  %v7123_v34 = vld [vmem:[%s9273_s8 + $0x160] sm:$0xff]  }
 0x896   : > { %2320 = vmatprep.subr.bf16.mxu0 %v7371_v39 }
 0x967   : > { %v1961_v48 = vpop.f32.mrb[12].mxu0 }
 0x968   : > { %v1962_v49 = vadd.f32 %v6016_v47, %v1961_v48  ;;  %v1963_v50 = vpop.f32.mrb[13].mxu0 }
 0x969   : > { %v1964_v51 = vpop.f32.mrb[14].mxu0 }
 0x96a   : > { %v1970_v54 = vmul.f32 0.044715, %v1962_v49  ;;  %v1965_v58 = vadd.f32 %v6016_v47, %v1964_v51  ;;  %v1966_v59 = vpop.f32.mrb[15].mxu0  ;;  %v1968_v7 = vmul.f32 0.5, %v1962_v49 }
 0x96c   : > { %v1972_v61 = vmul.f32 %v1970_v54, %v1962_v49  ;;  %v1971_v62 = vmul.f32 0.044715, %v1965_v58  ;;  %v1969_v10 = vmul.f32 0.5, %v1965_v58 }
 0x96e   : > { %v1974_v63 = vmul.f32 %v1972_v61, %v1962_v49  ;;  %v1973_v52 = vmul.f32 %v1971_v62, %v1965_v58 }
 0x970   : > { %v1975_v0 = vmul.f32 %v1973_v52, %v1965_v58  ;;  %v1976_v3 = vadd.f32 %v1974_v63, %v1962_v49 }
 0x972   : > { %v1977_v53 = vadd.f32 %v1975_v0, %v1965_v58  ;;  %v1978_v4 = vmul.f32 0.7978846, %v1976_v3 }
 0x974   : > { %v1979_v55 = vmul.f32 0.7978846, %v1977_v53  ;;  %7289 = vtanh.f32 %v1978_v4 }
 0x976   : > { %7291 = vtanh.f32 %v1979_v55 }
 0x97e   : > { %v7290_v57 = vpop.eup %7289 }
 0x97f   : > { %v1982_v8 = vadd.f32 1.0, %v7290_v57 }
 0x980   : > { %v7292_v9 = vpop.eup %7291 }
 0x981   : > { %v1983_v11 = vadd.f32 1.0, %v7292_v9  ;;  %v1984_v12 = vmul.f32 %v1982_v8, %v1968_v7 }
 0x983   : > { %v1985_v13 = vmul.f32 %v1983_v11, %v1969_v10  ;;  %v2011_v18 = vrot.slane %v1984_v12, 4 }
 0x985   : > { %v2012_v14 = vrot.slane %v1985_v13, 4  ;;  %v6948_v15 = vpack.i.bf16 %v1985_v13, %v1984_v12 }
 0x987   : > { %6949 = vrot.lane.b32.xlu1 %v6948_v15, %s9276_s6  ;;  %v2013_v19 = vsel %vm1805_vm0, %v2011_v18, %v2012_v14  ;;  %v2014_v20 = vsel %vm1805_vm0, %v2012_v14, %v2011_v18 }
 0x988   : > { %v2018_v22 = vmul.f32 %v2014_v20, %v7942_v21  ;;  %v2015_v28 = vmul.f32 %v2014_v20, %v7953_v27  ;;  %v7104_v21 = vld [vmem:[%s9271_s28 + $0x128] sm:$0xff]  }
 0x989   : > { %2321 = vmatpush1.bf16.msra.mxu0 %v7104_v21  ;;  %v7124_v21 = vld [vmem:[%s9273_s8 + $0x168] sm:$0xff]  }
 0x98a   : > { %v2030_v23 = vpack.c.bf16 %v2018_v22, %v2013_v19  ;;  %2322 = vmatprep.subr.bf16.mxu0 %v7371_v39 }
 0x98c   : > { %6068 = vmatprep.mubr.msk.bf16.mxu1 %vm1035_vm9, %v2030_v23  ;;  %v7115_v23 = vld [vmem:[%s9273_s8 + $0x120] sm:$0xff]  }
 0x98d   : > { %2323 = vmatpush1.bf16.msra.mxu0 %v7105_v35  ;;  %v7125_v35 = vld [vmem:[%s9273_s8 + $0x170] sm:$0xff]  }
 0x98e   : > { %2324 = vmatprep.subr.bf16.mxu0 %v7371_v39 }
 0x991   : > { %2325 = vmatpush1.bf16.msra.mxu0 %v7106_v36  ;;  %v6094_v36 = vld [vmem:[%s9274_s3 + $0x3] ss:$0 sm:$0xff] }
 0x992   : > { %2326 = vmatprep.subr.bf16.mxu0 %v7371_v39 }
 0x995   : > { %2327 = vmatpush1.bf16.msra.mxu0 %v7107_v17 }
 0x996   : > { %2328 = vmatprep.subr.bf16.mxu0 %v7371_v39 }
 0x999   : > { %2329 = vmatpush1.bf16.msra.mxu0 %v7108_v37 }
 0x99a   : > { %2330 = vmatprep.subr.bf16.mxu0 %v7371_v39 }
 0x99d   : > { %2331 = vmatpush1.bf16.msra.mxu0 %v7109_v16 }
 0x99e   : > { %2332 = vmatprep.subr.bf16.mxu0 %v7371_v39 }
 0x9a1   : > { %2333 = vmatpush1.bf16.msra.mxu0 %v7110_v38 }
 0x9a2   : > { %2334 = vmatprep.subr.bf16.mxu0 %v7371_v39 }
 0x9a5   : > { %2335 = vmatpush1.bf16.msra.mxu0 %v7111_v40 }
 0x9a6   : > { %2336 = vmatprep.subr.bf16.mxu0 %v7371_v39 }
 0x9a9   : > { %2337 = vmatpush1.bf16.msra.mxu0 %v7112_v41 }
 0x9aa   : > { %2338 = vmatprep.subr.bf16.mxu0 %v7371_v39 }
 0x9ad   : > { %2339 = vmatpush1.bf16.msra.mxu0 %v7113_v42 }
 0x9ae   : > { %2340 = vmatprep.subr.bf16.mxu0 %v7371_v39 }
 0x9f9   : > { %v6950_v24 = vpop.permute.xlu1 %6949 }
 0x9fa   : > { %v6952_v25 = vunpack.i.h.bf16 %v6950_v24  ;;  %v6951_v26 = vunpack.i.l.bf16 %v6950_v24  ;;  %v7116_v24 = vld [vmem:[%s9273_s8 + $0x128] sm:$0xff]  }
 0x9fc   : > { %v2027_v31 = vsel %vm1035_vm9, %v2015_v28, %v6951_v26  ;;  %v2028_v32 = vsel %vm1035_vm9, %v2013_v19, %v6952_v25  ;;  %v7117_v25 = vld [vmem:[%s9273_s8 + $0x130] sm:$0xff]   ;;  %v7118_v26 = vld [vmem:[%s9273_s8 + $0x138] sm:$0xff]   ;;  %v7119_v28 = vld [vmem:[%s9273_s8 + $0x140] sm:$0xff]  }
 0x9fd   : > { %v2029_v33 = vpack.c.bf16 %v2028_v32, %v2027_v31  ;;  %v7120_v31 = vld [vmem:[%s9273_s8 + $0x148] sm:$0xff]   ;;  %v7121_v32 = vld [vmem:[%s9273_s8 + $0x150] sm:$0xff]  }
 0x9ff   : > { %2147 = vmatmul.mubr.bf16.vlgmr.msra.gmra.mrb[12].mxu1 %v2029_v33  ;;  %v7122_v33 = vld [vmem:[%s9273_s8 + $0x158] sm:$0xff]  }
 0xa00   : > { %2502 = vmatpush1.bf16.msra.mxu1 %v7115_v23 }
 0xa01   : > { %2503 = vmatprep.subr.bf16.mxu1 %v7371_v39 }
 0xa04   : > { %2504 = vmatpush1.bf16.msra.mxu1 %v7116_v24 }
 0xa05   : > { %2505 = vmatprep.subr.bf16.mxu1 %v7371_v39 }
 0xa08   : > { %2506 = vmatpush1.bf16.msra.mxu1 %v7117_v25 }
 0xa09   : > { %2507 = vmatprep.subr.bf16.mxu1 %v7371_v39 }
 0xa0c   : > { %2508 = vmatpush1.bf16.msra.mxu1 %v7118_v26 }
 0xa0d   : > { %2509 = vmatprep.subr.bf16.mxu1 %v7371_v39 }
 0xa10   : > { %2510 = vmatpush1.bf16.msra.mxu1 %v7119_v28 }
 0xa11   : > { %2511 = vmatprep.subr.bf16.mxu1 %v7371_v39 }
 0xa14   : > { %2512 = vmatpush1.bf16.msra.mxu1 %v7120_v31 }
 0xa15   : > { %2513 = vmatprep.subr.bf16.mxu1 %v7371_v39 }
 0xa18   : > { %2514 = vmatpush1.bf16.msra.mxu1 %v7121_v32 }
 0xa19   : > { %2515 = vmatprep.subr.bf16.mxu1 %v7371_v39 }
 0xa1c   : > { %2516 = vmatpush1.bf16.msra.mxu1 %v7122_v33 }
 0xa1d   : > { %2517 = vmatprep.subr.bf16.mxu1 %v7371_v39 }
 0xa20   : > { %2518 = vmatpush1.bf16.msra.mxu1 %v7123_v34 }
 0xa21   : > { %2519 = vmatprep.subr.bf16.mxu1 %v7371_v39 }
 0xa24   : > { %2520 = vmatpush1.bf16.msra.mxu1 %v7124_v21 }
 0xa25   : > { %2521 = vmatprep.subr.bf16.mxu1 %v7371_v39 }
 0xa28   : > { %2522 = vmatpush1.bf16.msra.mxu1 %v7125_v35 }
 0xa29   : > { %2523 = vmatprep.subr.bf16.mxu1 %v7371_v39 }
 0xad2   : > { %v2148_v44 = vpop.f32.mrb[12].mxu1 }
 0xad3   : > { %v2149_v45 = vadd.f32 %v6055_v43, %v2148_v44  ;;  %v2150_v46 = vpop.f32.mrb[13].mxu1 }
 0xad4   : > { %v2151_v47 = vpop.f32.mrb[14].mxu1 }
 0xad5   : > { %v8067_v48 = vadd.f32 %v2149_v45, %v7920_v56  ;;  %v2152_v49 = vadd.f32 %v6055_v43, %v2151_v47  ;;  %v2153_v50 = vpop.f32.mrb[15].mxu1 }
 0xad7   : > { %v8070_v51 = vadd.f32 %v2152_v49, %v7923_v60  ;;  %v2159_v54 = vmul.f32 0.044715, %v8067_v48  ;;  %v7114_v60 = vld [vmem:[%s9271_s28 + $0x178] sm:$0xff]   ;;  %v2157_v4 = vmul.f32 0.5, %v8067_v48 }
 0xad8   : > { %2341 = vmatpush1.bf16.msra.mxu0 %v7114_v60 }
 0xad9   : > { %v2160_v58 = vmul.f32 0.044715, %v8070_v51  ;;  %v2161_v59 = vmul.f32 %v2159_v54, %v8067_v48  ;;  %6687 = vmatprep.subr.bf16.mxu0 %v9243_v2  ;;  %v2158_v57 = vmul.f32 0.5, %v8070_v51 }
 0xadb   : > { %v2162_v61 = vmul.f32 %v2160_v58, %v8070_v51  ;;  %v2163_v62 = vmul.f32 %v2161_v59, %v8067_v48  ;;  %v7126_v59 = vld [vmem:[%s9273_s8 + $0x178] sm:$0xff]  }
 0xadc   : > { %2524 = vmatpush1.bf16.msra.mxu1 %v7126_v59 }
 0xadd   : > { %v2164_v63 = vmul.f32 %v2162_v61, %v8070_v51  ;;  %v2165_v56 = vadd.f32 %v2163_v62, %v8067_v48  ;;  %6699 = vmatprep.subr.bf16.mxu1 %v9243_v2 }
 0xadf   : > { %v2166_v52 = vadd.f32 %v2164_v63, %v8070_v51  ;;  %v2167_v0 = vmul.f32 0.7978846, %v2165_v56 }
 0xae1   : > { %v2168_v3 = vmul.f32 0.7978846, %v2166_v52  ;;  %7293 = vtanh.f32 %v2167_v0 }
 0xae3   : > { %7295 = vtanh.f32 %v2168_v3 }
 0xaeb   : > { %v7294_v53 = vpop.eup %7293 }
 0xaec   : > { %v2171_v55 = vadd.f32 1.0, %v7294_v53 }
 0xaed   : > { %v7296_v6 = vpop.eup %7295 }
 0xaee   : > { %v2172_v7 = vadd.f32 1.0, %v7296_v6  ;;  %v2173_v8 = vmul.f32 %v2171_v55, %v2157_v4 }
 0xaf0   : > { %v2174_v9 = vmul.f32 %v2172_v7, %v2158_v57  ;;  %v2222_v10 = vmul.f32 0.0, %v2173_v8 }
 0xaf2   : > { %v6953_v11 = vpack.i.bf16 %v2174_v9, %v2173_v8  ;;  %v2234_v12 = vpack.c.bf16 %v2222_v10, %v2174_v9  ;;  %v2210_v14 = vmul.f32 0.0, %v2174_v9 }
 0xaf4   : > { %6954 = vrot.lane.b32.xlu0 %v6953_v11, %s9276_s6  ;;  %6107 = vmatprep.mubr.msk.bf16.mxu0 %vm1035_vm9, %v2234_v12  ;;  %v7127_v12 = vld [vmem:[%s9271_s28 + $0x1a0] sm:$0xff]  }
 0xb66   : > { %v6955_v13 = vpop.permute.xlu0 %6954 }
 0xb67   : > { %v6957_v15 = vunpack.i.h.bf16 %v6955_v13  ;;  %v6956_v18 = vunpack.i.l.bf16 %v6955_v13  ;;  %v7128_v13 = vld [vmem:[%s9271_s28 + $0x1a8] sm:$0xff]  }
 0xb69   : > { %v2232_v19 = vsel %vm1035_vm9, %v2173_v8, %v6957_v15  ;;  %v2231_v20 = vsel %vm1035_vm9, %v2210_v14, %v6956_v18  ;;  %v7129_v14 = vld [vmem:[%s9271_s28 + $0x1b0] sm:$0xff]   ;;  %v7130_v15 = vld [vmem:[%s9271_s28 + $0x1b8] sm:$0xff]   ;;  %v6133_v18 = vld [vmem:[%s9275_s9 + $0x3] ss:$0 sm:$0xff] }
 0xb6a   : > { %v2233_v22 = vpack.c.bf16 %v2232_v19, %v2231_v20 }
 0xb6c   : > { %2351 = vmatmul.mubr.bf16.vlgmr.msra.gmra.mrb[16].mxu0 %v2233_v22 }
 0xb6d   : > { %6695 = vmatprep.mubr.msk.bf16.mxu0 %vm7368_vm1, %v9243_v2  ;;  %6688 = vmatpush3.bf16.msra.mxu0 %v7127_v12 }
 0xb6e   : > { %6689 = vmatprep.subr.bf16.mxu0 %v9243_v2 }
 0xb71   : > { %6690 = vmatpush3.bf16.msra.mxu0 %v7128_v13 }
 0xb72   : > { %6691 = vmatprep.subr.bf16.mxu0 %v9243_v2 }
 0xb75   : > { %6692 = vmatpush3.bf16.msra.mxu0 %v7129_v14 }
 0xb76   : > { %6693 = vmatprep.subr.bf16.mxu0 %v9243_v2 }
 0xb79   : > { %6694 = vmatpush3.bf16.msra.mxu0 %v7130_v15 }
 0xb7a   : > { %6711 = vmatprep.subr.bf16.mxu0 %v9243_v2 }
 0xc3f   : > { %v2352_v17 = vpop.f32.mrb[16].mxu0 }
 0xc40   : > { %v2353_v37 = vadd.f32 %v6094_v36, %v2352_v17  ;;  %v2354_v16 = vpop.f32.mrb[17].mxu0 }
 0xc41   : > { %v2355_v38 = vpop.f32.mrb[18].mxu0 }
 0xc42   : > { %v2361_v40 = vmul.f32 0.044715, %v2353_v37  ;;  %v2356_v41 = vadd.f32 %v6094_v36, %v2355_v38  ;;  %v2357_v42 = vpop.f32.mrb[19].mxu0  ;;  %v2359_v62 = vmul.f32 0.5, %v2353_v37 }
 0xc44   : > { %v2363_v43 = vmul.f32 %v2361_v40, %v2353_v37  ;;  %v2362_v44 = vmul.f32 0.044715, %v2356_v41  ;;  %v2360_v52 = vmul.f32 0.5, %v2356_v41 }
 0xc46   : > { %v2365_v45 = vmul.f32 %v2363_v43, %v2353_v37  ;;  %v2364_v46 = vmul.f32 %v2362_v44, %v2356_v41 }
 0xc48   : > { %v2367_v47 = vadd.f32 %v2365_v45, %v2353_v37  ;;  %v2366_v49 = vmul.f32 %v2364_v46, %v2356_v41  ;;  %v7131_v46 = vld [vmem:[%s9273_s8 + $0x1a0] sm:$0xff]  }
 0xc4a   : > { %v2369_v50 = vmul.f32 0.7978846, %v2367_v47  ;;  %v2368_v54 = vadd.f32 %v2366_v49, %v2356_v41  ;;  %v7132_v47 = vld [vmem:[%s9273_s8 + $0x1a8] sm:$0xff]   ;;  %v7133_v49 = vld [vmem:[%s9273_s8 + $0x1b0] sm:$0xff]  }
 0xc4c   : > { %v2370_v58 = vmul.f32 0.7978846, %v2368_v54  ;;  %7297 = vtanh.f32 %v2369_v50  ;;  %v7134_v50 = vld [vmem:[%s9273_s8 + $0x1b8] sm:$0xff]   ;;  %v6156_v54 = vld [vmem:[%s9274_s3 + $0x4] ss:$0 sm:$0xff] }
 0xc4e   : > { %7299 = vtanh.f32 %v2370_v58 }
 0xc56   : > { %v7298_v61 = vpop.eup %7297 }
 0xc57   : > { %v2373_v63 = vadd.f32 1.0, %v7298_v61 }
 0xc58   : > { %v7300_v56 = vpop.eup %7299 }
 0xc59   : > { %v2374_v0 = vadd.f32 1.0, %v7300_v56  ;;  %v2375_v3 = vmul.f32 %v2373_v63, %v2359_v62 }
 0xc5b   : > { %v2376_v60 = vmul.f32 %v2374_v0, %v2360_v52  ;;  %v2405_v53 = vmul.f32 0.0, %v2375_v3 }
 0xc5d   : > { %v6958_v4 = vpack.i.bf16 %v2376_v60, %v2375_v3  ;;  %v2417_v55 = vpack.c.bf16 %v2405_v53, %v2376_v60  ;;  %v2402_v57 = vmul.f32 0.0, %v2376_v60 }
 0xc5f   : > { %6959 = vrot.lane.b32.xlu1 %v6958_v4, %s9276_s6  ;;  %6146 = vmatprep.mubr.msk.bf16.mxu1 %vm1035_vm9, %v2417_v55 }
 0xcd1   : > { %v6960_v6 = vpop.permute.xlu1 %6959 }
 0xcd2   : > { %v6962_v7 = vunpack.i.h.bf16 %v6960_v6  ;;  %v6961_v8 = vunpack.i.l.bf16 %v6960_v6 }
 0xcd4   : > { %v2415_v9 = vsel %vm1035_vm9, %v2375_v3, %v6962_v7  ;;  %v2414_v10 = vsel %vm1035_vm9, %v2402_v57, %v6961_v8 }
 0xcd5   : > { %v2416_v11 = vpack.c.bf16 %v2415_v9, %v2414_v10 }
 0xcd7   : > { %2534 = vmatmul.mubr.bf16.vlgmr.msra.gmra.mrb[16].mxu1 %v2416_v11 }
 0xcd8   : > { %6707 = vmatprep.mubr.msk.bf16.mxu1 %vm7368_vm1, %v9243_v2  ;;  %6700 = vmatpush3.bf16.msra.mxu1 %v7131_v46 }
 0xcd9   : > { %6701 = vmatprep.subr.bf16.mxu1 %v9243_v2 }
 0xcdc   : > { %6702 = vmatpush3.bf16.msra.mxu1 %v7132_v47 }
 0xcdd   : > { %6703 = vmatprep.subr.bf16.mxu1 %v9243_v2 }
 0xce0   : > { %6704 = vmatpush3.bf16.msra.mxu1 %v7133_v49 }
 0xce1   : > { %6705 = vmatprep.subr.bf16.mxu1 %v9243_v2 }
 0xce4   : > { %6706 = vmatpush3.bf16.msra.mxu1 %v7134_v50 }
 0xce5   : > { %6723 = vmatprep.subr.bf16.mxu1 %v9243_v2 }
 0xdaa   : > { %v2535_v19 = vpop.f32.mrb[16].mxu1 }
 0xdab   : > { %v2536_v20 = vadd.f32 %v6133_v18, %v2535_v19  ;;  %v2537_v22 = vpop.f32.mrb[17].mxu1  ;;  %v7135_v19 = vld [vmem:[%s9271_s28 + $0x200] sm:$0xff]  }
 0xdac   : > { %v2538_v23 = vpop.f32.mrb[18].mxu1  ;;  %v7137_v22 = vld [vmem:[%s9271_s28 + $0x210] sm:$0xff]  }
 0xdad   : > { %v8169_v24 = vadd.f32 %v2536_v20, %v8067_v48  ;;  %v2539_v25 = vadd.f32 %v6133_v18, %v2538_v23  ;;  %v2540_v26 = vpop.f32.mrb[19].mxu1  ;;  %v7136_v20 = vld [vmem:[%s9271_s28 + $0x208] sm:$0xff]   ;;  %v7138_v23 = vld [vmem:[%s9271_s28 + $0x218] sm:$0xff]  }
 0xdaf   : > { %v2546_v28 = vmul.f32 0.044715, %v8169_v24  ;;  %v8173_v31 = vadd.f32 %v2539_v25, %v8070_v51  ;;  %v2544_v40 = vmul.f32 0.5, %v8169_v24  ;;  %v6171_v25 = vld [vmem:[%s9275_s9 + $0x4] ss:$0 sm:$0xff] }
 0xdb1   : > { %v2548_v32 = vmul.f32 %v2546_v28, %v8169_v24  ;;  %v2547_v33 = vmul.f32 0.044715, %v8173_v31  ;;  %v2545_v41 = vmul.f32 0.5, %v8173_v31 }
 0xdb3   : > { %v2550_v34 = vmul.f32 %v2548_v32, %v8169_v24  ;;  %v2549_v21 = vmul.f32 %v2547_v33, %v8173_v31 }
 0xdb5   : > { %v2551_v35 = vmul.f32 %v2549_v21, %v8173_v31  ;;  %v2552_v48 = vadd.f32 %v2550_v34, %v8169_v24 }
 0xdb7   : > { %v2553_v36 = vadd.f32 %v2551_v35, %v8173_v31  ;;  %v2554_v17 = vmul.f32 0.7978846, %v2552_v48 }
 0xdb9   : > { %v2555_v37 = vmul.f32 0.7978846, %v2553_v36  ;;  %7301 = vtanh.f32 %v2554_v17 }
 0xdbb   : > { %7303 = vtanh.f32 %v2555_v37 }
 0xdc3   : > { %v7302_v51 = vpop.eup %7301 }
 0xdc4   : > { %v2558_v16 = vadd.f32 1.0, %v7302_v51 }
 0xdc5   : > { %v7304_v38 = vpop.eup %7303 }
 0xdc6   : > { %v2559_v42 = vadd.f32 1.0, %v7304_v38  ;;  %v2560_v43 = vmul.f32 %v2558_v16, %v2544_v40 }
 0xdc8   : > { %v2561_v44 = vmul.f32 %v2559_v42, %v2545_v41 }
 0xdca   : > { %v2571_v45 = vpack.c.bf16 %v2561_v44, %v2560_v43 }
 0xdcc   : > { %6696 = vmatmul.mubr.msk.bf16.vlgmr.msra.gmra.mrb[20].mxu0 %vm1035_vm9, %v2571_v45 }
 0xdcd   : > { %6719 = vmatprep.mubr.msk.bf16.mxu0 %vm7368_vm1, %v9243_v2  ;;  %6712 = vmatpush3.bf16.msra.mxu0 %v7135_v19 }
 0xdce   : > { %6713 = vmatprep.subr.bf16.mxu0 %v9243_v2 }
 0xdd1   : > { %6714 = vmatpush3.bf16.msra.mxu0 %v7136_v20 }
 0xdd2   : > { %6715 = vmatprep.subr.bf16.mxu0 %v9243_v2 }
 0xdd5   : > { %6716 = vmatpush3.bf16.msra.mxu0 %v7137_v22 }
 0xdd6   : > { %6717 = vmatprep.subr.bf16.mxu0 %v9243_v2 }
 0xdd9   : > { %6718 = vmatpush3.bf16.msra.mxu0 %v7138_v23 }
 0xdda   : > { %6735 = vmatprep.subr.bf16.mxu0 %v9243_v2 }
 0xe9f   : > { %v2641_v58 = vpop.f32.mrb[20].mxu0 }
 0xea0   : > { %v2642_v59 = vadd.f32 %v6156_v54, %v2641_v58  ;;  %v6697_v61 = vpop.f32.mrb[21].mxu0  ;;  %v7139_v58 = vld [vmem:[%s9273_s8 + $0x200] sm:$0xff]  }
 0xea1   : > { %v2644_v62 = vpop.f32.mrb[22].mxu0  ;;  %v7141_v61 = vld [vmem:[%s9273_s8 + $0x210] sm:$0xff]  }
 0xea2   : > { %v2650_v63 = vmul.f32 0.044715, %v2642_v59  ;;  %v2645_v56 = vadd.f32 %v6156_v54, %v2644_v62  ;;  %v6698_v52 = vpop.f32.mrb[23].mxu0  ;;  %v2648_v11 = vmul.f32 0.5, %v2642_v59  ;;  %v7142_v62 = vld [vmem:[%s9273_s8 + $0x218] sm:$0xff]  }
 0xea4   : > { %v2652_v0 = vmul.f32 %v2650_v63, %v2642_v59  ;;  %v2651_v3 = vmul.f32 0.044715, %v2645_v56  ;;  %v2649_v12 = vmul.f32 0.5, %v2645_v56  ;;  %v6186_v63 = vld [vmem:[%s9274_s3 + $0x5] ss:$0 sm:$0xff] }
 0xea6   : > { %v2654_v60 = vmul.f32 %v2652_v0, %v2642_v59  ;;  %v2653_v53 = vmul.f32 %v2651_v3, %v2645_v56 }
 0xea8   : > { %v2656_v4 = vadd.f32 %v2654_v60, %v2642_v59  ;;  %v2655_v55 = vmul.f32 %v2653_v53, %v2645_v56  ;;  %v7140_v59 = vld [vmem:[%s9273_s8 + $0x208] sm:$0xff]  }
 0xeaa   : > { %v2658_v6 = vmul.f32 0.7978846, %v2656_v4  ;;  %v2657_v57 = vadd.f32 %v2655_v55, %v2645_v56 }
 0xeac   : > { %7305 = vtanh.f32 %v2658_v6  ;;  %v2659_v7 = vmul.f32 0.7978846, %v2657_v57 }
 0xeae   : > { %7307 = vtanh.f32 %v2659_v7 }
 0xeb6   : > { %v7306_v8 = vpop.eup %7305 }
 0xeb7   : > { %v2662_v9 = vadd.f32 1.0, %v7306_v8 }
 0xeb8   : > { %v7308_v10 = vpop.eup %7307 }
 0xeb9   : > { %v2663_v13 = vadd.f32 1.0, %v7308_v10  ;;  %v2664_v14 = vmul.f32 %v2662_v9, %v2648_v11 }
 0xebb   : > { %v2665_v15 = vmul.f32 %v2663_v13, %v2649_v12 }
 0xebd   : > { %v2675_v18 = vpack.c.bf16 %v2665_v15, %v2664_v14 }
 0xebf   : > { %6708 = vmatmul.mubr.msk.bf16.vlgmr.msra.gmra.mrb[20].mxu1 %vm1035_vm9, %v2675_v18 }
 0xec0   : > { %6731 = vmatprep.mubr.msk.bf16.mxu1 %vm7368_vm1, %v9243_v2  ;;  %6724 = vmatpush3.bf16.msra.mxu1 %v7139_v58 }
 0xec1   : > { %6725 = vmatprep.subr.bf16.mxu1 %v9243_v2 }
 0xec4   : > { %6726 = vmatpush3.bf16.msra.mxu1 %v7140_v59 }
 0xec5   : > { %6727 = vmatprep.subr.bf16.mxu1 %v9243_v2 }
 0xec8   : > { %6728 = vmatpush3.bf16.msra.mxu1 %v7141_v61 }
 0xec9   : > { %6729 = vmatprep.subr.bf16.mxu1 %v9243_v2 }
 0xecc   : > { %6730 = vmatpush3.bf16.msra.mxu1 %v7142_v62 }
 0xecd   : > { %6747 = vmatprep.subr.bf16.mxu1 %v9243_v2 }
 0xf92   : > { %v2745_v26 = vpop.f32.mrb[20].mxu1 }
 0xf93   : > { %v2746_v28 = vadd.f32 %v6171_v25, %v2745_v26  ;;  %v6709_v32 = vpop.f32.mrb[21].mxu1  ;;  %v7143_v26 = vld [vmem:[%s9271_s28 + $0x260] sm:$0xff]  }
 0xf94   : > { %v2748_v33 = vpop.f32.mrb[22].mxu1  ;;  %v7145_v32 = vld [vmem:[%s9271_s28 + $0x270] sm:$0xff]  }
 0xf95   : > { %v8229_v34 = vadd.f32 %v2746_v28, %v8169_v24  ;;  %v2749_v21 = vadd.f32 %v6171_v25, %v2748_v33  ;;  %v6710_v35 = vpop.f32.mrb[23].mxu1  ;;  %v7144_v28 = vld [vmem:[%s9271_s28 + $0x268] sm:$0xff]   ;;  %v7146_v33 = vld [vmem:[%s9271_s28 + $0x278] sm:$0xff]  }
 0xf97   : > { %v2756_v48 = vmul.f32 0.044715, %v8229_v34  ;;  %v8233_v36 = vadd.f32 %v2749_v21, %v8173_v31  ;;  %v2754_v45 = vmul.f32 0.5, %v8229_v34  ;;  %v6201_v21 = vld [vmem:[%s9275_s9 + $0x5] ss:$0 sm:$0xff] }
 0xf99   : > { %v2758_v17 = vmul.f32 %v2756_v48, %v8229_v34  ;;  %v2757_v37 = vmul.f32 0.044715, %v8233_v36  ;;  %v2755_v46 = vmul.f32 0.5, %v8233_v36 }
 0xf9b   : > { %v2760_v51 = vmul.f32 %v2758_v17, %v8229_v34  ;;  %v2759_v16 = vmul.f32 %v2757_v37, %v8233_v36 }
 0xf9d   : > { %v2761_v38 = vmul.f32 %v2759_v16, %v8233_v36  ;;  %v2762_v24 = vadd.f32 %v2760_v51, %v8229_v34 }
 0xf9f   : > { %v2763_v40 = vadd.f32 %v2761_v38, %v8233_v36  ;;  %v2764_v41 = vmul.f32 0.7978846, %v2762_v24 }
 0xfa1   : > { %v2765_v42 = vmul.f32 0.7978846, %v2763_v40  ;;  %7309 = vtanh.f32 %v2764_v41 }
 0xfa3   : > { %7311 = vtanh.f32 %v2765_v42 }
 0xfab   : > { %v7310_v31 = vpop.eup %7309 }
 0xfac   : > { %v2768_v43 = vadd.f32 1.0, %v7310_v31 }
 0xfad   : > { %v7312_v44 = vpop.eup %7311 }
 0xfae   : > { %v2769_v47 = vadd.f32 1.0, %v7312_v44  ;;  %v2770_v49 = vmul.f32 %v2768_v43, %v2754_v45 }
 0xfb0   : > { %v2771_v50 = vmul.f32 %v2769_v47, %v2755_v46 }
 0xfb2   : > { %v2781_v54 = vpack.c.bf16 %v2771_v50, %v2770_v49 }
 0xfb4   : > { %6720 = vmatmul.mubr.msk.bf16.vlgmr.msra.gmra.mrb[24].mxu0 %vm1035_vm9, %v2781_v54 }
 0xfb5   : > { %6743 = vmatprep.mubr.msk.bf16.mxu0 %vm7368_vm1, %v9243_v2  ;;  %6736 = vmatpush3.bf16.msra.mxu0 %v7143_v26 }
 0xfb6   : > { %6737 = vmatprep.subr.bf16.mxu0 %v9243_v2 }
 0xfb9   : > { %6738 = vmatpush3.bf16.msra.mxu0 %v7144_v28 }
 0xfba   : > { %6739 = vmatprep.subr.bf16.mxu0 %v9243_v2 }
 0xfbd   : > { %6740 = vmatpush3.bf16.msra.mxu0 %v7145_v32 }
 0xfbe   : > { %6741 = vmatprep.subr.bf16.mxu0 %v9243_v2 }
 0xfc1   : > { %6742 = vmatpush3.bf16.msra.mxu0 %v7146_v33 }
 0xfc2   : > { %6759 = vmatprep.subr.bf16.mxu0 %v9243_v2 }
0x1087   : > { %v2851_v56 = vpop.f32.mrb[24].mxu0 }
0x1088   : > { %v2852_v52 = vadd.f32 %v6186_v63, %v2851_v56  ;;  %v6721_v0 = vpop.f32.mrb[25].mxu0  ;;  %v7147_v56 = vld [vmem:[%s9273_s8 + $0x260] sm:$0xff]  }
0x1089   : > { %v2854_v3 = vpop.f32.mrb[26].mxu0  ;;  %v7149_v0 = vld [vmem:[%s9273_s8 + $0x270] sm:$0xff]  }
0x108a   : > { %v2860_v60 = vmul.f32 0.044715, %v2852_v52  ;;  %v2855_v53 = vadd.f32 %v6186_v63, %v2854_v3  ;;  %v6722_v4 = vpop.f32.mrb[27].mxu0  ;;  %v2858_v18 = vmul.f32 0.5, %v2852_v52  ;;  %v7150_v3 = vld [vmem:[%s9273_s8 + $0x278] sm:$0xff]  }
0x108c   : > { %v2862_v55 = vmul.f32 %v2860_v60, %v2852_v52  ;;  %v2861_v6 = vmul.f32 0.044715, %v2855_v53  ;;  %v2859_v19 = vmul.f32 0.5, %v2855_v53  ;;  %v6216_v60 = vld [vmem:[%s9274_s3 + $0x6] ss:$0 sm:$0xff] }
0x108e   : > { %v2864_v57 = vmul.f32 %v2862_v55, %v2852_v52  ;;  %v2863_v7 = vmul.f32 %v2861_v6, %v2855_v53 }
0x1090   : > { %v2866_v8 = vadd.f32 %v2864_v57, %v2852_v52  ;;  %v2865_v9 = vmul.f32 %v2863_v7, %v2855_v53  ;;  %v7148_v52 = vld [vmem:[%s9273_s8 + $0x268] sm:$0xff]  }
0x1092   : > { %v2868_v10 = vmul.f32 0.7978846, %v2866_v8  ;;  %v2867_v11 = vadd.f32 %v2865_v9, %v2855_v53 }
0x1094   : > { %7313 = vtanh.f32 %v2868_v10  ;;  %v2869_v12 = vmul.f32 0.7978846, %v2867_v11 }
0x1096   : > { %7315 = vtanh.f32 %v2869_v12 }
0x109e   : > { %v7314_v13 = vpop.eup %7313 }
0x109f   : > { %v2872_v14 = vadd.f32 1.0, %v7314_v13 }
0x10a0   : > { %v7316_v15 = vpop.eup %7315 }
0x10a1   : > { %v2873_v20 = vadd.f32 1.0, %v7316_v15  ;;  %v2874_v22 = vmul.f32 %v2872_v14, %v2858_v18 }
0x10a3   : > { %v2875_v23 = vmul.f32 %v2873_v20, %v2859_v19 }
0x10a5   : > { %v2885_v25 = vpack.c.bf16 %v2875_v23, %v2874_v22 }
0x10a7   : > { %6732 = vmatmul.mubr.msk.bf16.vlgmr.msra.gmra.mrb[24].mxu1 %vm1035_vm9, %v2885_v25 }
0x10a8   : > { %6755 = vmatprep.mubr.msk.bf16.mxu1 %vm7368_vm1, %v9243_v2  ;;  %6748 = vmatpush3.bf16.msra.mxu1 %v7147_v56 }
0x10a9   : > { %6749 = vmatprep.subr.bf16.mxu1 %v9243_v2 }
0x10ac   : > { %6750 = vmatpush3.bf16.msra.mxu1 %v7148_v52 }
0x10ad   : > { %6751 = vmatprep.subr.bf16.mxu1 %v9243_v2 }
0x10b0   : > { %6752 = vmatpush3.bf16.msra.mxu1 %v7149_v0 }
0x10b1   : > { %6753 = vmatprep.subr.bf16.mxu1 %v9243_v2 }
0x10b4   : > { %6754 = vmatpush3.bf16.msra.mxu1 %v7150_v3 }
0x10b5   : > { %6771 = vmatprep.subr.bf16.mxu1 %v9243_v2 }
0x117a   : > { %v2955_v35 = vpop.f32.mrb[24].mxu1 }
0x117b   : > { %v2956_v48 = vadd.f32 %v6201_v21, %v2955_v35  ;;  %v6733_v17 = vpop.f32.mrb[25].mxu1  ;;  %v7151_v35 = vld [vmem:[%s9271_s28 + $0x2c0] sm:$0xff]  }
0x117c   : > { %v2958_v37 = vpop.f32.mrb[26].mxu1  ;;  %v7153_v17 = vld [vmem:[%s9271_s28 + $0x2d0] sm:$0xff]  }
0x117d   : > { %v8289_v51 = vadd.f32 %v2956_v48, %v8229_v34  ;;  %v2959_v16 = vadd.f32 %v6201_v21, %v2958_v37  ;;  %v6734_v38 = vpop.f32.mrb[27].mxu1  ;;  %v7152_v48 = vld [vmem:[%s9271_s28 + $0x2c8] sm:$0xff]   ;;  %v7154_v37 = vld [vmem:[%s9271_s28 + $0x2d8] sm:$0xff]  }
0x117f   : > { %v2966_v24 = vmul.f32 0.044715, %v8289_v51  ;;  %v8293_v40 = vadd.f32 %v2959_v16, %v8233_v36  ;;  %v2964_v54 = vmul.f32 0.5, %v8289_v51  ;;  %v6231_v16 = vld [vmem:[%s9275_s9 + $0x6] ss:$0 sm:$0xff] }
0x1181   : > { %v2968_v41 = vmul.f32 %v2966_v24, %v8289_v51  ;;  %v2967_v42 = vmul.f32 0.044715, %v8293_v40  ;;  %v2965_v58 = vmul.f32 0.5, %v8293_v40 }
0x1183   : > { %v2970_v31 = vmul.f32 %v2968_v41, %v8289_v51  ;;  %v2969_v43 = vmul.f32 %v2967_v42, %v8293_v40 }
0x1185   : > { %v2971_v44 = vmul.f32 %v2969_v43, %v8293_v40  ;;  %v2972_v34 = vadd.f32 %v2970_v31, %v8289_v51 }
0x1187   : > { %v2973_v45 = vadd.f32 %v2971_v44, %v8293_v40  ;;  %v2974_v46 = vmul.f32 0.7978846, %v2972_v34 }
0x1189   : > { %v2975_v47 = vmul.f32 0.7978846, %v2973_v45  ;;  %7317 = vtanh.f32 %v2974_v46 }
0x118b   : > { %7319 = vtanh.f32 %v2975_v47 }
0x1193   : > { %v7318_v36 = vpop.eup %7317 }
0x1194   : > { %v2978_v49 = vadd.f32 1.0, %v7318_v36 }
0x1195   : > { %v7320_v50 = vpop.eup %7319 }
0x1196   : > { %v2979_v59 = vadd.f32 1.0, %v7320_v50  ;;  %v2980_v61 = vmul.f32 %v2978_v49, %v2964_v54 }
0x1198   : > { %v2981_v62 = vmul.f32 %v2979_v59, %v2965_v58 }
0x119a   : > { %v2991_v63 = vpack.c.bf16 %v2981_v62, %v2980_v61 }
0x119c   : > { %6744 = vmatmul.mubr.msk.bf16.vlgmr.msra.gmra.mrb[28].mxu0 %vm1035_vm9, %v2991_v63 }
0x119d   : > { %6767 = vmatprep.mubr.msk.bf16.mxu0 %vm7368_vm1, %v9243_v2  ;;  %6760 = vmatpush3.bf16.msra.mxu0 %v7151_v35 }
0x119e   : > { %6761 = vmatprep.subr.bf16.mxu0 %v9243_v2 }
0x11a1   : > { %6762 = vmatpush3.bf16.msra.mxu0 %v7152_v48 }
0x11a2   : > { %6763 = vmatprep.subr.bf16.mxu0 %v9243_v2 }
0x11a5   : > { %6764 = vmatpush3.bf16.msra.mxu0 %v7153_v17 }
0x11a6   : > { %6765 = vmatprep.subr.bf16.mxu0 %v9243_v2 }
0x11a9   : > { %6766 = vmatpush3.bf16.msra.mxu0 %v7154_v37 }
0x11aa   : > { %6783 = vmatprep.subr.bf16.mxu0 %v9243_v2 }
0x126f   : > { %v3061_v53 = vpop.f32.mrb[28].mxu0 }
0x1270   : > { %v3062_v4 = vadd.f32 %v6216_v60, %v3061_v53  ;;  %v6745_v55 = vpop.f32.mrb[29].mxu0  ;;  %v7155_v53 = vld [vmem:[%s9273_s8 + $0x2c0] sm:$0xff]  }
0x1271   : > { %v3064_v6 = vpop.f32.mrb[30].mxu0  ;;  %v7157_v55 = vld [vmem:[%s9273_s8 + $0x2d0] sm:$0xff]  }
0x1272   : > { %v3070_v57 = vmul.f32 0.044715, %v3062_v4  ;;  %v3065_v7 = vadd.f32 %v6216_v60, %v3064_v6  ;;  %v6746_v8 = vpop.f32.mrb[31].mxu0  ;;  %v3068_v25 = vmul.f32 0.5, %v3062_v4  ;;  %v7158_v6 = vld [vmem:[%s9273_s8 + $0x2d8] sm:$0xff]  }
0x1274   : > { %v3072_v9 = vmul.f32 %v3070_v57, %v3062_v4  ;;  %v3071_v10 = vmul.f32 0.044715, %v3065_v7  ;;  %v3069_v26 = vmul.f32 0.5, %v3065_v7  ;;  %v6246_v57 = vld [vmem:[%s9274_s3 + $0x7] ss:$0 sm:$0xff] }
0x1276   : > { %v3074_v11 = vmul.f32 %v3072_v9, %v3062_v4  ;;  %v3073_v12 = vmul.f32 %v3071_v10, %v3065_v7 }
0x1278   : > { %v3076_v13 = vadd.f32 %v3074_v11, %v3062_v4  ;;  %v3075_v14 = vmul.f32 %v3073_v12, %v3065_v7  ;;  %v7156_v4 = vld [vmem:[%s9273_s8 + $0x2c8] sm:$0xff]  }
0x127a   : > { %v3078_v15 = vmul.f32 0.7978846, %v3076_v13  ;;  %v3077_v18 = vadd.f32 %v3075_v14, %v3065_v7 }
0x127c   : > { %7321 = vtanh.f32 %v3078_v15  ;;  %v3079_v19 = vmul.f32 0.7978846, %v3077_v18 }
0x127e   : > { %7323 = vtanh.f32 %v3079_v19 }
0x1286   : > { %v7322_v20 = vpop.eup %7321 }
0x1287   : > { %v3082_v22 = vadd.f32 1.0, %v7322_v20 }
0x1288   : > { %v7324_v23 = vpop.eup %7323 }
0x1289   : > { %v3083_v28 = vadd.f32 1.0, %v7324_v23  ;;  %v3084_v32 = vmul.f32 %v3082_v22, %v3068_v25 }
0x128b   : > { %v3085_v33 = vmul.f32 %v3083_v28, %v3069_v26 }
0x128d   : > { %v3095_v21 = vpack.c.bf16 %v3085_v33, %v3084_v32 }
0x128f   : > { %6756 = vmatmul.mubr.msk.bf16.vlgmr.msra.gmra.mrb[28].mxu1 %vm1035_vm9, %v3095_v21 }
0x1290   : > { %6779 = vmatprep.mubr.msk.bf16.mxu1 %vm7368_vm1, %v9243_v2  ;;  %6772 = vmatpush3.bf16.msra.mxu1 %v7155_v53 }
0x1291   : > { %6773 = vmatprep.subr.bf16.mxu1 %v9243_v2 }
0x1294   : > { %6774 = vmatpush3.bf16.msra.mxu1 %v7156_v4 }
0x1295   : > { %6775 = vmatprep.subr.bf16.mxu1 %v9243_v2 }
0x1298   : > { %6776 = vmatpush3.bf16.msra.mxu1 %v7157_v55 }
0x1299   : > { %6777 = vmatprep.subr.bf16.mxu1 %v9243_v2 }
0x129c   : > { %6778 = vmatpush3.bf16.msra.mxu1 %v7158_v6 }
0x129d   : > { %6795 = vmatprep.subr.bf16.mxu1 %v9243_v2 }
0x1362   : > { %v3165_v38 = vpop.f32.mrb[28].mxu1 }
0x1363   : > { %v3166_v24 = vadd.f32 %v6231_v16, %v3165_v38  ;;  %v6757_v41 = vpop.f32.mrb[29].mxu1  ;;  %v7159_v38 = vld [vmem:[%s9271_s28 + $0x320] sm:$0xff]  }
0x1364   : > { %v3168_v42 = vpop.f32.mrb[30].mxu1  ;;  %v7161_v41 = vld [vmem:[%s9271_s28 + $0x330] sm:$0xff]  }
0x1365   : > { %v8349_v31 = vadd.f32 %v3166_v24, %v8289_v51  ;;  %v3169_v43 = vadd.f32 %v6231_v16, %v3168_v42  ;;  %v6758_v44 = vpop.f32.mrb[31].mxu1  ;;  %v7160_v24 = vld [vmem:[%s9271_s28 + $0x328] sm:$0xff]   ;;  %v7162_v42 = vld [vmem:[%s9271_s28 + $0x338] sm:$0xff]  }
0x1367   : > { %v3176_v34 = vmul.f32 0.044715, %v8349_v31  ;;  %v8353_v45 = vadd.f32 %v3169_v43, %v8293_v40  ;;  %v3174_v63 = vmul.f32 0.5, %v8349_v31  ;;  %v6261_v43 = vld [vmem:[%s9275_s9 + $0x7] ss:$0 sm:$0xff] }
0x1369   : > { %v3178_v46 = vmul.f32 %v3176_v34, %v8349_v31  ;;  %v3177_v47 = vmul.f32 0.044715, %v8353_v45  ;;  %v3175_v56 = vmul.f32 0.5, %v8353_v45 }
0x136b   : > { %v3180_v36 = vmul.f32 %v3178_v46, %v8349_v31  ;;  %v3179_v49 = vmul.f32 %v3177_v47, %v8353_v45 }
0x136d   : > { %v3181_v50 = vmul.f32 %v3179_v49, %v8353_v45  ;;  %v3182_v51 = vadd.f32 %v3180_v36, %v8349_v31 }
0x136f   : > { %v3183_v54 = vadd.f32 %v3181_v50, %v8353_v45  ;;  %v3184_v58 = vmul.f32 0.7978846, %v3182_v51 }
0x1371   : > { %v3185_v59 = vmul.f32 0.7978846, %v3183_v54  ;;  %7325 = vtanh.f32 %v3184_v58 }
0x1373   : > { %7327 = vtanh.f32 %v3185_v59 }
0x137b   : > { %v7326_v40 = vpop.eup %7325 }
0x137c   : > { %v3188_v61 = vadd.f32 1.0, %v7326_v40 }
0x137d   : > { %v7328_v62 = vpop.eup %7327 }
0x137e   : > { %v3189_v52 = vadd.f32 1.0, %v7328_v62  ;;  %v3190_v0 = vmul.f32 %v3188_v61, %v3174_v63 }
0x1380   : > { %v3191_v3 = vmul.f32 %v3189_v52, %v3175_v56 }
0x1382   : > { %v3201_v60 = vpack.c.bf16 %v3191_v3, %v3190_v0 }
0x1384   : > { %6768 = vmatmul.mubr.msk.bf16.vlgmr.msra.gmra.mrb[32].mxu0 %vm1035_vm9, %v3201_v60 }
0x1385   : > { %6791 = vmatprep.mubr.msk.bf16.mxu0 %vm7368_vm1, %v9243_v2  ;;  %6784 = vmatpush3.bf16.msra.mxu0 %v7159_v38 }
0x1386   : > { %6785 = vmatprep.subr.bf16.mxu0 %v9243_v2 }
0x1389   : > { %6786 = vmatpush3.bf16.msra.mxu0 %v7160_v24 }
0x138a   : > { %6787 = vmatprep.subr.bf16.mxu0 %v9243_v2 }
0x138d   : > { %6788 = vmatpush3.bf16.msra.mxu0 %v7161_v41 }
0x138e   : > { %6789 = vmatprep.subr.bf16.mxu0 %v9243_v2 }
0x1391   : > { %6790 = vmatpush3.bf16.msra.mxu0 %v7162_v42 }
0x1392   : > { %6807 = vmatprep.subr.bf16.mxu0 %v9243_v2 }
0x1457   : > { %v3271_v7 = vpop.f32.mrb[32].mxu0 }
0x1458   : > { %v3272_v8 = vadd.f32 %v6246_v57, %v3271_v7  ;;  %v6769_v9 = vpop.f32.mrb[33].mxu0  ;;  %v7163_v7 = vld [vmem:[%s9273_s8 + $0x320] sm:$0xff]  }
0x1459   : > { %v3274_v10 = vpop.f32.mrb[34].mxu0  ;;  %v7165_v9 = vld [vmem:[%s9273_s8 + $0x330] sm:$0xff]  }
0x145a   : > { %v3280_v11 = vmul.f32 0.044715, %v3272_v8  ;;  %v3275_v12 = vadd.f32 %v6246_v57, %v3274_v10  ;;  %v6770_v13 = vpop.f32.mrb[35].mxu0  ;;  %v3278_v21 = vmul.f32 0.5, %v3272_v8  ;;  %v7166_v10 = vld [vmem:[%s9273_s8 + $0x338] sm:$0xff]  }
0x145c   : > { %v3282_v14 = vmul.f32 %v3280_v11, %v3272_v8  ;;  %v3281_v15 = vmul.f32 0.044715, %v3275_v12  ;;  %v3279_v35 = vmul.f32 0.5, %v3275_v12  ;;  %v6276_v11 = vld [vmem:[%s9274_s3 + $0x8] ss:$0 sm:$0xff] }
0x145e   : > { %v3284_v18 = vmul.f32 %v3282_v14, %v3272_v8  ;;  %v3283_v19 = vmul.f32 %v3281_v15, %v3275_v12 }
0x1460   : > { %v3286_v20 = vadd.f32 %v3284_v18, %v3272_v8  ;;  %v3285_v22 = vmul.f32 %v3283_v19, %v3275_v12  ;;  %v7164_v8 = vld [vmem:[%s9273_s8 + $0x328] sm:$0xff]  }
0x1462   : > { %v3288_v23 = vmul.f32 0.7978846, %v3286_v20  ;;  %v3287_v25 = vadd.f32 %v3285_v22, %v3275_v12 }
0x1464   : > { %7329 = vtanh.f32 %v3288_v23  ;;  %v3289_v26 = vmul.f32 0.7978846, %v3287_v25 }
0x1466   : > { %7331 = vtanh.f32 %v3289_v26 }
0x146e   : > { %v7330_v28 = vpop.eup %7329 }
0x146f   : > { %v3292_v32 = vadd.f32 1.0, %v7330_v28 }
0x1470   : > { %v7332_v33 = vpop.eup %7331 }
0x1471   : > { %v3293_v48 = vadd.f32 1.0, %v7332_v33  ;;  %v3294_v17 = vmul.f32 %v3292_v32, %v3278_v21 }
0x1473   : > { %v3295_v37 = vmul.f32 %v3293_v48, %v3279_v35 }
0x1475   : > { %v3305_v16 = vpack.c.bf16 %v3295_v37, %v3294_v17 }
0x1477   : > { %6780 = vmatmul.mubr.msk.bf16.vlgmr.msra.gmra.mrb[32].mxu1 %vm1035_vm9, %v3305_v16 }
0x1478   : > { %6803 = vmatprep.mubr.msk.bf16.mxu1 %vm7368_vm1, %v9243_v2  ;;  %6796 = vmatpush3.bf16.msra.mxu1 %v7163_v7 }
0x1479   : > { %6797 = vmatprep.subr.bf16.mxu1 %v9243_v2 }
0x147c   : > { %6798 = vmatpush3.bf16.msra.mxu1 %v7164_v8 }
0x147d   : > { %6799 = vmatprep.subr.bf16.mxu1 %v9243_v2 }
0x1480   : > { %6800 = vmatpush3.bf16.msra.mxu1 %v7165_v9 }
0x1481   : > { %6801 = vmatprep.subr.bf16.mxu1 %v9243_v2 }
0x1484   : > { %6802 = vmatpush3.bf16.msra.mxu1 %v7166_v10 }
0x1485   : > { %6819 = vmatprep.subr.bf16.mxu1 %v9243_v2 }
0x154a   : > { %v3375_v44 = vpop.f32.mrb[32].mxu1 }
0x154b   : > { %v3376_v34 = vadd.f32 %v6261_v43, %v3375_v44  ;;  %v6781_v46 = vpop.f32.mrb[33].mxu1  ;;  %v7167_v44 = vld [vmem:[%s9271_s28 + $0x380] sm:$0xff]  }
0x154c   : > { %v3378_v47 = vpop.f32.mrb[34].mxu1  ;;  %v7169_v46 = vld [vmem:[%s9271_s28 + $0x390] sm:$0xff]  }
0x154d   : > { %v8409_v36 = vadd.f32 %v3376_v34, %v8349_v31  ;;  %v3379_v49 = vadd.f32 %v6261_v43, %v3378_v47  ;;  %v6782_v50 = vpop.f32.mrb[35].mxu1  ;;  %v7168_v34 = vld [vmem:[%s9271_s28 + $0x388] sm:$0xff]   ;;  %v7170_v47 = vld [vmem:[%s9271_s28 + $0x398] sm:$0xff]  }
0x154f   : > { %v3386_v51 = vmul.f32 0.044715, %v8409_v36  ;;  %v8413_v54 = vadd.f32 %v3379_v49, %v8353_v45  ;;  %v3384_v60 = vmul.f32 0.5, %v8409_v36  ;;  %v6291_v49 = vld [vmem:[%s9275_s9 + $0x8] ss:$0 sm:$0xff] }
0x1551   : > { %v3388_v58 = vmul.f32 %v3386_v51, %v8409_v36  ;;  %v3387_v59 = vmul.f32 0.044715, %v8413_v54  ;;  %v3385_v53 = vmul.f32 0.5, %v8413_v54 }
0x1553   : > { %v3390_v40 = vmul.f32 %v3388_v58, %v8409_v36  ;;  %v3389_v61 = vmul.f32 %v3387_v59, %v8413_v54 }
0x1555   : > { %v3391_v62 = vmul.f32 %v3389_v61, %v8413_v54  ;;  %v3392_v31 = vadd.f32 %v3390_v40, %v8409_v36 }
0x1557   : > { %v3393_v63 = vadd.f32 %v3391_v62, %v8413_v54  ;;  %v3394_v56 = vmul.f32 0.7978846, %v3392_v31 }
0x1559   : > { %v3395_v52 = vmul.f32 0.7978846, %v3393_v63  ;;  %7333 = vtanh.f32 %v3394_v56 }
0x155b   : > { %7335 = vtanh.f32 %v3395_v52 }
0x1563   : > { %v7334_v45 = vpop.eup %7333 }
0x1564   : > { %v3398_v0 = vadd.f32 1.0, %v7334_v45 }
0x1565   : > { %v7336_v3 = vpop.eup %7335 }
0x1566   : > { %v3399_v4 = vadd.f32 1.0, %v7336_v3  ;;  %v3400_v55 = vmul.f32 %v3398_v0, %v3384_v60 }
0x1568   : > { %v3401_v6 = vmul.f32 %v3399_v4, %v3385_v53 }
0x156a   : > { %v3411_v57 = vpack.c.bf16 %v3401_v6, %v3400_v55 }
0x156c   : > { %6792 = vmatmul.mubr.msk.bf16.vlgmr.msra.gmra.mrb[36].mxu0 %vm1035_vm9, %v3411_v57 }
0x156d   : > { %6815 = vmatprep.mubr.msk.bf16.mxu0 %vm7368_vm1, %v9243_v2  ;;  %6808 = vmatpush3.bf16.msra.mxu0 %v7167_v44 }
0x156e   : > { %6809 = vmatprep.subr.bf16.mxu0 %v9243_v2 }
0x1571   : > { %6810 = vmatpush3.bf16.msra.mxu0 %v7168_v34 }
0x1572   : > { %6811 = vmatprep.subr.bf16.mxu0 %v9243_v2 }
0x1575   : > { %6812 = vmatpush3.bf16.msra.mxu0 %v7169_v46 }
0x1576   : > { %6813 = vmatprep.subr.bf16.mxu0 %v9243_v2 }
0x1579   : > { %6814 = vmatpush3.bf16.msra.mxu0 %v7170_v47 }
0x157a   : > { %6831 = vmatprep.subr.bf16.mxu0 %v9243_v2 }
0x163f   : > { %v3481_v12 = vpop.f32.mrb[36].mxu0 }
0x1640   : > { %v3482_v13 = vadd.f32 %v6276_v11, %v3481_v12  ;;  %v6793_v14 = vpop.f32.mrb[37].mxu0  ;;  %v7171_v12 = vld [vmem:[%s9273_s8 + $0x380] sm:$0xff]  }
0x1641   : > { %v3484_v15 = vpop.f32.mrb[38].mxu0  ;;  %v7173_v14 = vld [vmem:[%s9273_s8 + $0x390] sm:$0xff]  }
0x1642   : > { %v3490_v18 = vmul.f32 0.044715, %v3482_v13  ;;  %v3485_v19 = vadd.f32 %v6276_v11, %v3484_v15  ;;  %v6794_v20 = vpop.f32.mrb[39].mxu0  ;;  %v3488_v16 = vmul.f32 0.5, %v3482_v13  ;;  %v7174_v15 = vld [vmem:[%s9273_s8 + $0x398] sm:$0xff]  }
0x1643   : > { %v6306_v20 = vld [vmem:[%s9274_s3 + $0x9] ss:$0 sm:$0xff] }
0x1644   : > { %v3492_v22 = vmul.f32 %v3490_v18, %v3482_v13  ;;  %v3491_v23 = vmul.f32 0.044715, %v3485_v19  ;;  %v3489_v38 = vmul.f32 0.5, %v3485_v19  ;;  %v7175_v18 = vld [vmem:[%s9277_s1] sm:$0xff]  }
0x1646   : > { %v3494_v25 = vmul.f32 %v3492_v22, %v3482_v13  ;;  %v3493_v26 = vmul.f32 %v3491_v23, %v3485_v19 }
0x1648   : > { %v3496_v28 = vadd.f32 %v3494_v25, %v3482_v13  ;;  %v3495_v32 = vmul.f32 %v3493_v26, %v3485_v19  ;;  %v7172_v13 = vld [vmem:[%s9273_s8 + $0x388] sm:$0xff]  }
0x164a   : > { %v3498_v33 = vmul.f32 0.7978846, %v3496_v28  ;;  %v3497_v21 = vadd.f32 %v3495_v32, %v3485_v19  ;;  %v7176_v19 = vld [vmem:[%s9277_s1 + $0x8] sm:$0xff]  }
0x164c   : > { %7337 = vtanh.f32 %v3498_v33  ;;  %v3499_v35 = vmul.f32 0.7978846, %v3497_v21 }
0x164e   : > { %7339 = vtanh.f32 %v3499_v35 }
0x1656   : > { %v7338_v48 = vpop.eup %7337 }
0x1657   : > { %v3502_v17 = vadd.f32 1.0, %v7338_v48 }
0x1658   : > { %v7340_v37 = vpop.eup %7339 }
0x1659   : > { %v3503_v24 = vadd.f32 1.0, %v7340_v37  ;;  %v3504_v41 = vmul.f32 %v3502_v17, %v3488_v16 }
0x165b   : > { %v3505_v42 = vmul.f32 %v3503_v24, %v3489_v38 }
0x165d   : > { %v3515_v43 = vpack.c.bf16 %v3505_v42, %v3504_v41 }
0x165f   : > { %6804 = vmatmul.mubr.msk.bf16.vlgmr.msra.gmra.mrb[36].mxu1 %vm1035_vm9, %v3515_v43 }
0x1660   : > { %6827 = vmatprep.mubr.msk.bf16.mxu1 %vm7368_vm1, %v9243_v2  ;;  %6820 = vmatpush3.bf16.msra.mxu1 %v7171_v12 }
0x1661   : > { %6821 = vmatprep.subr.bf16.mxu1 %v9243_v2 }
0x1664   : > { %6822 = vmatpush3.bf16.msra.mxu1 %v7172_v13 }
0x1665   : > { %6823 = vmatprep.subr.bf16.mxu1 %v9243_v2 }
0x1668   : > { %6824 = vmatpush3.bf16.msra.mxu1 %v7173_v14 }
0x1669   : > { %6825 = vmatprep.subr.bf16.mxu1 %v9243_v2 }
0x166c   : > { %6826 = vmatpush3.bf16.msra.mxu1 %v7174_v15 }
0x166d   : > { %6843 = vmatprep.subr.bf16.mxu1 %v9243_v2 }
0x1732   : > { %v3585_v50 = vpop.f32.mrb[36].mxu1 }
0x1733   : > { %v3586_v51 = vadd.f32 %v6291_v49, %v3585_v50  ;;  %v6805_v58 = vpop.f32.mrb[37].mxu1 }
0x1734   : > { %v3588_v59 = vpop.f32.mrb[38].mxu1  ;;  %v7177_v58 = vld [vmem:[%s9277_s1 + $0x10] sm:$0xff]  }
0x1735   : > { %v8469_v40 = vadd.f32 %v3586_v51, %v8409_v36  ;;  %v3589_v61 = vadd.f32 %v6291_v49, %v3588_v59  ;;  %v6806_v62 = vpop.f32.mrb[39].mxu1  ;;  %v7178_v59 = vld [vmem:[%s9277_s1 + $0x18] sm:$0xff]  }
0x1736   : > { %v7180_v62 = vld [vmem:[%s9271_s28 + $0x3e8] sm:$0xff]  }
0x1737   : > { %v3596_v31 = vmul.f32 0.044715, %v8469_v40  ;;  %v8473_v63 = vadd.f32 %v3589_v61, %v8413_v54  ;;  %v3594_v57 = vmul.f32 0.5, %v8469_v40  ;;  %v7179_v61 = vld [vmem:[%s9271_s28 + $0x3e0] sm:$0xff]  }
0x1739   : > { %v3598_v56 = vmul.f32 %v3596_v31, %v8469_v40  ;;  %v3597_v52 = vmul.f32 0.044715, %v8473_v63  ;;  %v3595_v7 = vmul.f32 0.5, %v8473_v63  ;;  %v7181_v31 = vld [vmem:[%s9271_s28 + $0x3f0] sm:$0xff]  }
0x173b   : > { %v3600_v45 = vmul.f32 %v3598_v56, %v8469_v40  ;;  %v3599_v0 = vmul.f32 %v3597_v52, %v8473_v63  ;;  %v7182_v56 = vld [vmem:[%s9271_s28 + $0x3f8] sm:$0xff]   ;;  %v6321_v52 = vld [vmem:[%s9275_s9 + $0x9] ss:$0 sm:$0xff] }
0x173d   : > { %v3601_v3 = vmul.f32 %v3599_v0, %v8473_v63  ;;  %v3602_v36 = vadd.f32 %v3600_v45, %v8469_v40 }
0x173f   : > { %v3603_v60 = vadd.f32 %v3601_v3, %v8473_v63  ;;  %v3604_v53 = vmul.f32 0.7978846, %v3602_v36 }
0x1741   : > { %v3605_v4 = vmul.f32 0.7978846, %v3603_v60  ;;  %7341 = vtanh.f32 %v3604_v53 }
0x1743   : > { %7343 = vtanh.f32 %v3605_v4 }
0x174b   : > { %v7342_v54 = vpop.eup %7341 }
0x174c   : > { %v3608_v55 = vadd.f32 1.0, %v7342_v54 }
0x174d   : > { %v7344_v6 = vpop.eup %7343 }
0x174e   : > { %v3609_v8 = vadd.f32 1.0, %v7344_v6  ;;  %v3610_v9 = vmul.f32 %v3608_v55, %v3594_v57 }
0x1750   : > { %v3611_v10 = vmul.f32 %v3609_v8, %v3595_v7 }
0x1752   : > { %v3621_v11 = vpack.c.bf16 %v3611_v10, %v3610_v9 }
0x1754   : > { %6816 = vmatmul.mubr.msk.bf16.vlgmr.msra.gmra.mrb[40].mxu0 %vm1035_vm9, %v3621_v11 }
0x1755   : > { %6839 = vmatprep.mubr.msk.bf16.mxu0 %vm7368_vm1, %v9243_v2  ;;  %6832 = vmatpush3.bf16.msra.mxu0 %v7175_v18 }
0x1756   : > { %6833 = vmatprep.subr.bf16.mxu0 %v9243_v2 }
0x1759   : > { %6834 = vmatpush3.bf16.msra.mxu0 %v7176_v19 }
0x175a   : > { %6835 = vmatprep.subr.bf16.mxu0 %v9243_v2 }
0x175d   : > { %6836 = vmatpush3.bf16.msra.mxu0 %v7177_v58 }
0x175e   : > { %6837 = vmatprep.subr.bf16.mxu0 %v9243_v2 }
0x1761   : > { %6838 = vmatpush3.bf16.msra.mxu0 %v7178_v59 }
0x1762   : > { %6855 = vmatprep.subr.bf16.mxu0 %v9243_v2 }
0x1827   : > { %v3691_v22 = vpop.f32.mrb[40].mxu0 }
0x1828   : > { %v3692_v23 = vadd.f32 %v6306_v20, %v3691_v22  ;;  %v6817_v25 = vpop.f32.mrb[41].mxu0 }
0x1829   : > { %v3694_v26 = vpop.f32.mrb[42].mxu0 }
0x182a   : > { %v3700_v28 = vmul.f32 0.044715, %v3692_v23  ;;  %v3695_v32 = vadd.f32 %v6306_v20, %v3694_v26  ;;  %v6818_v33 = vpop.f32.mrb[43].mxu0  ;;  %v3698_v34 = vmul.f32 0.5, %v3692_v23  ;;  %v7183_v26 = vld [vmem:[%s9273_s8 + $0x3e0] sm:$0xff]  }
0x182b   : > { %v7186_v33 = vld [vmem:[%s9273_s8 + $0x3f8] sm:$0xff]  }
0x182c   : > { %v3702_v21 = vmul.f32 %v3700_v28, %v3692_v23  ;;  %v3701_v35 = vmul.f32 0.044715, %v3695_v32  ;;  %v3699_v46 = vmul.f32 0.5, %v3695_v32  ;;  %v7184_v28 = vld [vmem:[%s9273_s8 + $0x3e8] sm:$0xff]  }
0x182e   : > { %v3704_v48 = vmul.f32 %v3702_v21, %v3692_v23  ;;  %v3703_v17 = vmul.f32 %v3701_v35, %v3695_v32  ;;  %v6342_v21 = vld [vmem:[%s9274_s3 + $0xa] ss:$0 sm:$0xff]  ;;  %s7374_s3 = smov 96  }
0x1830   : > { %v3706_v37 = vadd.f32 %v3704_v48, %v3692_v23  ;;  %v3705_v16 = vmul.f32 %v3703_v17, %v3695_v32 }
0x1832   : > { %v3708_v38 = vmul.f32 0.7978846, %v3706_v37  ;;  %v3707_v24 = vadd.f32 %v3705_v16, %v3695_v32  ;;  %v7185_v32 = vld [vmem:[%s9273_s8 + $0x3f0] sm:$0xff]  }
0x1834   : > { %7345 = vtanh.f32 %v3708_v38  ;;  %v3709_v41 = vmul.f32 0.7978846, %v3707_v24 }
0x1836   : > { %7347 = vtanh.f32 %v3709_v41 }
0x183e   : > { %v7346_v42 = vpop.eup %7345 }
0x183f   : > { %v3712_v43 = vadd.f32 1.0, %v7346_v42 }
0x1840   : > { %v7348_v44 = vpop.eup %7347 }
0x1841   : > { %v3713_v47 = vadd.f32 1.0, %v7348_v44  ;;  %v3714_v49 = vmul.f32 %v3712_v43, %v3698_v34 }
0x1843   : > { %v3715_v50 = vmul.f32 %v3713_v47, %v3699_v46 }
0x1845   : > { %v3725_v51 = vpack.c.bf16 %v3715_v50, %v3714_v49 }
0x1847   : > { %6828 = vmatmul.mubr.msk.bf16.vlgmr.msra.gmra.mrb[40].mxu1 %vm1035_vm9, %v3725_v51 }
0x1848   : > { %6851 = vmatprep.mubr.msk.bf16.mxu1 %vm7368_vm1, %v9243_v2  ;;  %6844 = vmatpush3.bf16.msra.mxu1 %v7179_v61 }
0x1849   : > { %6845 = vmatprep.subr.bf16.mxu1 %v9243_v2 }
0x184c   : > { %6846 = vmatpush3.bf16.msra.mxu1 %v7180_v62 }
0x184d   : > { %6847 = vmatprep.subr.bf16.mxu1 %v9243_v2 }
0x1850   : > { %6848 = vmatpush3.bf16.msra.mxu1 %v7181_v31 }
0x1851   : > { %6849 = vmatprep.subr.bf16.mxu1 %v9243_v2 }
0x1854   : > { %6850 = vmatpush3.bf16.msra.mxu1 %v7182_v56 }
0x191a   : > { %v3795_v45 = vpop.f32.mrb[40].mxu1 }
0x191b   : > { %v3796_v0 = vadd.f32 %v6321_v52, %v3795_v45  ;;  %v6829_v3 = vpop.f32.mrb[41].mxu1 }
0x191c   : > { %v3798_v36 = vpop.f32.mrb[42].mxu1  ;;  %v7188_v3 = vld [vmem:[%s9216_s11] sm:$0xff]  }
0x191d   : > { %v3802_v60 = vadd.f32 %v3796_v0, %v8469_v40  ;;  %v3799_v53 = vadd.f32 %v6321_v52, %v3798_v36  ;;  %v6830_v4 = vpop.f32.mrb[43].mxu1  ;;  %v7187_v0 = vld [vmem:[%s9216_s11 + $0x40] sm:$0xff]   ;;  %v7189_v36 = vld [vmem:[%s9216_s11 + $0x48] sm:$0xff]  }
0x191e   : > { %6534 = vmatprep.subr.bf16.mxu1 %v7187_v0  ;;  %v7196_v4 = vld [vmem:[%s9216_s11 + $0x80] sm:$0xff]  }
0x191f   : > { %v3890_v54 = vmul.f32 0.044715, %v3802_v60  ;;  %v3803_v55 = vadd.f32 %v3799_v53, %v8473_v63  ;;  %v3888_v18 = vmul.f32 0.5, %v3802_v60  ;;  %v7190_v53 = vld [vmem:[%s9216_s11 + $0x8] sm:$0xff]  }
0x1921   : > { %v3892_v6 = vmul.f32 %v3890_v54, %v3802_v60  ;;  %v3891_v57 = vmul.f32 0.044715, %v3803_v55  ;;  %v3812_v7 = vpack.c.bf16 %v3803_v55, %v3802_v60  ;;  %v3889_v19 = vmul.f32 0.5, %v3803_v55  ;;  %v7198_v54 = vld [vmem:[%s9216_s11 + $0xc8] sm:$0xff]  }
0x1923   : > { %v3894_v8 = vmul.f32 %v3892_v6, %v3802_v60  ;;  %v3893_v9 = vmul.f32 %v3891_v57, %v3803_v55  ;;  %6840 = vmatmul.mubr.msk.bf16.vlgmr.msra.gmra.mrb[44].mxu0 %vm1035_vm9, %v3812_v7  ;;  %v7200_v6 = vld [vmem:[%s9216_s11 + $0x88] sm:$0xff]   ;;  %v7192_v57 = vld [vmem:[%s9216_s11 + $0x10] sm:$0xff]   ;;  %v7193_v7 = vld [vmem:[%s9216_s11 + $0x58] sm:$0xff]  }
0x1924   : > { %6863 = vmatprep.mubr.msk.bf16.mxu0 %vm7368_vm1, %v9243_v2  ;;  %6856 = vmatpush3.bf16.msra.mxu0 %v7183_v26 }
0x1925   : > { %v3895_v10 = vmul.f32 %v3893_v9, %v3803_v55  ;;  %v3896_v11 = vadd.f32 %v3894_v8, %v3802_v60  ;;  %6857 = vmatprep.subr.bf16.mxu0 %v9243_v2  ;;  %v7194_v60 = vld [vmem:[%s9216_s11 + $0xc0] sm:$0xff]   ;;  %v7195_v8 = vld [vmem:[%s9216_s11 + $0x18] sm:$0xff]  }
0x1926   : > { %v7197_v9 = vld [vmem:[%s9216_s11 + $0x60] sm:$0xff]  }
0x1927   : > { %v3897_v12 = vadd.f32 %v3895_v10, %v3803_v55  ;;  %v3898_v13 = vmul.f32 0.7978846, %v3896_v11  ;;  %v7191_v55 = vld [vmem:[%s9216_s11 + $0x50] sm:$0xff]   ;;  %v7199_v10 = vld [vmem:[%s9216_s11 + $0x20] sm:$0xff]  }
0x1928   : > { %6858 = vmatpush3.bf16.msra.mxu0 %v7184_v28  ;;  %v6327_v11 = vld [vmem:[%s9215_s10] ss:$0 sm:$0xff] }
0x1929   : > { %v3899_v40 = vmul.f32 0.7978846, %v3897_v12  ;;  %7349 = vtanh.f32 %v3898_v13  ;;  %6859 = vmatprep.subr.bf16.mxu0 %v9243_v2  ;;  %v6357_v12 = vld [vmem:[%s9275_s9 + $0xa] ss:$0 sm:$0xff]  ;;  %v4138_v13 = vadd.s32 4294967291, %v7515_v1 }
0x192b   : > { %7351 = vtanh.f32 %v3899_v40  ;;  %v4154_v40 = vadd.s32 4294967290, %v7515_v1  ;;  %vm4140_vm6 = vcmp.ge.s32.totalorder %v4138_v13, 0 }
0x192c   : > { %6860 = vmatpush3.bf16.msra.mxu0 %v7185_v32  ;;  %v4146_v26 = vsel %vm4140_vm6, 1.0, %v9243_v2  ;;  %v4115_v32 = vadd.s32 4294967293, %v7515_v1 }
0x192d   : > { %6861 = vmatprep.subr.bf16.mxu0 %v9243_v2  ;;  %vm4156_vm8 = vcmp.ge.s32.totalorder %v4154_v40, 0 }
0x192e   : > { %v4162_v28 = vsel %vm4156_vm8, 1.0, %v9243_v2  ;;  %vm4117_vm15 = vcmp.ge.s32.totalorder %v4115_v32, 0  ;;  %vm4368_vm8 = vcmask 785408  }
0x1930   : > { %6862 = vmatpush3.bf16.msra.mxu0 %v7186_v33  ;;  %v7204_v33 = vld [vmem:[%s9216_s11 + $0x90] sm:$0xff]  }
0x1931   : > { %6556 = vmatprep.subr.bf16.mxu0 %v7194_v60 }
0x1933   : > { %v7350_v14 = vpop.eup %7349 }
0x1934   : > { %v3902_v15 = vadd.f32 1.0, %v7350_v14  ;;  %v6887_v14 = vadd.f32 %v6357_v12, %v6327_v11  ;;  %v4197_v11 = vadd.s32 4294967286, %v7621_v5  ;;  %v4257_v12 = vadd.s32 4294967281, %v7621_v5 }
0x1935   : > { %v7352_v63 = vpop.eup %7351 }
0x1936   : > { %v3903_v20 = vadd.f32 1.0, %v7352_v63  ;;  %v3904_v22 = vmul.f32 %v3902_v15, %v3888_v18  ;;  %v4170_v15 = vadd.s32 4294967289, %v7515_v1  ;;  %vm4259_vm6 = vcmp.ge.s32.totalorder %v4257_v12, 0 }
0x1938   : > { %v3905_v23 = vmul.f32 %v3903_v20, %v3889_v19  ;;  %v7201_v20 = vld [vmem:[%s9216_s11 + $0x68] sm:$0xff]   ;;  %vm4172_vm11 = vcmp.ge.s32.totalorder %v4170_v15, 0 }
0x193a   : > { %v3915_v25 = vpack.c.bf16 %v3905_v23, %v3904_v22  ;;  %v7202_v22 = vld [vmem:[%s9216_s11 + $0xd0] sm:$0xff]   ;;  %v7203_v23 = vld [vmem:[%s9216_s11 + $0x28] sm:$0xff]  }
0x193c   : > { %6852 = vmatmul.mubr.msk.bf16.vlgmr.msra.gmra.mrb[44].mxu1 %vm1035_vm9, %v3915_v25 }
0x193d   : > { %6535 = vmatpush3.bf16.msra.mxu1 %v7188_v3 }
0x193e   : > { %6536 = vmatprep.subr.bf16.mxu1 %v7189_v36 }
0x1941   : > { %6537 = vmatpush3.bf16.msra.mxu1 %v7190_v53 }
0x1942   : > { %6538 = vmatprep.subr.bf16.mxu1 %v7191_v55  ;;  %v7209_v55 = vld [vmem:[%s9216_s11 + $0x78] sm:$0xff]  }
0x1945   : > { %6539 = vmatpush3.bf16.msra.mxu1 %v7192_v57  ;;  %v7211_v57 = vld [vmem:[%s9216_s11 + $0x38] sm:$0xff]  }
0x1946   : > { %6540 = vmatprep.subr.bf16.mxu1 %v7193_v7 }
0x1949   : > { %6541 = vmatpush3.bf16.msra.mxu1 %v7195_v8  ;;  %v4123_v8 = vsel %vm4117_vm15, 1.0, %v9243_v2 }
0x194a   : > { %6542 = vmatprep.subr.bf16.mxu1 %v7197_v9  ;;  %v7212_v9 = vld [vmem:[%s9216_s11 + $0xa0] sm:$0xff]  }
0x194d   : > { %6543 = vmatpush3.bf16.msra.mxu1 %v7199_v10 }
0x194e   : > { %6544 = vmatprep.subr.bf16.mxu1 %v7201_v20 }
0x1951   : > { %6545 = vmatpush3.bf16.msra.mxu1 %v7203_v23  ;;  %v7217_v23 = vld [vmem:[%s9216_s11 + $0xa8] sm:$0xff]  }
0x1a0f   : > { %v3985_v35 = vpop.f32.mrb[44].mxu1 }
0x1a10   : > { %v3986_v48 = vadd.f32 %v6342_v21, %v3985_v35  ;;  %v6853_v17 = vpop.f32.mrb[45].mxu1 }
0x1a11   : > { %v3988_v37 = vpop.f32.mrb[46].mxu1  ;;  %v8643_v17 = vadd.s32 4294967287, %v7621_v5 }
0x1a12   : > { %v3994_v16 = vmul.f32 0.044715, %v3986_v48  ;;  %v3989_v38 = vadd.f32 %v6342_v21, %v3988_v37  ;;  %v6854_v24 = vpop.f32.mrb[47].mxu1  ;;  %v3992_v61 = vmul.f32 0.5, %v3986_v48 }
0x1a13   : > { %vm4187_vm5 = vcmp.ge.s32.totalorder %v8643_v17, 0 }
0x1a14   : > { %v3996_v41 = vmul.f32 %v3994_v16, %v3986_v48  ;;  %v3995_v42 = vmul.f32 0.044715, %v3989_v38  ;;  %v3993_v62 = vmul.f32 0.5, %v3989_v38 }
0x1a16   : > { %v3998_v43 = vmul.f32 %v3996_v41, %v3986_v48  ;;  %v3997_v44 = vmul.f32 %v3995_v42, %v3989_v38 }
0x1a18   : > { %v4000_v34 = vadd.f32 %v3998_v43, %v3986_v48  ;;  %v3999_v46 = vmul.f32 %v3997_v44, %v3989_v38  ;;  %v8640_v48 = vadd.s32 4294967283, %v7621_v5  ;;  %v7205_v44 = vld [vmem:[%s9216_s11 + $0x70] sm:$0xff]  }
0x1a19   : > { %6546 = vmatprep.subr.bf16.mxu1 %v7205_v44 }
0x1a1a   : > { %v4002_v47 = vmul.f32 0.7978846, %v4000_v34  ;;  %v4001_v49 = vadd.f32 %v3999_v46, %v3989_v38  ;;  %v8649_v38 = vadd.s32 4294967282, %v7621_v5  ;;  %v7206_v34 = vld [vmem:[%s9216_s11 + $0xd8] sm:$0xff]  }
0x1a1c   : > { %7353 = vtanh.f32 %v4002_v47  ;;  %v4003_v50 = vmul.f32 0.7978846, %v4001_v49 }
0x1a1e   : > { %7355 = vtanh.f32 %v4003_v50  ;;  %v7207_v50 = vld [vmem:[%s9216_s11 + $0x30] sm:$0xff]  }
0x1a1f   : > { %6547 = vmatpush3.bf16.msra.mxu1 %v7207_v50 }
0x1a20   : > { %6548 = vmatprep.subr.bf16.mxu1 %v7209_v55 }
0x1a23   : > { %6549 = vmatpush3.bf16.msra.mxu1 %v7211_v57 }
0x1a26   : > { %v7354_v51 = vpop.eup %7353 }
0x1a27   : > { %v4006_v58 = vadd.f32 1.0, %v7354_v51  ;;  %v7208_v51 = vld [vmem:[%s9216_s11 + $0x98] sm:$0xff]  }
0x1a28   : > { %v7356_v59 = vpop.eup %7355 }
0x1a29   : > { %v4007_v31 = vadd.f32 1.0, %v7356_v59  ;;  %v4008_v56 = vmul.f32 %v4006_v58, %v3992_v61 }
0x1a2b   : > { %v4009_v52 = vmul.f32 %v4007_v31, %v3993_v62 }
0x1a2d   : > { %v4019_v45 = vpack.c.bf16 %v4009_v52, %v4008_v56 }
0x1a2f   : > { %6864 = vmatmul.mubr.msk.bf16.vlgmr.msra.gmra.mrb[44].mxu0 %vm1035_vm9, %v4019_v45 }
0x1a30   : > { %6557 = vmatpush3.bf16.msra.mxu0 %v7196_v4 }
0x1a31   : > { %6558 = vmatprep.subr.bf16.mxu0 %v7198_v54  ;;  %v4178_v54 = vsel %vm4172_vm11, 1.0, %v9243_v2  ;;  %vm5583_vm11 = vcmask 1044480  }
0x1a34   : > { %6559 = vmatpush3.bf16.msra.mxu0 %v7200_v6  ;;  %v7210_v6 = vld [vmem:[%s9216_s11 + $0xe0] sm:$0xff]  }
0x1a35   : > { %6560 = vmatprep.subr.bf16.mxu0 %v7202_v22  ;;  %v7216_v22 = vld [vmem:[%s9220_s15 + $0x4] ss:$16 sps:$4 sm:$0xff]  }
0x1a36   : > { %4793 = vmatprep.subr.bf16.mxu1 %v7216_v22 }
0x1a38   : > { %6561 = vmatpush3.bf16.msra.mxu0 %v7204_v33 }
0x1a39   : > { %6562 = vmatprep.subr.bf16.mxu0 %v7206_v34 }
0x1a3c   : > { %6563 = vmatpush3.bf16.msra.mxu0 %v7208_v51  ;;  %v7223_v51 = vld [vmem:[%s9216_s11 + $0xf8] sm:$0xff]  }
0x1a3d   : > { %6564 = vmatprep.subr.bf16.mxu0 %v7210_v6 }
0x1a40   : > { %6565 = vmatpush3.bf16.msra.mxu0 %v7212_v9 }
0x1b02   : > { %v4089_v63 = vpop.f32.mrb[44].mxu0 }
0x1b03   : > { %v8619_v18 = vadd.f32 %v6887_v14, %v4089_v63  ;;  %v6865_v19 = vpop.f32.mrb[45].mxu0 }
0x1b04   : > { %v4092_v25 = vpop.f32.mrb[46].mxu0 }
0x1b05   : > { %v8637_v21 = vadd.f32 %v6887_v14, %v4092_v25  ;;  %v6866_v35 = vpop.f32.mrb[47].mxu0  ;;  %v4133_v37 = vrot.slane %v8619_v18, 3  ;;  %v4098_v16 = vrot.slane %v8619_v18, 7  ;;  %v4150_v46 = vrot.slane %v8619_v18, 2  ;;  %v7213_v14 = vld [vmem:[%s9216_s11 + $0xe8] sm:$0xff]  }
0x1b06   : > { %v4104_v47 = vrot.slane %v8619_v18, 6  ;;  %v4166_v49 = vrot.slane %v8619_v18, 1  ;;  %v4110_v45 = vrot.slane %v8619_v18, 5  ;;  %v4193_v25 = vsel %vm4187_vm5, 1.0, %v9243_v2  ;;  %6566 = vmatprep.subr.bf16.mxu0 %v7213_v14 }
0x1b07   : > { %v4134_v24 = vrot.slane %v8637_v21, 3  ;;  %v4099_v41 = vrot.slane %v8637_v21, 7  ;;  %v4151_v42 = vrot.slane %v8637_v21, 2  ;;  %v4105_v43 = vrot.slane %v8637_v21, 6  ;;  %6567 = vmatpush3.bf16.msra.mxu0 %v7217_v23 }
0x1b08   : > { %v4167_v61 = vrot.slane %v8637_v21, 1  ;;  %v4111_v62 = vrot.slane %v8637_v21, 5 }
0x1b09   : > { %v4137_v58 = vsel %vm4135_vm10, %v4134_v24, %v4133_v37  ;;  %v8674_v59 = vsel %vm790_vm3, %v4099_v41, %v4098_v16  ;;  %v8682_v52 = vsel %vm1416_vm12, %v4151_v42, %v4150_v46  ;;  %v4136_v0 = vsel %vm4135_vm10, %v4133_v37, %v4134_v24 }
0x1b0a   : > { %v4148_v31 = vmul.f32 %v4146_v26, %v4137_v58  ;;  %v4102_v56 = vmul.f32 %v8674_v59, %v7646_v29  ;;  %v4100_v3 = vsel %vm790_vm3, %v4098_v16, %v4099_v41  ;;  %v4164_v36 = vmul.f32 %v4162_v28, %v8682_v52  ;;  %v7222_v41 = vld [vmem:[%s9216_s11 + $0xb0] sm:$0xff]  }
0x1b0b   : > { %v8692_v60 = vsel %vm1399_vm13, %v4105_v43, %v4104_v47  ;;  %v8709_v7 = vsel %vm795_vm2, %v4167_v61, %v4166_v49  ;;  %vm4235_vm3 = vcmp.ge.s32.totalorder %v8640_v48, 0  ;;  %v4152_v10 = vsel %vm1416_vm12, %v4150_v46, %v4151_v42  ;;  %v7218_v48 = vld [vmem:[%s9216_s11 + $0xf0] sm:$0xff]  }
0x1b0c   : > { %v6963_v29 = vpack.i.bf16 %v4136_v0, %v4148_v31  ;;  %v6968_v53 = vpack.i.bf16 %v4100_v3, %v4102_v56  ;;  %v4108_v4 = vmul.f32 %v8692_v60, %v7802_v30  ;;  %v8713_v30 = vsel %vm4112_vm14, %v4111_v62, %v4110_v45  ;;  %6568 = vmatprep.subr.bf16.mxu0 %v7218_v48 }
0x1b0d   : > { %v6973_v13 = vpack.i.bf16 %v4152_v10, %v4164_v36  ;;  %v4106_v40 = vsel %vm1399_vm13, %v4104_v47, %v4105_v43  ;;  %v4180_v63 = vmul.f32 %v4178_v54, %v8709_v7  ;;  %v4125_v19 = vmul.f32 %v4123_v8, %v8713_v30  ;;  %6569 = vmatpush3.bf16.msra.mxu0 %v7222_v41 }
0x1b0e   : > { %6964 = vrot.lane.b32.xlu0 %v6963_v29, %s7373_s29  ;;  %6969 = vrot.lane.b32.xlu1 %v6968_v53, %s7373_s29  ;;  %v6978_v15 = vpack.i.bf16 %v4106_v40, %v4108_v4  ;;  %v4241_v20 = vsel %vm4235_vm3, 1.0, %v9243_v2  ;;  %vm4247_vm12 = vcmp.ge.s32.totalorder %v8649_v38, 0  ;;  %vm4199_vm13 = vcmp.ge.s32.totalorder %v4197_v11, 0 }
0x1b0f   : > { %v4209_v26 = vadd.s32 4294967285, %v7621_v5  ;;  %v4168_v28 = vsel %vm795_vm2, %v4166_v49, %v4167_v61  ;;  %v4113_v32 = vsel %vm4112_vm14, %v4110_v45, %v4111_v62  ;;  %v4242_v33 = vmul.f32 0.0, %v4136_v0  ;;  %6570 = vmatprep.subr.bf16.mxu0 %v7223_v51  ;;  %v7219_v51 = vld [vmem:[%s9220_s15 + $0x20] ss:$16 sps:$4 sm:$0xff]  }
0x1b10   : > { %v4243_v35 = vmul.f32 %v4241_v20, %v4137_v58  ;;  %v6983_v17 = vpack.i.bf16 %v4168_v28, %v4180_v63  ;;  %v6988_v37 = vpack.i.bf16 %v4113_v32, %v4125_v19  ;;  %v4194_v16 = vmul.f32 0.0, %v4100_v3 }
0x1b11   : > { %v4195_v24 = vmul.f32 %v4193_v25, %v8674_v59  ;;  %v4253_v42 = vsel %vm4247_vm12, 1.0, %v9243_v2  ;;  %v4205_v43 = vsel %vm4199_vm13, 1.0, %v9243_v2  ;;  %vm4211_vm2 = vcmp.ge.s32.totalorder %v4209_v26, 0  ;;  %v7227_v59 = vld [vmem:[%s9216_s11 + $0xb8] sm:$0xff]  }
0x1b12   : > { %6974 = vrot.lane.b32.xlu0 %v6973_v13, %s9276_s6  ;;  %6979 = vrot.lane.b32.xlu1 %v6978_v15, %s9276_s6  ;;  %v6993_v44 = vpack.i.bf16 %v4243_v35, %v4242_v33  ;;  %v4254_v34 = vmul.f32 0.0, %v4152_v10  ;;  %v4265_v46 = vsel %vm4259_vm6, 1.0, %v9243_v2  ;;  %v4255_v49 = vmul.f32 %v4253_v42, %v8682_v52  ;;  %v7214_v42 = vld [vmem:[%s9220_s15] ss:$16 sps:$4 sm:$0xff]  }
0x1b13   : > { %v6998_v47 = vpack.i.bf16 %v4195_v24, %v4194_v16  ;;  %v4206_v50 = vmul.f32 0.0, %v4106_v40  ;;  %v4207_v38 = vmul.f32 %v4205_v43, %v8692_v60  ;;  %v4217_v58 = vsel %vm4211_vm2, 1.0, %v9243_v2  ;;  %6571 = vmatpush3.bf16.msra.mxu0 %v7227_v59  ;;  %v7221_v43 = vld [vmem:[%s9220_s15 + $0x24] ss:$16 sps:$4 sm:$0xff]  }
0x1b14   : > { %v4266_v61 = vmul.f32 0.0, %v4168_v28  ;;  %v4267_v62 = vmul.f32 %v4265_v46, %v8709_v7  ;;  %v7003_v31 = vpack.i.bf16 %v4255_v49, %v4254_v34  ;;  %v4218_v52 = vmul.f32 0.0, %v4113_v32 }
0x1b15   : > { %v7008_v56 = vpack.i.bf16 %v4207_v38, %v4206_v50  ;;  %v4219_v45 = vmul.f32 %v4217_v58, %v8713_v30  ;;  %v4128_v36 = vrot.slane %v8637_v21, 4  ;;  %v4127_v60 = vrot.slane %v8619_v18, 4 }
0x1b16   : > { %6984 = vrot.lane.b32.xlu0 %v6983_v17, %s7374_s3  ;;  %6989 = vrot.lane.b32.xlu1 %v6988_v37, %s7374_s3  ;;  %v7013_v0 = vpack.i.bf16 %v4267_v62, %v4266_v61  ;;  %v4221_v54 = vadd.s32 4294967284, %v7621_v5  ;;  %v4182_v61 = vmul.f32 0.0, %v8637_v21  ;;  %v7226_v62 = vld [vmem:[%s9220_s15 + $0xc] ss:$16 sps:$4 sm:$0xff]   ;;  %vm5578_vm14 = vcmask 72704  }
0x1b17   : > { %v7018_v3 = vpack.i.bf16 %v4219_v45, %v4218_v52  ;;  %v4130_v4 = vsel %vm1805_vm0, %v4128_v36, %v4127_v60  ;;  %v4129_v40 = vsel %vm1805_vm0, %v4127_v60, %v4128_v36  ;;  %vm5582_vm0 = vcmask 1043456  }
0x1b18   : > { %v4131_v9 = vmul.f32 %v4130_v4, %v7953_v27  ;;  %vm4223_vm10 = vcmp.ge.s32.totalorder %v4221_v54, 0  ;;  %v4230_v58 = vmul.f32 0.0, %v4129_v40  ;;  %v7224_v54 = vld [vmem:[%s9220_s15 + $0x8] ss:$16 sps:$4 sm:$0xff]  }
0x1b1a   : > { %6994 = vrot.lane.b32.xlu0 %v6993_v44, %s7373_s29  ;;  %6999 = vrot.lane.b32.xlu1 %v6998_v47, %s7373_s29  ;;  %v4229_v44 = vsel %vm4223_vm10, 1.0, %v9243_v2 }
0x1b1b   : > { %v4231_v59 = vmul.f32 %v4229_v44, %v4130_v4 }
0x1b1e   : > { %7004 = vrot.lane.b32.xlu0 %v7003_v31, %s9276_s6  ;;  %7009 = vrot.lane.b32.xlu1 %v7008_v56, %s9276_s6 }
0x1b22   : > { %7014 = vrot.lane.b32.xlu0 %v7013_v0, %s7374_s3  ;;  %7019 = vrot.lane.b32.xlu1 %v7018_v3, %s7374_s3  ;;  %v4749_v0 = vpack.c.bf16 %v8637_v21, %v8619_v18 }
0x1b80   : > { %v6965_v29 = vpop.permute.xlu0 %6964  ;;  %v6970_v53 = vpop.permute.xlu1 %6969 }
0x1b81   : > { %v6967_v55 = vunpack.i.h.bf16 %v6965_v29  ;;  %v6966_v6 = vunpack.i.l.bf16 %v6965_v29  ;;  %v6972_v57 = vunpack.i.h.bf16 %v6970_v53  ;;  %v6971_v7 = vunpack.i.l.bf16 %v6970_v53 }
0x1b83   : > { %v4371_v14 = vsel %vm908_vm7, %v4131_v9, %v6966_v6  ;;  %v4372_v5 = vsel %vm908_vm7, %v4129_v40, %v6967_v55  ;;  %v4365_v15 = vsel %vm908_vm7, %v8637_v21, %v6972_v57  ;;  %v4364_v63 = vsel %vm908_vm7, %v8619_v18, %v6971_v7  ;;  %v7230_v7 = vld [vmem:[%s9220_s15 + $0x2c] ss:$16 sps:$4 sm:$0xff]  }
0x1b84   : > { %v6975_v30 = vpop.permute.xlu0 %6974  ;;  %v6980_v8 = vpop.permute.xlu1 %6979 }
0x1b85   : > { %v6977_v10 = vunpack.i.h.bf16 %v6975_v30  ;;  %v6976_v11 = vunpack.i.l.bf16 %v6975_v30  ;;  %v6982_v12 = vunpack.i.h.bf16 %v6980_v8  ;;  %v6981_v13 = vunpack.i.l.bf16 %v6980_v8 }
0x1b87   : > { %v4373_v1 = vsel %vm1035_vm9, %v4371_v14, %v6976_v11  ;;  %v4374_v26 = vsel %vm1035_vm9, %v4372_v5, %v6977_v10  ;;  %v4366_v28 = vsel %vm1035_vm9, %v4364_v63, %v6981_v13  ;;  %v4367_v32 = vsel %vm1035_vm9, %v4365_v15, %v6982_v12  ;;  %v7228_v5 = vld [vmem:[%s9220_s15 + $0x28] ss:$16 sps:$4 sm:$0xff]  }
0x1b88   : > { %v6985_v27 = vpop.permute.xlu0 %6984  ;;  %v6990_v19 = vpop.permute.xlu1 %6989 }
0x1b89   : > { %v6987_v20 = vunpack.i.h.bf16 %v6985_v27  ;;  %v6986_v22 = vunpack.i.l.bf16 %v6985_v27  ;;  %v6992_v23 = vunpack.i.h.bf16 %v6990_v19  ;;  %v6991_v25 = vunpack.i.l.bf16 %v6990_v19 }
0x1b8b   : > { %v4369_v33 = vsel %vm4368_vm8, %v4366_v28, %v6991_v25  ;;  %v4370_v35 = vsel %vm4368_vm8, %v4367_v32, %v6992_v23  ;;  %v4375_v48 = vsel %vm4368_vm8, %v4373_v1, %v6986_v22  ;;  %v4376_v17 = vsel %vm4368_vm8, %v4374_v26, %v6987_v20  ;;  %v6363_v26 = vld [vmem:[%s9217_s12] ss:$0 sm:$0xff] }
0x1b8c   : > { %v4453_v37 = vpack.c.bf16 %v4370_v35, %v4369_v33  ;;  %v6995_v16 = vpop.permute.xlu0 %6994  ;;  %v7000_v24 = vpop.permute.xlu1 %6999  ;;  %v4454_v41 = vpack.c.bf16 %v4376_v17, %v4375_v48 }
0x1b8d   : > { %v6997_v34 = vunpack.i.h.bf16 %v6995_v16  ;;  %v6996_v46 = vunpack.i.l.bf16 %v6995_v16  ;;  %v7002_v47 = vunpack.i.h.bf16 %v7000_v24  ;;  %v7001_v49 = vunpack.i.l.bf16 %v7000_v24  ;;  %v7231_v24 = vld [vmem:[%s9218_s13] sm:$0x1f]  }
0x1b8e   : > { %4688 = vmatprep.mubr.bf16.mxu1 %v4454_v41 }
0x1b8f   : > { %4689 = vmatmul.mubr.bf16.vlgmr.msra.gmra.mrb[48].mxu1 %v4453_v37  ;;  %v4383_v3 = vsel %vm908_vm7, %v4230_v58, %v6996_v46  ;;  %v4384_v36 = vsel %vm908_vm7, %v4231_v59, %v6997_v34  ;;  %v4378_v60 = vsel %vm908_vm7, %v8619_v18, %v7002_v47  ;;  %v4377_v29 = vsel %vm908_vm7, %v4182_v61, %v7001_v49  ;;  %v8866_v46 = vld [vmem:[%s9223_s18 + $0x40] sm:$0xff]  }
0x1b90   : > { %v7005_v50 = vpop.permute.xlu0 %7004  ;;  %4794 = vmatpush1.bf16.msra.mxu1 %v7214_v42  ;;  %v7010_v38 = vpop.permute.xlu1 %7009  ;;  %4825 = vmatprep.mubr.bf16.mxu1 %v7371_v39  ;;  %v7232_v59 = vld [vmem:[%s9219_s14] sm:$0x1f]  }
0x1b91   : > { %4795 = vmatprep.subr.bf16.mxu1 %v7221_v43  ;;  %v7007_v31 = vunpack.i.h.bf16 %v7005_v50  ;;  %v7006_v56 = vunpack.i.l.bf16 %v7005_v50  ;;  %v7012_v52 = vunpack.i.h.bf16 %v7010_v38  ;;  %v7011_v45 = vunpack.i.l.bf16 %v7010_v38  ;;  %v8883_v61 = vld [vmem:[%s9223_s18] sm:$0xff]  }
0x1b93   : > { %v4385_v18 = vsel %vm1035_vm9, %v4383_v3, %v7006_v56  ;;  %v4386_v30 = vsel %vm1035_vm9, %v4384_v36, %v7007_v31  ;;  %v4379_v8 = vsel %vm1035_vm9, %v4377_v29, %v7011_v45  ;;  %v4380_v9 = vsel %vm1035_vm9, %v4378_v60, %v7012_v52  ;;  %v8893_v31 = vld [vmem:[%s9223_s18 + $0x48] sm:$0xff]   ;;  %v8909_v52 = vld [vmem:[%s9223_s18 + $0x50] sm:$0xff]   ;;  %v8931_v3 = vld [vmem:[%s9223_s18 + $0x58] sm:$0xff]  }
0x1b94   : > { %v7015_v53 = vpop.permute.xlu0 %7014  ;;  %4796 = vmatpush1.bf16.msra.mxu1 %v7219_v51  ;;  %v7020_v4 = vpop.permute.xlu1 %7019  ;;  %vm4738_vm9 = vcmask 130048   ;;  %v8902_v56 = vld [vmem:[%s9223_s18 + $0x8] sm:$0xff]   ;;  %v8920_v45 = vld [vmem:[%s9223_s18 + $0x10] sm:$0xff]   ;;  %v8945_v60 = vld [vmem:[%s9223_s18 + $0x18] sm:$0xff]  }
0x1b95   : > { %v7017_v55 = vunpack.i.h.bf16 %v7015_v53  ;;  %v7016_v6 = vunpack.i.l.bf16 %v7015_v53  ;;  %v7022_v57 = vunpack.i.h.bf16 %v7020_v4  ;;  %v7021_v21 = vunpack.i.l.bf16 %v7020_v4  ;;  %4836 = vmatprep.subr.bf16.mxu1 %v7226_v62  ;;  %v8888_v62 = vld [vmem:[%s9223_s18 + $0xc0] sm:$0xff]   ;;  %v8938_v36 = vld [vmem:[%s9223_s18 + $0x88] sm:$0xff]   ;;  %v8950_v29 = vld [vmem:[%s9223_s18 + $0xd0] sm:$0xff]  }
0x1b96   : > { %v8956_v53 = vld [vmem:[%s9223_s18 + $0x60] sm:$0xff]   ;;  %v8962_v4 = vld [vmem:[%s9223_s18 + $0x90] sm:$0xff]  }
0x1b97   : > { %v4381_v10 = vsel %vm4368_vm8, %v4379_v8, %v7021_v21  ;;  %v4382_v11 = vsel %vm4368_vm8, %v4380_v9, %v7022_v57  ;;  %6404 = vmatmul.mubr.msk.bf16.vlgmr.msra.gmra.mrb[52].mxu1 %vm908_vm7, %v4749_v0  ;;  %v4387_v12 = vsel %vm4368_vm8, %v4385_v18, %v7016_v6  ;;  %v4388_v13 = vsel %vm4368_vm8, %v4386_v30, %v7017_v55  ;;  %v8977_v55 = vld [vmem:[%s9223_s18 + $0x68] sm:$0xff]   ;;  %v8982_v6 = vld [vmem:[%s9223_s18 + $0xd8] sm:$0xff]   ;;  %v9006_v18 = vld [vmem:[%s9223_s18 + $0xe0] sm:$0xff]  }
0x1b98   : > { %v4455_v40 = vpack.c.bf16 %v4382_v11, %v4381_v10  ;;  %4837 = vmatpush1.bf16.msra.mxu1 %v7224_v54  ;;  %v4456_v14 = vpack.c.bf16 %v4388_v13, %v4387_v12  ;;  %4868 = vmatprep.mubr.bf16.mxu1 %v7371_v39  ;;  %v8969_v54 = vld [vmem:[%s9223_s18 + $0x20] sm:$0xff]   ;;  %v8987_v57 = vld [vmem:[%s9223_s18 + $0x28] sm:$0xff]   ;;  %v8992_v21 = vld [vmem:[%s9223_s18 + $0x98] sm:$0xff]  }
0x1b99   : > { %4838 = vmatprep.subr.bf16.mxu1 %v7230_v7  ;;  %v9001_v7 = vld [vmem:[%s9223_s18 + $0x70] sm:$0xff]   ;;  %v9016_v8 = vld [vmem:[%s9223_s18 + $0xa0] sm:$0xff]   ;;  %v9023_v9 = vld [vmem:[%s9223_s18 + $0x78] sm:$0xff]  }
0x1b9a   : > { %4729 = vmatprep.mubr.bf16.mxu0 %v4456_v14  ;;  %v9011_v30 = vld [vmem:[%s9223_s18 + $0x30] sm:$0xff]   ;;  %9280 = vst [vmem:[#allocation5_spill] sm:$0xff] %v9023_v9  ;;  %v9028_v10 = vld [vmem:[%s9223_s18 + $0xe8] sm:$0xff]   ;;  %v9035_v11 = vld [vmem:[%s9223_s18 + $0x38] sm:$0xff]  }
0x1b9b   : > { %4730 = vmatmul.mubr.bf16.vlgmr.msra.gmra.mrb[48].mxu0 %v4455_v40  ;;  %9281 = vst [vmem:[#allocation6_spill] sm:$0xff] %v9028_v10  ;;  %9282 = vst [vmem:[#allocation7_spill] sm:$0xff] %v9035_v11  ;;  %v9040_v12 = vld [vmem:[%s9223_s18 + $0xa8] sm:$0xff]   ;;  %v9049_v13 = vld [vmem:[%s9223_s18 + $0xf0] sm:$0xff]  }
0x1b9c   : > { %4839 = vmatpush1.bf16.msra.mxu1 %v7228_v5  ;;  %4925 = vmatprep.mubr.bf16.mxu0 %v7371_v39  ;;  %9283 = vst [vmem:[#allocation8_spill] sm:$0xff] %v9040_v12  ;;  %9284 = vst [vmem:[#allocation9_spill] sm:$0xff] %v9049_v13  ;;  %v9054_v40 = vld [vmem:[%s9223_s18 + $0xb0] sm:$0xff]   ;;  %v9060_v14 = vld [vmem:[%s9223_s18 + $0xf8] sm:$0xff]  }
0x1b9d   : > { %9285 = vst [vmem:[#allocation10_spill] sm:$0xff] %v9054_v40  ;;  %9286 = vst [vmem:[#allocation11_spill] sm:$0xff] %v9060_v14  ;;  %v9067_v5 = vld [vmem:[%s9223_s18 + $0xb8] sm:$0xff]  }
0x1b9e   : > { %9287 = vst [vmem:[#allocation12_spill] sm:$0xff] %v9067_v5 }
0x1b9f   : > { %6405 = vmatmul.mubr.msk.bf16.vlgmr.msra.gmra.mrb[56].mxu1 %vm908_vm7, %v4749_v0  ;;  %v8925_v0 = vld [vmem:[%s9223_s18 + $0xc8] sm:$0xff]  }
0x1ba0   : > { %4968 = vmatprep.mubr.bf16.mxu1 %v7371_v39 }
0x1c62   : > { %v6550_v15 = vpop.f32.mrb[48].mxu1 }
0x1c63   : > { %v6551_v63 = vpop.f32.mrb[49].mxu1 }
0x1c64   : > { %v6552_v27 = vadd.f32 %v6551_v63, %v6550_v15  ;;  %v6553_v19 = vpop.f32.mrb[50].mxu1 }
0x1c65   : > { %v6554_v20 = vpop.f32.mrb[51].mxu1 }
0x1c66   : > { %v6555_v22 = vadd.f32 %v6554_v20, %v6553_v19  ;;  %v4691_v17 = vadd.f32 %v6552_v27, %v6363_v26  ;;  %v5075_v20 = vld [vmem:[%s9221_s16] sm:$0xff] }
0x1c68   : > { %v4694_v42 = vadd.f32 %v6555_v22, %v6363_v26  ;;  %v5083_v22 = vld [vmem:[%s9222_s17] sm:$0xff] }
0x1c6a   : > { %v4827_v23 = vpop.f32.mrb[52].mxu1 }
0x1c6b   : > { %v4829_v25 = vpop.f32.mrb[53].mxu1 }
0x1c6c   : > { %v4831_v1 = vpop.f32.mrb[54].mxu1 }
0x1c6d   : > { %v4881_v28 = vpack.c.bf16 %v4831_v1, %v4827_v23  ;;  %v4833_v32 = vpop.f32.mrb[55].mxu1  ;;  %v5076_v23 = vld [vmem:[%s9221_s16 + $0x8] sm:$0xff] }
0x1c6e   : > { %v4882_v33 = vpack.c.bf16 %v4833_v32, %v4829_v25  ;;  %v6572_v35 = vpop.f32.mrb[48].mxu0  ;;  %v5084_v25 = vld [vmem:[%s9222_s17 + $0x8] sm:$0xff] }
0x1c6f   : > { %v6573_v48 = vpop.f32.mrb[49].mxu0 }
0x1c70   : > { %v6574_v37 = vadd.f32 %v6573_v48, %v6572_v35  ;;  %v6575_v16 = vpop.f32.mrb[50].mxu0  ;;  %4893 = vmatprep.subr.bf16.mxu0 %v4882_v33  ;;  %v5087_v35 = vld [vmem:[%s9222_s17 + $0x20] sm:$0x1] }
0x1c71   : > { %v6576_v41 = vpop.f32.mrb[51].mxu0  ;;  %4894 = vmatpush1.bf16.msra.mxu0 %v4881_v28 }
0x1c72   : > { %v8861_v43 = vadd.f32 %v6574_v37, %v4691_v17  ;;  %v6577_v44 = vadd.f32 %v6576_v41, %v6575_v16  ;;  %v4870_v34 = vpop.f32.mrb[56].mxu1  ;;  %4989 = vmatprep.subr.bf16.mxu0 %v4882_v33  ;;  %v5079_v33 = vld [vmem:[%s9221_s16 + $0x20] sm:$0x1] }
0x1c73   : > { %v4872_v47 = vpop.f32.mrb[57].mxu1 }
0x1c74   : > { %9278 = vst [vmem:[#allocation3_spill] sm:$0xff] %v8861_v43  ;;  %4739 = vst.msk [vmem:[%s774_s30] sm:$0xff] %vm4738_vm9, %v8861_v43  ;;  %v8870_v49 = vadd.f32 %v6577_v44, %v4694_v42  ;;  %v4874_v50 = vpop.f32.mrb[58].mxu1  ;;  %6407 = vmatmul.mubr.msk.bf16.vlgmr.msra.gmra.mrb[52].mxu0 %vm4738_vm9, %v7231_v24  ;;  %v5080_v42 = vld [vmem:[%s9221_s16 + $0x28] sm:$0x1] }
0x1c75   : > { %v4883_v38 = vpack.c.bf16 %v4874_v50, %v4870_v34  ;;  %v4876_v51 = vpop.f32.mrb[59].mxu1  ;;  %4990 = vmatpush1.bf16.msra.mxu0 %v4881_v28  ;;  %5021 = vmatprep.mubr.bf16.mxu0 %v7371_v39  ;;  %v5088_v44 = vld [vmem:[%s9222_s17 + $0x28] sm:$0x1] }
0x1c76   : > { %9279 = vst [vmem:[#allocation4_spill] sm:$0xff] %v8870_v49  ;;  %4740 = vst.msk [vmem:[%s774_s30 + $0x8] sm:$0xff] %vm4738_vm9, %v8870_v49  ;;  %v4884_v58 = vpack.c.bf16 %v4876_v51, %v4872_v47  ;;  %6578 = vmatprep.subr.bf16.mxu0 %v8866_v46 }
0x1c78   : > { %4936 = vmatprep.subr.bf16.mxu1 %v4884_v58 }
0x1c79   : > { %4937 = vmatpush1.bf16.msra.mxu1 %v4883_v38 }
0x1c7a   : > { %5032 = vmatprep.subr.bf16.mxu1 %v4884_v58  ;;  %v5077_v58 = vld [vmem:[%s9221_s16 + $0x10] sm:$0xff] }
0x1c7c   : > { %6408 = vmatmul.mubr.msk.bf16.vlgmr.msra.gmra.mrb[60].mxu1 %vm4738_vm9, %v7231_v24  ;;  %6410 = vmatmul.mubr.msk.bf16.vlgmr.msra.gmra.mrb[56].mxu0 %vm4738_vm9, %v7232_v59 }
0x1c7d   : > { %5033 = vmatpush1.bf16.msra.mxu1 %v4883_v38  ;;  %5064 = vmatprep.mubr.bf16.mxu1 %v7371_v39  ;;  %v8914_v39 = vld [vmem:[%s9223_s18 + $0x80] sm:$0xff]  }
0x1c7e   : > { %6579 = vmatpush3.bf16.msra.mxu0 %v8883_v61  ;;  %6600 = vmatprep.subr.bf16.mxu1 %v8888_v62 }
0x1c7f   : > { %6580 = vmatprep.subr.bf16.mxu0 %v8893_v31 }
0x1c82   : > { %6581 = vmatpush3.bf16.msra.mxu0 %v8902_v56 }
0x1c83   : > { %6582 = vmatprep.subr.bf16.mxu0 %v8909_v52 }
0x1c84   : > { %6411 = vmatmul.mubr.msk.bf16.vlgmr.msra.gmra.mrb[64].mxu1 %vm4738_vm9, %v7232_v59  ;;  %v5085_v59 = vld [vmem:[%s9222_s17 + $0x10] sm:$0xff] }
0x1c85   : > { %6601 = vmatpush3.bf16.msra.mxu1 %v8914_v39 }
0x1c86   : > { %6583 = vmatpush3.bf16.msra.mxu0 %v8920_v45  ;;  %6602 = vmatprep.subr.bf16.mxu1 %v8925_v0 }
0x1c87   : > { %6584 = vmatprep.subr.bf16.mxu0 %v8931_v3 }
0x1c89   : > { %6603 = vmatpush3.bf16.msra.mxu1 %v8938_v36 }
0x1c8a   : > { %6585 = vmatpush3.bf16.msra.mxu0 %v8945_v60  ;;  %6604 = vmatprep.subr.bf16.mxu1 %v8950_v29 }
0x1c8b   : > { %6586 = vmatprep.subr.bf16.mxu0 %v8956_v53 }
0x1c8d   : > { %6605 = vmatpush3.bf16.msra.mxu1 %v8962_v4 }
0x1c8e   : > { %6587 = vmatpush3.bf16.msra.mxu0 %v8969_v54  ;;  %6606 = vmatprep.subr.bf16.mxu1 %v8982_v6 }
0x1c8f   : > { %6588 = vmatprep.subr.bf16.mxu0 %v8977_v55 }
0x1c91   : > { %6607 = vmatpush3.bf16.msra.mxu1 %v8992_v21 }
0x1c92   : > { %6589 = vmatpush3.bf16.msra.mxu0 %v8987_v57  ;;  %6608 = vmatprep.subr.bf16.mxu1 %v9006_v18 }
0x1c93   : > { %6590 = vmatprep.subr.bf16.mxu0 %v9001_v7 }
0x1c95   : > { %6609 = vmatpush3.bf16.msra.mxu1 %v9016_v8 }
0x1c96   : > { %6591 = vmatpush3.bf16.msra.mxu0 %v9011_v30  ;;  %6610 = vmatprep.subr.bf16.mxu1 %v9028_v10 }
0x1c97   : > { %6592 = vmatprep.subr.bf16.mxu0 %v9023_v9 }
0x1c99   : > { %6611 = vmatpush3.bf16.msra.mxu1 %v9040_v12 }
0x1c9a   : > { %6593 = vmatpush3.bf16.msra.mxu0 %v9035_v11  ;;  %6612 = vmatprep.subr.bf16.mxu1 %v9049_v13 }
0x1c9b   : > { %6622 = vmatprep.subr.bf16.mxu0 %v8866_v46 }
0x1c9d   : > { %6613 = vmatpush3.bf16.msra.mxu1 %v9054_v40 }
0x1c9e   : > { %6614 = vmatprep.subr.bf16.mxu1 %v9060_v14 }
0x1ca1   : > { %6615 = vmatpush3.bf16.msra.mxu1 %v9067_v5 }
0x1ca2   : > { %6644 = vmatprep.subr.bf16.mxu1 %v8888_v62 }
0x1d47   : > { %v4927_v15 = vpop.f32.mrb[52].mxu0 }
0x1d48   : > { %v4929_v63 = vpop.f32.mrb[53].mxu0  ;;  %v5091_v1 = vmul.f32 %v5075_v20, %v4927_v15  ;;  %v5115_v26 = vmul.f32 %v5083_v22, %v4927_v15 }
0x1d49   : > { %v4931_v27 = vpop.f32.mrb[54].mxu0  ;;  %v5092_v28 = vmul.f32 %v5076_v23, %v4929_v63  ;;  %v5116_v32 = vmul.f32 %v5084_v25, %v4929_v63 }
0x1d4a   : > { %v4933_v19 = vpop.f32.mrb[55].mxu0  ;;  %v5095_v38 = vmul.f32 %v5079_v33, %v4931_v27  ;;  %v5119_v51 = vmul.f32 %v5087_v35, %v4931_v27  ;;  %v5086_v27 = vld [vmem:[%s9222_s17 + $0x18] sm:$0xff] }
0x1d4b   : > { %v5096_v2 = vmul.f32 %v5080_v42, %v4933_v19  ;;  %v5120_v49 = vmul.f32 %v5088_v44, %v4933_v19  ;;  %v5082_v19 = vld [vmem:[%s9221_s16 + $0x38] sm:$0x1] }
0x1d4f   : > { %v4970_v48 = vpop.f32.mrb[60].mxu1  ;;  %v5023_v17 = vpop.f32.mrb[56].mxu0 }
0x1d50   : > { %v5099_v37 = vmul.f32 %v5083_v22, %v5023_v17  ;;  %v5123_v16 = vmul.f32 %v5075_v20, %v5023_v17  ;;  %v4972_v24 = vpop.f32.mrb[61].mxu1  ;;  %v5025_v41 = vpop.f32.mrb[57].mxu0  ;;  %v5078_v22 = vld [vmem:[%s9221_s16 + $0x18] sm:$0xff]  ;;  %v5093_v43 = vmul.f32 %v5077_v58, %v4970_v48  ;;  %v5117_v5 = vmul.f32 %v5085_v59, %v4970_v48 }
0x1d51   : > { %v5100_v34 = vmul.f32 %v5084_v25, %v5025_v41  ;;  %v5124_v46 = vmul.f32 %v5076_v23, %v5025_v41  ;;  %v4974_v47 = vpop.f32.mrb[62].mxu1  ;;  %v5027_v50 = vpop.f32.mrb[58].mxu0 }
0x1d52   : > { %v5107_v62 = vsub.f32 %v5091_v1, %v5099_v37  ;;  %v9102_v15 = vadd.f32 %v5123_v16, %v5115_v26  ;;  %v4976_v63 = vpop.f32.mrb[63].mxu1  ;;  %v5029_v20 = vpop.f32.mrb[59].mxu0  ;;  %v5103_v17 = vmul.f32 %v5087_v35, %v5027_v50  ;;  %v5127_v41 = vmul.f32 %v5079_v33, %v5027_v50  ;;  %v5081_v1 = vld [vmem:[%s9221_s16 + $0x30] sm:$0x1]  ;;  %v5090_v33 = vld [vmem:[%s9222_s17 + $0x38] sm:$0x1] }
0x1d53   : > { %v5108_v23 = vsub.f32 %v5092_v28, %v5100_v34  ;;  %v5132_v25 = vadd.f32 %v5124_v46, %v5116_v32  ;;  %v5089_v26 = vld [vmem:[%s9222_s17 + $0x30] sm:$0x1]  ;;  %v5104_v37 = vmul.f32 %v5088_v44, %v5029_v20  ;;  %v5128_v16 = vmul.f32 %v5080_v42, %v5029_v20 }
0x1d54   : > { %v5111_v14 = vsub.f32 %v5095_v38, %v5103_v17  ;;  %v9116_v40 = vadd.f32 %v5127_v41, %v5119_v51  ;;  %v5094_v28 = vmul.f32 %v5078_v22, %v4972_v24  ;;  %v5118_v32 = vmul.f32 %v5086_v27, %v4972_v24 }
0x1d55   : > { %v5112_v35 = vsub.f32 %v5096_v2, %v5104_v37  ;;  %v5136_v34 = vadd.f32 %v5128_v16, %v5120_v49  ;;  %v5097_v46 = vmul.f32 %v5081_v1, %v4974_v47  ;;  %v5121_v44 = vmul.f32 %v5089_v26, %v4974_v47 }
0x1d56   : > { %v5203_v42 = vpack.c.bf16 %v5111_v14, %v5107_v62  ;;  %v5481_v48 = vpack.c.bf16 %v9116_v40, %v9102_v15  ;;  %v5098_v41 = vmul.f32 %v5082_v19, %v4976_v63  ;;  %v5122_v13 = vmul.f32 %v5090_v33, %v4976_v63 }
0x1d57   : > { %v5066_v50 = vpop.f32.mrb[64].mxu1  ;;  %v5204_v20 = vpack.c.bf16 %v5112_v35, %v5108_v23  ;;  %v5482_v17 = vpack.c.bf16 %v5136_v34, %v5132_v25 }
0x1d58   : > { %v5101_v38 = vmul.f32 %v5085_v59, %v5066_v50  ;;  %v5125_v51 = vmul.f32 %v5077_v58, %v5066_v50  ;;  %v5068_v24 = vpop.f32.mrb[65].mxu1 }
0x1d59   : > { %v5102_v11 = vmul.f32 %v5086_v27, %v5068_v24  ;;  %v5126_v12 = vmul.f32 %v5078_v22, %v5068_v24  ;;  %v5070_v9 = vpop.f32.mrb[66].mxu1  ;;  %5431 = vmatprep.mubr.bf16.mxu0 %v5204_v20  ;;  %v7265_v20 = vld [vmem:[%s9225_s20] sm:$0xff]  }
0x1d5a   : > { %v5109_v10 = vsub.f32 %v5093_v43, %v5101_v38  ;;  %v5133_v2 = vadd.f32 %v5125_v51, %v5117_v5  ;;  %v5105_v49 = vmul.f32 %v5089_v26, %v5070_v9  ;;  %v5129_v37 = vmul.f32 %v5081_v1, %v5070_v9  ;;  %v5072_v14 = vpop.f32.mrb[67].mxu1  ;;  %5432 = vmatmul.mubr.bf16.vlgmr.msra.gmra.mrb[60].mxu0 %v5203_v42  ;;  %v7266_v1 = vld [vmem:[%s9224_s19] sm:$0xff]  }
0x1d5b   : > { %v5110_v47 = vsub.f32 %v5094_v28, %v5102_v11  ;;  %v5134_v62 = vadd.f32 %v5126_v12, %v5118_v32  ;;  %v5106_v40 = vmul.f32 %v5090_v33, %v5072_v14  ;;  %v5130_v15 = vmul.f32 %v5082_v19, %v5072_v14  ;;  %6623 = vmatpush3.bf16.msra.mxu0 %v8883_v61  ;;  %v9288_v61 = vld [vmem:[#allocation6_spill] sm:$0xff]  ;;  %v7268_v14 = vld [vmem:[%s9227_s22 + $0x8] sm:$0xff]  }
0x1d5c   : > { %v5113_v58 = vsub.f32 %v5097_v46, %v5105_v49  ;;  %v5137_v59 = vadd.f32 %v5129_v37, %v5121_v44  ;;  %5517 = vmatprep.mubr.bf16.mxu0 %v5482_v17  ;;  %6624 = vmatprep.subr.bf16.mxu0 %v8893_v31  ;;  %v9289_v31 = vld [vmem:[#allocation5_spill] sm:$0xff]  ;;  %v7267_v17 = vld [vmem:[%s9227_s22] sm:$0xff]  }
0x1d5d   : > { %v5114_v63 = vsub.f32 %v5098_v41, %v5106_v40  ;;  %v5138_v27 = vadd.f32 %v5130_v15, %v5122_v13  ;;  %v5682_v15 = vld [vmem:[%s9226_s21] sm:$0xff] }
0x1d5e   : > { %v5205_v43 = vpack.c.bf16 %v5113_v58, %v5109_v10  ;;  %v5483_v5 = vpack.c.bf16 %v5137_v59, %v5133_v2  ;;  %v7375_v10 = vmov 65535   ;;  %v5683_v59 = vld [vmem:[%s9226_s21 + $0x8] sm:$0xff] }
0x1d5f   : > { %v5206_v22 = vpack.c.bf16 %v5114_v63, %v5110_v47  ;;  %v5484_v9 = vpack.c.bf16 %v5138_v27, %v5134_v62  ;;  %6625 = vmatpush3.bf16.msra.mxu0 %v8902_v56  ;;  %v9290_v56 = vld [vmem:[#allocation8_spill] sm:$0xff]  ;;  %v5584_v11 = vsel %vm5582_vm0, 4294967295, %v7375_v10 }
0x1d60   : > { %6626 = vmatprep.subr.bf16.mxu0 %v8909_v52  ;;  %v9291_v52 = vld [vmem:[#allocation7_spill] sm:$0xff]  ;;  %v5585_v13 = vsel %vm5583_vm11, %v5584_v11, 0 }
0x1d61   : > { %5472 = vmatprep.mubr.bf16.mxu1 %v5206_v22 }
0x1d62   : > { %5473 = vmatmul.mubr.bf16.vlgmr.msra.gmra.mrb[68].mxu1 %v5205_v43 }
0x1d63   : > { %6645 = vmatpush3.bf16.msra.mxu1 %v8914_v39  ;;  %5558 = vmatprep.mubr.bf16.mxu1 %v5484_v9  ;;  %v9292_v39 = vld [vmem:[#allocation9_spill] sm:$0xff] }
0x1d64   : > { %6627 = vmatpush3.bf16.msra.mxu0 %v8920_v45  ;;  %6646 = vmatprep.subr.bf16.mxu1 %v8925_v0  ;;  %v9293_v45 = vmov 0.0   ;;  %v9294_v0 = vld [vmem:[#allocation10_spill] sm:$0xff] }
0x1d65   : > { %6628 = vmatprep.subr.bf16.mxu0 %v8931_v3  ;;  %v9295_v3 = vld [vmem:[#allocation11_spill] sm:$0xff] }
0x1d67   : > { %6647 = vmatpush3.bf16.msra.mxu1 %v8938_v36  ;;  %v9296_v36 = vld [vmem:[#allocation12_spill] sm:$0xff] }
0x1d68   : > { %6629 = vmatpush3.bf16.msra.mxu0 %v8945_v60  ;;  %6648 = vmatprep.subr.bf16.mxu1 %v8950_v29 }
0x1d69   : > { %6630 = vmatprep.subr.bf16.mxu0 %v8956_v53 }
0x1d6b   : > { %6649 = vmatpush3.bf16.msra.mxu1 %v8962_v4 }
0x1d6c   : > { %6631 = vmatpush3.bf16.msra.mxu0 %v8969_v54  ;;  %6650 = vmatprep.subr.bf16.mxu1 %v8982_v6 }
0x1d6d   : > { %6632 = vmatprep.subr.bf16.mxu0 %v8977_v55 }
0x1d6f   : > { %6651 = vmatpush3.bf16.msra.mxu1 %v8992_v21 }
0x1d70   : > { %6633 = vmatpush3.bf16.msra.mxu0 %v8987_v57  ;;  %6652 = vmatprep.subr.bf16.mxu1 %v9006_v18 }
0x1d71   : > { %6634 = vmatprep.subr.bf16.mxu0 %v9001_v7 }
0x1d73   : > { %6653 = vmatpush3.bf16.msra.mxu1 %v9016_v8 }
0x1d74   : > { %6635 = vmatpush3.bf16.msra.mxu0 %v9011_v30  ;;  %6654 = vmatprep.subr.bf16.mxu1 %v9288_v61 }
0x1d75   : > { %6636 = vmatprep.subr.bf16.mxu0 %v9289_v31 }
0x1d77   : > { %6655 = vmatpush3.bf16.msra.mxu1 %v9290_v56  ;;  %v9297_v56 = vld [vmem:[#allocation3_spill] sm:$0xff] }
0x1d78   : > { %6637 = vmatpush3.bf16.msra.mxu0 %v9291_v52  ;;  %6656 = vmatprep.subr.bf16.mxu1 %v9292_v39  ;;  %v9298_v39 = vld [vmem:[#allocation4_spill] sm:$0xff] }
0x1d79   : > { %6867 = vmatprep.subr.bf16.mxu0 %v9293_v45 }
0x1d7b   : > { %5518 = vmatmul.mubr.bf16.vlgmr.msra.gmra.mrb[64].mxu0 %v5481_v48  ;;  %6657 = vmatpush3.bf16.msra.mxu1 %v9294_v0 }
0x1d7c   : > { %6658 = vmatprep.subr.bf16.mxu1 %v9295_v3  ;;  %6869 = vmatprep.mubr.msk.bf16.mxu0 %vm7368_vm1, %v9293_v45  ;;  %v6448_v3 = vld [vmem:[%s9228_s23] ss:$0 sm:$0xff] }
0x1d7f   : > { %6659 = vmatpush3.bf16.msra.mxu1 %v9296_v36 }
0x1d80   : > { %6873 = vmatprep.subr.bf16.mxu1 %v9293_v45 }
0x1d82   : > { %5559 = vmatmul.mubr.bf16.vlgmr.msra.gmra.mrb[72].mxu1 %v5483_v5 }
0x1d83   : > { %6875 = vmatprep.mubr.msk.bf16.mxu1 %vm7368_vm1, %v9293_v45 }
0x1e2d   : > { %v6594_v60 = vpop.f32.mrb[60].mxu0 }
0x1e2e   : > { %v6595_v29 = vpop.f32.mrb[61].mxu0 }
0x1e2f   : > { %v6596_v53 = vadd.f32 %v6595_v29, %v6594_v60  ;;  %v6597_v4 = vpop.f32.mrb[62].mxu0 }
0x1e30   : > { %v6598_v54 = vpop.f32.mrb[63].mxu0 }
0x1e31   : > { %v6599_v55 = vadd.f32 %v6598_v54, %v6597_v4  ;;  %v7357_v4 = vld [vmem:[%s7530_s4] sm:$0xff] }
0x1e35   : > { %v6616_v6 = vpop.f32.mrb[68].mxu1 }
0x1e36   : > { %v6617_v57 = vpop.f32.mrb[69].mxu1 }
0x1e37   : > { %v6618_v21 = vadd.f32 %v6617_v57, %v6616_v6  ;;  %v6619_v7 = vpop.f32.mrb[70].mxu1  ;;  %v7358_v57 = vld [vmem:[%s7530_s4 + $0x8] sm:$0xff] }
0x1e38   : > { %v6620_v18 = vpop.f32.mrb[71].mxu1 }
0x1e39   : > { %v5475_v30 = vadd.f32 %v6618_v21, %v6596_v53  ;;  %v6621_v8 = vadd.f32 %v6620_v18, %v6619_v7 }
0x1e3b   : > { %v5478_v12 = vadd.f32 %v6621_v8, %v6599_v55 }
0x1e3d   : > { %v5569_v23 = vpack.c.bf16 %v5478_v12, %v5475_v30 }
0x1e3f   : > { %v5639_v25 = vand.u32 %v5585_v13, %v5569_v23 }
0x1e41   : > { %6874 = vmatpush3.bf16.msra.mxu1 %v5639_v25 }
0x1e44   : > { %6876 = vmatmul.mubr.msk.bf16.vlgmr.msra.gmra.mrb[76].mxu1 %vm5578_vm14, %v7266_v1 }
0x1e4e   : > { %v6638_v26 = vpop.f32.mrb[64].mxu0 }
0x1e4f   : > { %v6639_v16 = vpop.f32.mrb[65].mxu0 }
0x1e50   : > { %v6640_v28 = vadd.f32 %v6639_v16, %v6638_v26  ;;  %v6641_v32 = vpop.f32.mrb[66].mxu0 }
0x1e51   : > { %v6642_v19 = vpop.f32.mrb[67].mxu0 }
0x1e52   : > { %v6643_v33 = vadd.f32 %v6642_v19, %v6641_v32 }
0x1e55   : > { %v6660_v35 = vpop.f32.mrb[72].mxu1 }
0x1e56   : > { %v6661_v34 = vpop.f32.mrb[73].mxu1 }
0x1e57   : > { %v6662_v46 = vadd.f32 %v6661_v34, %v6660_v35  ;;  %v6663_v44 = vpop.f32.mrb[74].mxu1 }
0x1e58   : > { %v6664_v42 = vpop.f32.mrb[75].mxu1 }
0x1e59   : > { %v5561_v48 = vadd.f32 %v6662_v46, %v6640_v28  ;;  %v6665_v50 = vadd.f32 %v6664_v42, %v6663_v44 }
0x1e5b   : > { %v5564_v38 = vadd.f32 %v6665_v50, %v6643_v33 }
0x1e5d   : > { %v5572_v51 = vpack.c.bf16 %v5564_v38, %v5561_v48 }
0x1e5f   : > { %v5587_v24 = vand.u32 %v5585_v13, %v5572_v51 }
0x1e61   : > { %6868 = vmatpush3.bf16.msra.mxu0 %v5587_v24 }
0x1e62   : > { %6879 = vmatprep.subr.bf16.mxu0 %v9293_v45 }
0x1e64   : > { %6870 = vmatmul.mubr.msk.bf16.vlgmr.msra.gmra.mrb[68].mxu0 %vm5578_vm14, %v7265_v20 }
0x1e65   : > { %6883 = vmatprep.mubr.msk.bf16.mxu0 %vm7368_vm1, %v9293_v45  ;;  %6880 = vmatpush3.bf16.msra.mxu0 %v7267_v17  ;;  %vm5774_vm1 = vcmask 7168  }
0x1e66   : > { %6881 = vmatprep.subr.bf16.mxu0 %v9293_v45 }
0x1e69   : > { %6882 = vmatpush3.bf16.msra.mxu0 %v7268_v14 }
0x1f17   : > { %v5675_v41 = vpop.f32.mrb[76].mxu1 }
0x1f18   : > { %v6877_v2 = vpop.f32.mrb[77].mxu1 }
0x1f19   : > { %v5678_v49 = vpop.f32.mrb[78].mxu1 }
0x1f1a   : > { %v6878_v37 = vpop.f32.mrb[79].mxu1 }
0x1f37   : > { %v5623_v47 = vpop.f32.mrb[68].mxu0 }
0x1f38   : > { %v5676_v62 = vadd.f32 %v5675_v41, %v5623_v47  ;;  %v6871_v40 = vpop.f32.mrb[69].mxu0 }
0x1f39   : > { %v5626_v58 = vpop.f32.mrb[70].mxu0 }
0x1f3a   : > { %v5679_v63 = vadd.f32 %v5678_v49, %v5626_v58  ;;  %v6872_v27 = vpop.f32.mrb[71].mxu0  ;;  %v5684_v43 = vadd.f32 %v5682_v15, %v5676_v62 }
0x1f3c   : > { %v5685_v5 = vadd.f32 %v5683_v59, %v5679_v63 }
0x1f3e   : > { %v7023_v22 = vpack.i.bf16 %v5685_v5, %v5684_v43 }
0x1f40   : > { %7024 = vrot.lane.b32.xlu0 %v7023_v22, %s7376_s7 }
0x1fb2   : > { %v7025_v9 = vpop.permute.xlu0 %7024 }
0x1fb3   : > { %v7027_v61 = vunpack.i.h.bf16 %v7025_v9  ;;  %v7026_v31 = vunpack.i.l.bf16 %v7025_v9 }
0x1fb5   : > { %v5694_v52 = vsel %vm4738_vm9, %v9297_v56, %v7026_v31  ;;  %v5695_v45 = vsel %vm4738_vm9, %v9298_v39, %v7027_v61 }
0x1fb6   : > { %v5700_v0 = vpack.c.bf16 %v5695_v45, %v5694_v52 }
0x1fb8   : > { %6884 = vmatmul.mubr.msk.bf16.vlgmr.msra.gmra.mrb[72].mxu0 %vm908_vm7, %v5700_v0 }
0x208b   : > { %v5757_v36 = vpop.f32.mrb[72].mxu0 }
0x208c   : > { %v5758_v60 = vadd.f32 %v6448_v3, %v5757_v36  ;;  %v6885_v29 = vpop.f32.mrb[73].mxu0 }
0x208d   : > { %v5760_v53 = vpop.f32.mrb[74].mxu0 }
0x208e   : > { %v5764_v54 = vsub.f32 %v5758_v60, %v7357_v4  ;;  %v5761_v55 = vadd.f32 %v6448_v3, %v5760_v53  ;;  %v6886_v6 = vpop.f32.mrb[75].mxu0 }
0x2090   : > { %v5765_v21 = vsub.f32 %v5761_v55, %v7358_v57  ;;  %v5766_v7 = vmul.f32 %v5764_v54, %v5764_v54 }
0x2092   : > { %v5768_v18 = vsel %vm814_vm4, %v5766_v7, 0.0  ;;  %v5767_v30 = vmul.f32 %v5765_v21, %v5765_v21 }
0x2093   : > { %5769 = vadd.xlane.f32.xlu1 %v5768_v18 }
0x2094   : > { %v5771_v8 = vsel %vm814_vm4, %v5767_v30, 0.0 }
0x2095   : > { %5772 = vadd.xlane.f32.xlu0 %v5771_v8 }
0x2120   : > { %v5770_v10 = vpop.xlane.xlu1 %5769 }
0x2121   : > { %5775 = vst.msk [vmem:[%s780_s2] sm:$0xff] %vm5774_vm1, %v5770_v10 }
0x2122   : > { %v5773_v11 = vpop.xlane.xlu0 %5772 }
0x2123   : > { %5776 = vst.msk [vmem:[%s780_s2 + $0x8] sm:$0xff] %vm5774_vm1, %v5773_v11 }
0x2124 PF: > { %s9300_s4 = sld [smem:[#allocation2_spill]] }
0x212a   : > { %s36_s29 = sadd.s32 1, %s9300_s4  }
0x212b   : > { %p33_p4 = scmp.ge.s32.totalorder %s36_s29, 4  }
0x212d   :  { %35 = sbr.rel (!%p33_p4) target bundleno = 12 (0xc), region = 198 }

</bundles_post_ra>
